<compile_context>
chip_gen: v6e
topology: v6e:2x2x1
jax: 0.10.0
libtpu: 0.0.40
codegen_flags: <defaults>
</compile_context>

<pallas_src>
import functools

import jax
import jax.numpy as jnp
from jax.experimental import pallas as pl
from jax.experimental.pallas import tpu as pltpu

# MXU input dtype: bf16 inputs + f32 accumulation (v6e/v7x MXU peak is bf16;
# epilogue math stays f32 so v5e's f32-only VPU is also happy).
MXU_DTYPE = jnp.bfloat16

# Row tile for the matmul grid (multiple of 8 sublanes).  Double-buffered
# blocks for the worst case (fc1: K=1152, N=128) are ~6 MiB, well under the
# 32 MiB scoped-VMEM budget even on v7x (64 MiB physical).
TILE_M = 512
# Batch tile for the pooling kernel.
POOL_TB = 8
VMEM_LIMIT_BYTES = 32 * 1024 * 1024


# --------------------------------------------------------------------------
# Fused matmul + bias (+ ReLU) kernel, tiled & pipelined over M.
# --------------------------------------------------------------------------
def _matmul_bias_kernel(x_ref, w_ref, b_ref, o_ref, *, relu):
    x = x_ref[...].astype(MXU_DTYPE)
    w = w_ref[...].astype(MXU_DTYPE)
    y = jnp.dot(x, w, preferred_element_type=jnp.float32)   # f32 accumulate
    y = y + b_ref[...]                                       # f32 epilogue
    if relu:
        y = jnp.maximum(y, 0.0)
    o_ref[...] = y.astype(o_ref.dtype)


def matmul_bias(x, w, b, relu):
    """x: (M, K) @ w: (K, N) + b, optional fused ReLU.  Grid over M rows."""
    M, K = x.shape
    _, N = w.shape
    tm = M if M <= TILE_M else TILE_M          # TILE_M is a multiple of 8
    grid = (pl.cdiv(M, tm),)
    return pl.pallas_call(
        functools.partial(_matmul_bias_kernel, relu=relu),
        out_shape=jax.ShapeDtypeStruct((M, N), jnp.float32),
        grid_spec=pltpu.PrefetchScalarGridSpec(
            num_scalar_prefetch=0,
            grid=grid,
            in_specs=[
                pl.BlockSpec((tm, K), lambda i: (i, 0)),   # activations: streamed
                pl.BlockSpec((K, N), lambda i: (0, 0)),    # weights: resident
                pl.BlockSpec((1, N), lambda i: (0, 0)),    # bias: resident
            ],
            out_specs=pl.BlockSpec((tm, N), lambda i: (i, 0)),
        ),
        compiler_params=pltpu.CompilerParams(
            dimension_semantics=("parallel",),             # 2 TCs on v7x
            vmem_limit_bytes=VMEM_LIMIT_BYTES,
        ),
    )(x, w, b.reshape(1, N))


# --------------------------------------------------------------------------
# Conv (valid, stride 1) + ReLU as im2col + the tiled matmul kernel above.
# --------------------------------------------------------------------------
def conv2d_relu(x, w2d, b, kh=3, kw=3):
    """x: (B, H, W, Cin) NHWC; w2d: (kh*kw*Cin, Cout) with (kh, kw, cin) row order."""
    B, H, W, Cin = x.shape
    Cout = w2d.shape[1]
    OH, OW = H - kh + 1, W - kw + 1
    # im2col glue (XLA).  K ordering is (kh, kw, cin), matching w2d's rows.
    cols = [x[:, i:i + OH, j:j + OW, :] for i in range(kh) for j in range(kw)]
    patches = jnp.concatenate(cols, axis=-1).reshape(B * OH * OW, kh * kw * Cin)
    y = matmul_bias(patches, w2d, b, relu=True)
    return y.reshape(B, OH, OW, Cout)


# --------------------------------------------------------------------------
# 2x2 max pool, stride 2, floor mode.  Single-input, batch-gridded kernel.
# The caller folds the W-parity into the lane dim (a free contiguous reshape),
# so the kernel only needs static contiguous slices — no strided loads and no
# XLA-materialized strided copies of the conv output.
# --------------------------------------------------------------------------
def _maxpool2x2_kernel(x_ref, o_ref):
    # x_ref: (TB, 2*PH, PW, 2*C)   o_ref: (TB, PH, PW, C)
    ph_out = o_ref.shape[1]
    c = o_ref.shape[3]
    for ph in range(ph_out):                       # static unroll, PH <= 13
        x00 = x_ref[:, 2 * ph, :, 0:c]             # (h even, w even)
        x01 = x_ref[:, 2 * ph, :, c:2 * c]         # (h even, w odd)
        x10 = x_ref[:, 2 * ph + 1, :, 0:c]         # (h odd,  w even)
        x11 = x_ref[:, 2 * ph + 1, :, c:2 * c]     # (h odd,  w odd)
        o_ref[:, ph, :, :] = jnp.maximum(jnp.maximum(x00, x01),
                                         jnp.maximum(x10, x11))


def maxpool2x2(x):
    """x: (B, H, W, C) NHWC -> (B, H//2, W//2, C)."""
    B, H, W, C = x.shape
    PH, PW = H // 2, W // 2
    x = x[:, :2 * PH, :2 * PW, :]                  # floor-mode crop (no-op if even)
    x = x.reshape(B, 2 * PH, PW, 2 * C)            # fold W-pairs into lanes (free)
    tb = B if B <= POOL_TB else POOL_TB
    grid = (pl.cdiv(B, tb),)
    return pl.pallas_call(
        _maxpool2x2_kernel,
        out_shape=jax.ShapeDtypeStruct((B, PH, PW, C), x.dtype),
        grid_spec=pltpu.PrefetchScalarGridSpec(
            num_scalar_prefetch=0,
            grid=grid,
            in_specs=[pl.BlockSpec((tb, 2 * PH, PW, 2 * C),
                                   lambda i: (i, 0, 0, 0))],
            out_specs=pl.BlockSpec((tb, PH, PW, C), lambda i: (i, 0, 0, 0)),
        ),
        compiler_params=pltpu.CompilerParams(
            dimension_semantics=("parallel",),
            vmem_limit_bytes=VMEM_LIMIT_BYTES,
        ),
    )(x)


# --------------------------------------------------------------------------
# Parameters (PyTorch-style uniform(-1/sqrt(fan_in), 1/sqrt(fan_in)) init).
# --------------------------------------------------------------------------
def init_params(key):
    ks = jax.random.split(key, 10)

    def u(k, shape, fan_in):
        bound = 1.0 / jnp.sqrt(jnp.float32(fan_in))
        return jax.random.uniform(k, shape, jnp.float32, -bound, bound)

    w1 = u(ks[0], (3, 3, 1, 32), 9 * 1)
    b1 = u(ks[1], (32,), 9 * 1)
    w2 = u(ks[2], (3, 3, 32, 64), 9 * 32)
    b2 = u(ks[3], (64,), 9 * 32)
    w3 = u(ks[4], (3, 3, 64, 128), 9 * 64)
    b3 = u(ks[5], (128,), 9 * 64)

    # fc1: PyTorch flattens the conv3 output in (C, H, W) order.  Generate the
    # weight with that row order, then fold the NCHW->NHWC flatten permutation
    # into the weight once here so the forward pass consumes the NHWC flatten
    # directly (no runtime activation transpose before fc1).
    wf1_chw = u(ks[6], (128 * 3 * 3, 128), 128 * 3 * 3)        # rows in (c, h, w) order
    wf1 = wf1_chw.reshape(128, 3, 3, 128).transpose(1, 2, 0, 3).reshape(1152, 128)
    bf1 = u(ks[7], (128,), 128 * 3 * 3)

    # fc2: pad N from 10 -> 128 so the output store is a full 128-lane slab; the
    # wrapper slices the 10 real logits back out.
    wf2 = jnp.zeros((128, 128), jnp.float32).at[:, :10].set(u(ks[8], (128, 10), 128))
    bf2 = jnp.zeros((128,), jnp.float32).at[:10].set(u(ks[9], (10,), 128))

    cast = lambda a: a.astype(MXU_DTYPE)            # weights stored in MXU dtype
    return {
        "w1": cast(w1.reshape(9 * 1, 32)), "b1": b1,
        "w2": cast(w2.reshape(9 * 32, 64)), "b2": b2,
        "w3": cast(w3.reshape(9 * 64, 128)), "b3": b3,
        "wf1": cast(wf1), "bf1": bf1,
        "wf2": cast(wf2), "bf2": bf2,
    }


# --------------------------------------------------------------------------
# Forward pass (matches CNN2.forward on NCHW input of shape (B, 1, 28, 28)).
# --------------------------------------------------------------------------
@jax.jit
def cnn2_forward(params, x_nchw):
    B = x_nchw.shape[0]
    x = jnp.transpose(x_nchw, (0, 2, 3, 1))                 # NCHW -> NHWC (unit C: free)
    t = conv2d_relu(x, params["w1"], params["b1"])          # (B, 26, 26, 32)
    t = maxpool2x2(t)                                       # (B, 13, 13, 32)
    t = conv2d_relu(t, params["w2"], params["b2"])          # (B, 11, 11, 64)
    t = maxpool2x2(t)                                       # (B, 5, 5, 64)
    t = conv2d_relu(t, params["w3"], params["b3"])          # (B, 3, 3, 128)
    t = t.reshape(B, 3 * 3 * 128)                           # NHWC flatten (wf1 pre-permuted)
    t = matmul_bias(t, params["wf1"], params["bf1"], relu=True)    # (B, 128)
    t = matmul_bias(t, params["wf2"], params["bf2"], relu=False)   # (B, 128) padded
    return t[:, :10]                                        # 10 real logits


if __name__ == "__main__":
    key = jax.random.PRNGKey(0)
    pkey, xkey = jax.random.split(key)
    params = init_params(pkey)
    x = jax.random.normal(xkey, (2, 1, 28, 28), jnp.float32)
    out = cnn2_forward(params, x)
    jax.block_until_ready(out)
    assert out.shape == (2, 10), out.shape
    assert bool(jnp.all(jnp.isfinite(out)))
    print("KERNEL_OK")
</pallas_src>

<mosaic_0001>
module attributes {stable_mosaic.version = 11 : i64} {
  func.func @_matmul_bias_kernel(%arg0: i32, %arg1: memref<512x9xf32, #tpu.memory_space<vmem>>, %arg2: memref<9x32xbf16, #tpu.memory_space<vmem>>, %arg3: memref<1x32xf32, #tpu.memory_space<vmem>>, %arg4: memref<512x32xf32, #tpu.memory_space<vmem>>) attributes {dimension_semantics = [#tpu.dimension_semantics<parallel>], iteration_bounds = array<i64: 3>, scalar_prefetch = 0 : i64, scratch_operands = 0 : i64, tpu.core_type = #tpu.core_type<tc>, window_params = [{transform_indices = @transform_0, window_bounds = array<i64: 512, 9>}, {pipeline_mode = #tpu.pipeline_mode<synchronous>, transform_indices = @transform_1, window_bounds = array<i64: 9, 32>}, {pipeline_mode = #tpu.pipeline_mode<synchronous>, transform_indices = @transform_2, window_bounds = array<i64: 1, 32>}, {transform_indices = @transform_3, window_bounds = array<i64: 512, 32>}]} {
    %c0 = arith.constant 0 : index
    %c0_0 = arith.constant 0 : index
    %0 = vector.load %arg1[%c0, %c0_0] : memref<512x9xf32, #tpu.memory_space<vmem>>, vector<512x9xf32>
    %1 = arith.truncf %0 : vector<512x9xf32> to vector<512x9xbf16>
    %c0_1 = arith.constant 0 : index
    %c0_2 = arith.constant 0 : index
    %2 = vector.load %arg2[%c0_1, %c0_2] : memref<9x32xbf16, #tpu.memory_space<vmem>>, vector<9x32xbf16>
    %cst = arith.constant dense<0.000000e+00> : vector<512x32xf32>
    %3 = tpu.matmul %1, %2, %cst {dimension_numbers = #tpu.dot_dimension_numbers<[1], [0], [0], [1], [0, 0, 1, 1], [], []>} : vector<512x9xbf16>, vector<9x32xbf16>, vector<512x32xf32> -> vector<512x32xf32>
    %c0_3 = arith.constant 0 : index
    %c0_4 = arith.constant 0 : index
    %4 = vector.load %arg3[%c0_3, %c0_4] : memref<1x32xf32, #tpu.memory_space<vmem>>, vector<1x32xf32>
    %5 = vector.broadcast %4 : vector<1x32xf32> to vector<512x32xf32>
    %6 = arith.addf %3, %5 : vector<512x32xf32>
    %cst_5 = arith.constant 0.000000e+00 : f32
    %7 = vector.broadcast %cst_5 : f32 to vector<512x32xf32>
    %8 = arith.maximumf %6, %7 : vector<512x32xf32>
    %c0_6 = arith.constant 0 : index
    %c0_7 = arith.constant 0 : index
    %9 = vector.load %arg4[%c0_6, %c0_7] : memref<512x32xf32, #tpu.memory_space<vmem>>, vector<512x32xf32>
    tpu.vector_store %arg4[%c0_6, %c0_7], %8 {strides = array<i32>} : memref<512x32xf32, #tpu.memory_space<vmem>>, vector<512x32xf32>,
    return
  }
  func.func @transform_0(%arg0: i32) -> (i32, i32) {
    %c0_i32 = arith.constant 0 : i32
    %c0_i32_0 = arith.constant 0 : i32
    return %arg0, %c0_i32 : i32, i32
  }
  func.func @transform_1(%arg0: i32) -> (i32, i32) {
    %c0_i32 = arith.constant 0 : i32
    %c0_i32_0 = arith.constant 0 : i32
    %c0_i32_1 = arith.constant 0 : i32
    return %c0_i32, %c0_i32_0 : i32, i32
  }
  func.func @transform_2(%arg0: i32) -> (i32, i32) {
    %c0_i32 = arith.constant 0 : i32
    %c0_i32_0 = arith.constant 0 : i32
    %c0_i32_1 = arith.constant 0 : i32
    return %c0_i32, %c0_i32_0 : i32, i32
  }
  func.func @transform_3(%arg0: i32) -> (i32, i32) {
    %c0_i32 = arith.constant 0 : i32
    %c0_i32_0 = arith.constant 0 : i32
    return %arg0, %c0_i32 : i32, i32
  }
}

module attributes {stable_mosaic.version = 11 : i64} {
  func.func @_maxpool2x2_kernel(%arg0: i32, %arg1: memref<2x26x13x64xf32, #tpu.memory_space<vmem>>, %arg2: memref<2x13x13x32xf32, #tpu.memory_space<vmem>>) attributes {dimension_semantics = [#tpu.dimension_semantics<parallel>], iteration_bounds = array<i64: 1>, scalar_prefetch = 0 : i64, scratch_operands = 0 : i64, tpu.core_type = #tpu.core_type<tc>, window_params = [{transform_indices = @transform_0, window_bounds = array<i64: 2, 26, 13, 64>}, {transform_indices = @transform_1, window_bounds = array<i64: 2, 13, 13, 32>}]} {
    %c0 = arith.constant 0 : index
    %c0_0 = arith.constant 0 : index
    %c0_1 = arith.constant 0 : index
    %c0_2 = arith.constant 0 : index
    %0 = vector.load %arg1[%c0, %c0_0, %c0_1, %c0_2] : memref<2x26x13x64xf32, #tpu.memory_space<vmem>>, vector<2x1x13x32xf32>
    %1 = vector.shape_cast %0 : vector<2x1x13x32xf32> to vector<2x13x32xf32>
    %c0_3 = arith.constant 0 : index
    %c0_4 = arith.constant 0 : index
    %c0_5 = arith.constant 0 : index
    %c32 = arith.constant 32 : index
    %2 = vector.load %arg1[%c0_3, %c0_4, %c0_5, %c32] : memref<2x26x13x64xf32, #tpu.memory_space<vmem>>, vector<2x1x13x32xf32>
    %3 = vector.shape_cast %2 : vector<2x1x13x32xf32> to vector<2x13x32xf32>
    %c0_6 = arith.constant 0 : index
    %c1 = arith.constant 1 : index
    %c0_7 = arith.constant 0 : index
    %c0_8 = arith.constant 0 : index
    %4 = vector.load %arg1[%c0_6, %c1, %c0_7, %c0_8] : memref<2x26x13x64xf32, #tpu.memory_space<vmem>>, vector<2x1x13x32xf32>
    %5 = vector.shape_cast %4 : vector<2x1x13x32xf32> to vector<2x13x32xf32>
    %c0_9 = arith.constant 0 : index
    %c1_10 = arith.constant 1 : index
    %c0_11 = arith.constant 0 : index
    %c32_12 = arith.constant 32 : index
    %6 = vector.load %arg1[%c0_9, %c1_10, %c0_11, %c32_12] : memref<2x26x13x64xf32, #tpu.memory_space<vmem>>, vector<2x1x13x32xf32>
    %7 = vector.shape_cast %6 : vector<2x1x13x32xf32> to vector<2x13x32xf32>
    %8 = arith.maximumf %1, %3 : vector<2x13x32xf32>
    %9 = arith.maximumf %5, %7 : vector<2x13x32xf32>
    %10 = arith.maximumf %8, %9 : vector<2x13x32xf32>
    %c0_13 = arith.constant 0 : index
    %c0_14 = arith.constant 0 : index
    %c0_15 = arith.constant 0 : index
    %c0_16 = arith.constant 0 : index
    %11 = vector.load %arg2[%c0_13, %c0_14, %c0_15, %c0_16] : memref<2x13x13x32xf32, #tpu.memory_space<vmem>>, vector<2x1x13x32xf32>
    %12 = vector.shape_cast %11 : vector<2x1x13x32xf32> to vector<2x13x32xf32>
    %13 = vector.shape_cast %10 : vector<2x13x32xf32> to vector<2x1x13x32xf32>
    tpu.vector_store %arg2[%c0_13, %c0_14, %c0_15, %c0_16], %13 {strides = array<i32>} : memref<2x13x13x32xf32, #tpu.memory_space<vmem>>, vector<2x1x13x32xf32>,
    %c0_17 = arith.constant 0 : index
    %c2 = arith.constant 2 : index
    %c0_18 = arith.constant 0 : index
    %c0_19 = arith.constant 0 : index
    %14 = vector.load %arg1[%c0_17, %c2, %c0_18, %c0_19] : memref<2x26x13x64xf32, #tpu.memory_space<vmem>>, vector<2x1x13x32xf32>
    %15 = vector.shape_cast %14 : vector<2x1x13x32xf32> to vector<2x13x32xf32>
    %c0_20 = arith.constant 0 : index
    %c2_21 = arith.constant 2 : index
    %c0_22 = arith.constant 0 : index
    %c32_23 = arith.constant 32 : index
    %16 = vector.load %arg1[%c0_20, %c2_21, %c0_22, %c32_23] : memref<2x26x13x64xf32, #tpu.memory_space<vmem>>, vector<2x1x13x32xf32>
    %17 = vector.shape_cast %16 : vector<2x1x13x32xf32> to vector<2x13x32xf32>
    %c0_24 = arith.constant 0 : index
    %c3 = arith.constant 3 : index
    %c0_25 = arith.constant 0 : index
    %c0_26 = arith.constant 0 : index
    %18 = vector.load %arg1[%c0_24, %c3, %c0_25, %c0_26] : memref<2x26x13x64xf32, #tpu.memory_space<vmem>>, vector<2x1x13x32xf32>
    %19 = vector.shape_cast %18 : vector<2x1x13x32xf32> to vector<2x13x32xf32>
    %c0_27 = arith.constant 0 : index
    %c3_28 = arith.constant 3 : index
    %c0_29 = arith.constant 0 : index
    %c32_30 = arith.constant 32 : index
    %20 = vector.load %arg1[%c0_27, %c3_28, %c0_29, %c32_30] : memref<2x26x13x64xf32, #tpu.memory_space<vmem>>, vector<2x1x13x32xf32>
    %21 = vector.shape_cast %20 : vector<2x1x13x32xf32> to vector<2x13x32xf32>
    %22 = arith.maximumf %15, %17 : vector<2x13x32xf32>
    %23 = arith.maximumf %19, %21 : vector<2x13x32xf32>
    %24 = arith.maximumf %22, %23 : vector<2x13x32xf32>
    %c0_31 = arith.constant 0 : index
    %c1_32 = arith.constant 1 : index
    %c0_33 = arith.constant 0 : index
    %c0_34 = arith.constant 0 : index
    %25 = vector.load %arg2[%c0_31, %c1_32, %c0_33, %c0_34] : memref<2x13x13x32xf32, #tpu.memory_space<vmem>>, vector<2x1x13x32xf32>
    %26 = vector.shape_cast %25 : vector<2x1x13x32xf32> to vector<2x13x32xf32>
    %27 = vector.shape_cast %24 : vector<2x13x32xf32> to vector<2x1x13x32xf32>
    tpu.vector_store %arg2[%c0_31, %c1_32, %c0_33, %c0_34], %27 {strides = array<i32>} : memref<2x13x13x32xf32, #tpu.memory_space<vmem>>, vector<2x1x13x32xf32>,
    %c0_35 = arith.constant 0 : index
    %c4 = arith.constant 4 : index
    %c0_36 = arith.constant 0 : index
    %c0_37 = arith.constant 0 : index
    %28 = vector.load %arg1[%c0_35, %c4, %c0_36, %c0_37] : memref<2x26x13x64xf32, #tpu.memory_space<vmem>>, vector<2x1x13x32xf32>
    %29 = vector.shape_cast %28 : vector<2x1x13x32xf32> to vector<2x13x32xf32>
    %c0_38 = arith.constant 0 : index
    %c4_39 = arith.constant 4 : index
    %c0_40 = arith.constant 0 : index
    %c32_41 = arith.constant 32 : index
    %30 = vector.load %arg1[%c0_38, %c4_39, %c0_40, %c32_41] : memref<2x26x13x64xf32, #tpu.memory_space<vmem>>, vector<2x1x13x32xf32>
    %31 = vector.shape_cast %30 : vector<2x1x13x32xf32> to vector<2x13x32xf32>
    %c0_42 = arith.constant 0 : index
    %c5 = arith.constant 5 : index
    %c0_43 = arith.constant 0 : index
    %c0_44 = arith.constant 0 : index
    %32 = vector.load %arg1[%c0_42, %c5, %c0_43, %c0_44] : memref<2x26x13x64xf32, #tpu.memory_space<vmem>>, vector<2x1x13x32xf32>
    %33 = vector.shape_cast %32 : vector<2x1x13x32xf32> to vector<2x13x32xf32>
    %c0_45 = arith.constant 0 : index
    %c5_46 = arith.constant 5 : index
    %c0_47 = arith.constant 0 : index
    %c32_48 = arith.constant 32 : index
    %34 = vector.load %arg1[%c0_45, %c5_46, %c0_47, %c32_48] : memref<2x26x13x64xf32, #tpu.memory_space<vmem>>, vector<2x1x13x32xf32>
    %35 = vector.shape_cast %34 : vector<2x1x13x32xf32> to vector<2x13x32xf32>
    %36 = arith.maximumf %29, %31 : vector<2x13x32xf32>
    %37 = arith.maximumf %33, %35 : vector<2x13x32xf32>
    %38 = arith.maximumf %36, %37 : vector<2x13x32xf32>
    %c0_49 = arith.constant 0 : index
    %c2_50 = arith.constant 2 : index
    %c0_51 = arith.constant 0 : index
    %c0_52 = arith.constant 0 : index
    %39 = vector.load %arg2[%c0_49, %c2_50, %c0_51, %c0_52] : memref<2x13x13x32xf32, #tpu.memory_space<vmem>>, vector<2x1x13x32xf32>
    %40 = vector.shape_cast %39 : vector<2x1x13x32xf32> to vector<2x13x32xf32>
    %41 = vector.shape_cast %38 : vector<2x13x32xf32> to vector<2x1x13x32xf32>
    tpu.vector_store %arg2[%c0_49, %c2_50, %c0_51, %c0_52], %41 {strides = array<i32>} : memref<2x13x13x32xf32, #tpu.memory_space<vmem>>, vector<2x1x13x32xf32>,
    %c0_53 = arith.constant 0 : index
    %c6 = arith.constant 6 : index
    %c0_54 = arith.constant 0 : index
    %c0_55 = arith.constant 0 : index
    %42 = vector.load %arg1[%c0_53, %c6, %c0_54, %c0_55] : memref<2x26x13x64xf32, #tpu.memory_space<vmem>>, vector<2x1x13x32xf32>
    %43 = vector.shape_cast %42 : vector<2x1x13x32xf32> to vector<2x13x32xf32>
    %c0_56 = arith.constant 0 : index
    %c6_57 = arith.constant 6 : index
    %c0_58 = arith.constant 0 : index
    %c32_59 = arith.constant 32 : index
    %44 = vector.load %arg1[%c0_56, %c6_57, %c0_58, %c32_59] : memref<2x26x13x64xf32, #tpu.memory_space<vmem>>, vector<2x1x13x32xf32>
    %45 = vector.shape_cast %44 : vector<2x1x13x32xf32> to vector<2x13x32xf32>
    %c0_60 = arith.constant 0 : index
    %c7 = arith.constant 7 : index
    %c0_61 = arith.constant 0 : index
    %c0_62 = arith.constant 0 : index
    %46 = vector.load %arg1[%c0_60, %c7, %c0_61, %c0_62] : memref<2x26x13x64xf32, #tpu.memory_space<vmem>>, vector<2x1x13x32xf32>
    %47 = vector.shape_cast %46 : vector<2x1x13x32xf32> to vector<2x13x32xf32>
    %c0_63 = arith.constant 0 : index
    %c7_64 = arith.constant 7 : index
    %c0_65 = arith.constant 0 : index
    %c32_66 = arith.constant 32 : index
    %48 = vector.load %arg1[%c0_63, %c7_64, %c0_65, %c32_66] : memref<2x26x13x64xf32, #tpu.memory_space<vmem>>, vector<2x1x13x32xf32>
    %49 = vector.shape_cast %48 : vector<2x1x13x32xf32> to vector<2x13x32xf32>
    %50 = arith.maximumf %43, %45 : vector<2x13x32xf32>
    %51 = arith.maximumf %47, %49 : vector<2x13x32xf32>
    %52 = arith.maximumf %50, %51 : vector<2x13x32xf32>
    %c0_67 = arith.constant 0 : index
    %c3_68 = arith.constant 3 : index
    %c0_69 = arith.constant 0 : index
    %c0_70 = arith.constant 0 : index
    %53 = vector.load %arg2[%c0_67, %c3_68, %c0_69, %c0_70] : memref<2x13x13x32xf32, #tpu.memory_space<vmem>>, vector<2x1x13x32xf32>
    %54 = vector.shape_cast %53 : vector<2x1x13x32xf32> to vector<2x13x32xf32>
    %55 = vector.shape_cast %52 : vector<2x13x32xf32> to vector<2x1x13x32xf32>
    tpu.vector_store %arg2[%c0_67, %c3_68, %c0_69, %c0_70], %55 {strides = array<i32>} : memref<2x13x13x32xf32, #tpu.memory_space<vmem>>, vector<2x1x13x32xf32>,
    %c0_71 = arith.constant 0 : index
    %c8 = arith.constant 8 : index
    %c0_72 = arith.constant 0 : index
    %c0_73 = arith.constant 0 : index
    %56 = vector.load %arg1[%c0_71, %c8, %c0_72, %c0_73] : memref<2x26x13x64xf32, #tpu.memory_space<vmem>>, vector<2x1x13x32xf32>
    %57 = vector.shape_cast %56 : vector<2x1x13x32xf32> to vector<2x13x32xf32>
    %c0_74 = arith.constant 0 : index
    %c8_75 = arith.constant 8 : index
    %c0_76 = arith.constant 0 : index
    %c32_77 = arith.constant 32 : index
    %58 = vector.load %arg1[%c0_74, %c8_75, %c0_76, %c32_77] : memref<2x26x13x64xf32, #tpu.memory_space<vmem>>, vector<2x1x13x32xf32>
    %59 = vector.shape_cast %58 : vector<2x1x13x32xf32> to vector<2x13x32xf32>
    %c0_78 = arith.constant 0 : index
    %c9 = arith.constant 9 : index
    %c0_79 = arith.constant 0 : index
    %c0_80 = arith.constant 0 : index
    %60 = vector.load %arg1[%c0_78, %c9, %c0_79, %c0_80] : memref<2x26x13x64xf32, #tpu.memory_space<vmem>>, vector<2x1x13x32xf32>
    %61 = vector.shape_cast %60 : vector<2x1x13x32xf32> to vector<2x13x32xf32>
    %c0_81 = arith.constant 0 : index
    %c9_82 = arith.constant 9 : index
    %c0_83 = arith.constant 0 : index
    %c32_84 = arith.constant 32 : index
    %62 = vector.load %arg1[%c0_81, %c9_82, %c0_83, %c32_84] : memref<2x26x13x64xf32, #tpu.memory_space<vmem>>, vector<2x1x13x32xf32>
    %63 = vector.shape_cast %62 : vector<2x1x13x32xf32> to vector<2x13x32xf32>
    %64 = arith.maximumf %57, %59 : vector<2x13x32xf32>
    %65 = arith.maximumf %61, %63 : vector<2x13x32xf32>
    %66 = arith.maximumf %64, %65 : vector<2x13x32xf32>
    %c0_85 = arith.constant 0 : index
    %c4_86 = arith.constant 4 : index
    %c0_87 = arith.constant 0 : index
    %c0_88 = arith.constant 0 : index
    %67 = vector.load %arg2[%c0_85, %c4_86, %c0_87, %c0_88] : memref<2x13x13x32xf32, #tpu.memory_space<vmem>>, vector<2x1x13x32xf32>
    %68 = vector.shape_cast %67 : vector<2x1x13x32xf32> to vector<2x13x32xf32>
    %69 = vector.shape_cast %66 : vector<2x13x32xf32> to vector<2x1x13x32xf32>
    tpu.vector_store %arg2[%c0_85, %c4_86, %c0_87, %c0_88], %69 {strides = array<i32>} : memref<2x13x13x32xf32, #tpu.memory_space<vmem>>, vector<2x1x13x32xf32>,
    %c0_89 = arith.constant 0 : index
    %c10 = arith.constant 10 : index
    %c0_90 = arith.constant 0 : index
    %c0_91 = arith.constant 0 : index
    %70 = vector.load %arg1[%c0_89, %c10, %c0_90, %c0_91] : memref<2x26x13x64xf32, #tpu.memory_space<vmem>>, vector<2x1x13x32xf32>
    %71 = vector.shape_cast %70 : vector<2x1x13x32xf32> to vector<2x13x32xf32>
    %c0_92 = arith.constant 0 : index
    %c10_93 = arith.constant 10 : index
    %c0_94 = arith.constant 0 : index
    %c32_95 = arith.constant 32 : index
    %72 = vector.load %arg1[%c0_92, %c10_93, %c0_94, %c32_95] : memref<2x26x13x64xf32, #tpu.memory_space<vmem>>, vector<2x1x13x32xf32>
    %73 = vector.shape_cast %72 : vector<2x1x13x32xf32> to vector<2x13x32xf32>
    %c0_96 = arith.constant 0 : index
    %c11 = arith.constant 11 : index
    %c0_97 = arith.constant 0 : index
    %c0_98 = arith.constant 0 : index
    %74 = vector.load %arg1[%c0_96, %c11, %c0_97, %c0_98] : memref<2x26x13x64xf32, #tpu.memory_space<vmem>>, vector<2x1x13x32xf32>
    %75 = vector.shape_cast %74 : vector<2x1x13x32xf32> to vector<2x13x32xf32>
    %c0_99 = arith.constant 0 : index
    %c11_100 = arith.constant 11 : index
    %c0_101 = arith.constant 0 : index
    %c32_102 = arith.constant 32 : index
    %76 = vector.load %arg1[%c0_99, %c11_100, %c0_101, %c32_102] : memref<2x26x13x64xf32, #tpu.memory_space<vmem>>, vector<2x1x13x32xf32>
    %77 = vector.shape_cast %76 : vector<2x1x13x32xf32> to vector<2x13x32xf32>
    %78 = arith.maximumf %71, %73 : vector<2x13x32xf32>
    %79 = arith.maximumf %75, %77 : vector<2x13x32xf32>
    %80 = arith.maximumf %78, %79 : vector<2x13x32xf32>
    %c0_103 = arith.constant 0 : index
    %c5_104 = arith.constant 5 : index
    %c0_105 = arith.constant 0 : index
    %c0_106 = arith.constant 0 : index
    %81 = vector.load %arg2[%c0_103, %c5_104, %c0_105, %c0_106] : memref<2x13x13x32xf32, #tpu.memory_space<vmem>>, vector<2x1x13x32xf32>
    %82 = vector.shape_cast %81 : vector<2x1x13x32xf32> to vector<2x13x32xf32>
    %83 = vector.shape_cast %80 : vector<2x13x32xf32> to vector<2x1x13x32xf32>
    tpu.vector_store %arg2[%c0_103, %c5_104, %c0_105, %c0_106], %83 {strides = array<i32>} : memref<2x13x13x32xf32, #tpu.memory_space<vmem>>, vector<2x1x13x32xf32>,
    %c0_107 = arith.constant 0 : index
    %c12 = arith.constant 12 : index
    %c0_108 = arith.constant 0 : index
    %c0_109 = arith.constant 0 : index
    %84 = vector.load %arg1[%c0_107, %c12, %c0_108, %c0_109] : memref<2x26x13x64xf32, #tpu.memory_space<vmem>>, vector<2x1x13x32xf32>
    %85 = vector.shape_cast %84 : vector<2x1x13x32xf32> to vector<2x13x32xf32>
    %c0_110 = arith.constant 0 : index
    %c12_111 = arith.constant 12 : index
    %c0_112 = arith.constant 0 : index
    %c32_113 = arith.constant 32 : index
    %86 = vector.load %arg1[%c0_110, %c12_111, %c0_112, %c32_113] : memref<2x26x13x64xf32, #tpu.memory_space<vmem>>, vector<2x1x13x32xf32>
    %87 = vector.shape_cast %86 : vector<2x1x13x32xf32> to vector<2x13x32xf32>
    %c0_114 = arith.constant 0 : index
    %c13 = arith.constant 13 : index
    %c0_115 = arith.constant 0 : index
    %c0_116 = arith.constant 0 : index
    %88 = vector.load %arg1[%c0_114, %c13, %c0_115, %c0_116] : memref<2x26x13x64xf32, #tpu.memory_space<vmem>>, vector<2x1x13x32xf32>
    %89 = vector.shape_cast %88 : vector<2x1x13x32xf32> to vector<2x13x32xf32>
    %c0_117 = arith.constant 0 : index
    %c13_118 = arith.constant 13 : index
    %c0_119 = arith.constant 0 : index
    %c32_120 = arith.constant 32 : index
    %90 = vector.load %arg1[%c0_117, %c13_118, %c0_119, %c32_120] : memref<2x26x13x64xf32, #tpu.memory_space<vmem>>, vector<2x1x13x32xf32>
    %91 = vector.shape_cast %90 : vector<2x1x13x32xf32> to vector<2x13x32xf32>
    %92 = arith.maximumf %85, %87 : vector<2x13x32xf32>
    %93 = arith.maximumf %89, %91 : vector<2x13x32xf32>
    %94 = arith.maximumf %92, %93 : vector<2x13x32xf32>
    %c0_121 = arith.constant 0 : index
    %c6_122 = arith.constant 6 : index
    %c0_123 = arith.constant 0 : index
    %c0_124 = arith.constant 0 : index
    %95 = vector.load %arg2[%c0_121, %c6_122, %c0_123, %c0_124] : memref<2x13x13x32xf32, #tpu.memory_space<vmem>>, vector<2x1x13x32xf32>
    %96 = vector.shape_cast %95 : vector<2x1x13x32xf32> to vector<2x13x32xf32>
    %97 = vector.shape_cast %94 : vector<2x13x32xf32> to vector<2x1x13x32xf32>
    tpu.vector_store %arg2[%c0_121, %c6_122, %c0_123, %c0_124], %97 {strides = array<i32>} : memref<2x13x13x32xf32, #tpu.memory_space<vmem>>, vector<2x1x13x32xf32>,
    %c0_125 = arith.constant 0 : index
    %c14 = arith.constant 14 : index
    %c0_126 = arith.constant 0 : index
    %c0_127 = arith.constant 0 : index
    %98 = vector.load %arg1[%c0_125, %c14, %c0_126, %c0_127] : memref<2x26x13x64xf32, #tpu.memory_space<vmem>>, vector<2x1x13x32xf32>
    %99 = vector.shape_cast %98 : vector<2x1x13x32xf32> to vector<2x13x32xf32>
    %c0_128 = arith.constant 0 : index
    %c14_129 = arith.constant 14 : index
    %c0_130 = arith.constant 0 : index
    %c32_131 = arith.constant 32 : index
    %100 = vector.load %arg1[%c0_128, %c14_129, %c0_130, %c32_131] : memref<2x26x13x64xf32, #tpu.memory_space<vmem>>, vector<2x1x13x32xf32>
    %101 = vector.shape_cast %100 : vector<2x1x13x32xf32> to vector<2x13x32xf32>
    %c0_132 = arith.constant 0 : index
    %c15 = arith.constant 15 : index
    %c0_133 = arith.constant 0 : index
    %c0_134 = arith.constant 0 : index
    %102 = vector.load %arg1[%c0_132, %c15, %c0_133, %c0_134] : memref<2x26x13x64xf32, #tpu.memory_space<vmem>>, vector<2x1x13x32xf32>
    %103 = vector.shape_cast %102 : vector<2x1x13x32xf32> to vector<2x13x32xf32>
    %c0_135 = arith.constant 0 : index
    %c15_136 = arith.constant 15 : index
    %c0_137 = arith.constant 0 : index
    %c32_138 = arith.constant 32 : index
    %104 = vector.load %arg1[%c0_135, %c15_136, %c0_137, %c32_138] : memref<2x26x13x64xf32, #tpu.memory_space<vmem>>, vector<2x1x13x32xf32>
    %105 = vector.shape_cast %104 : vector<2x1x13x32xf32> to vector<2x13x32xf32>
    %106 = arith.maximumf %99, %101 : vector<2x13x32xf32>
    %107 = arith.maximumf %103, %105 : vector<2x13x32xf32>
    %108 = arith.maximumf %106, %107 : vector<2x13x32xf32>
    %c0_139 = arith.constant 0 : index
    %c7_140 = arith.constant 7 : index
    %c0_141 = arith.constant 0 : index
    %c0_142 = arith.constant 0 : index
    %109 = vector.load %arg2[%c0_139, %c7_140, %c0_141, %c0_142] : memref<2x13x13x32xf32, #tpu.memory_space<vmem>>, vector<2x1x13x32xf32>
    %110 = vector.shape_cast %109 : vector<2x1x13x32xf32> to vector<2x13x32xf32>
    %111 = vector.shape_cast %108 : vector<2x13x32xf32> to vector<2x1x13x32xf32>
    tpu.vector_store %arg2[%c0_139, %c7_140, %c0_141, %c0_142], %111 {strides = array<i32>} : memref<2x13x13x32xf32, #tpu.memory_space<vmem>>, vector<2x1x13x32xf32>,
    %c0_143 = arith.constant 0 : index
    %c16 = arith.constant 16 : index
    %c0_144 = arith.constant 0 : index
    %c0_145 = arith.constant 0 : index
    %112 = vector.load %arg1[%c0_143, %c16, %c0_144, %c0_145] : memref<2x26x13x64xf32, #tpu.memory_space<vmem>>, vector<2x1x13x32xf32>
    %113 = vector.shape_cast %112 : vector<2x1x13x32xf32> to vector<2x13x32xf32>
    %c0_146 = arith.constant 0 : index
    %c16_147 = arith.constant 16 : index
    %c0_148 = arith.constant 0 : index
    %c32_149 = arith.constant 32 : index
    %114 = vector.load %arg1[%c0_146, %c16_147, %c0_148, %c32_149] : memref<2x26x13x64xf32, #tpu.memory_space<vmem>>, vector<2x1x13x32xf32>
    %115 = vector.shape_cast %114 : vector<2x1x13x32xf32> to vector<2x13x32xf32>
    %c0_150 = arith.constant 0 : index
    %c17 = arith.constant 17 : index
    %c0_151 = arith.constant 0 : index
    %c0_152 = arith.constant 0 : index
    %116 = vector.load %arg1[%c0_150, %c17, %c0_151, %c0_152] : memref<2x26x13x64xf32, #tpu.memory_space<vmem>>, vector<2x1x13x32xf32>
    %117 = vector.shape_cast %116 : vector<2x1x13x32xf32> to vector<2x13x32xf32>
    %c0_153 = arith.constant 0 : index
    %c17_154 = arith.constant 17 : index
    %c0_155 = arith.constant 0 : index
    %c32_156 = arith.constant 32 : index
    %118 = vector.load %arg1[%c0_153, %c17_154, %c0_155, %c32_156] : memref<2x26x13x64xf32, #tpu.memory_space<vmem>>, vector<2x1x13x32xf32>
    %119 = vector.shape_cast %118 : vector<2x1x13x32xf32> to vector<2x13x32xf32>
    %120 = arith.maximumf %113, %115 : vector<2x13x32xf32>
    %121 = arith.maximumf %117, %119 : vector<2x13x32xf32>
    %122 = arith.maximumf %120, %121 : vector<2x13x32xf32>
    %c0_157 = arith.constant 0 : index
    %c8_158 = arith.constant 8 : index
    %c0_159 = arith.constant 0 : index
    %c0_160 = arith.constant 0 : index
    %123 = vector.load %arg2[%c0_157, %c8_158, %c0_159, %c0_160] : memref<2x13x13x32xf32, #tpu.memory_space<vmem>>, vector<2x1x13x32xf32>
    %124 = vector.shape_cast %123 : vector<2x1x13x32xf32> to vector<2x13x32xf32>
    %125 = vector.shape_cast %122 : vector<2x13x32xf32> to vector<2x1x13x32xf32>
    tpu.vector_store %arg2[%c0_157, %c8_158, %c0_159, %c0_160], %125 {strides = array<i32>} : memref<2x13x13x32xf32, #tpu.memory_space<vmem>>, vector<2x1x13x32xf32>,
    %c0_161 = arith.constant 0 : index
    %c18 = arith.constant 18 : index
    %c0_162 = arith.constant 0 : index
    %c0_163 = arith.constant 0 : index
    %126 = vector.load %arg1[%c0_161, %c18, %c0_162, %c0_163] : memref<2x26x13x64xf32, #tpu.memory_space<vmem>>, vector<2x1x13x32xf32>
    %127 = vector.shape_cast %126 : vector<2x1x13x32xf32> to vector<2x13x32xf32>
    %c0_164 = arith.constant 0 : index
    %c18_165 = arith.constant 18 : index
    %c0_166 = arith.constant 0 : index
    %c32_167 = arith.constant 32 : index
    %128 = vector.load %arg1[%c0_164, %c18_165, %c0_166, %c32_167] : memref<2x26x13x64xf32, #tpu.memory_space<vmem>>, vector<2x1x13x32xf32>
    %129 = vector.shape_cast %128 : vector<2x1x13x32xf32> to vector<2x13x32xf32>
    %c0_168 = arith.constant 0 : index
    %c19 = arith.constant 19 : index
    %c0_169 = arith.constant 0 : index
    %c0_170 = arith.constant 0 : index
    %130 = vector.load %arg1[%c0_168, %c19, %c0_169, %c0_170] : memref<2x26x13x64xf32, #tpu.memory_space<vmem>>, vector<2x1x13x32xf32>
    %131 = vector.shape_cast %130 : vector<2x1x13x32xf32> to vector<2x13x32xf32>
    %c0_171 = arith.constant 0 : index
    %c19_172 = arith.constant 19 : index
    %c0_173 = arith.constant 0 : index
    %c32_174 = arith.constant 32 : index
    %132 = vector.load %arg1[%c0_171, %c19_172, %c0_173, %c32_174] : memref<2x26x13x64xf32, #tpu.memory_space<vmem>>, vector<2x1x13x32xf32>
    %133 = vector.shape_cast %132 : vector<2x1x13x32xf32> to vector<2x13x32xf32>
    %134 = arith.maximumf %127, %129 : vector<2x13x32xf32>
    %135 = arith.maximumf %131, %133 : vector<2x13x32xf32>
    %136 = arith.maximumf %134, %135 : vector<2x13x32xf32>
    %c0_175 = arith.constant 0 : index
    %c9_176 = arith.constant 9 : index
    %c0_177 = arith.constant 0 : index
    %c0_178 = arith.constant 0 : index
    %137 = vector.load %arg2[%c0_175, %c9_176, %c0_177, %c0_178] : memref<2x13x13x32xf32, #tpu.memory_space<vmem>>, vector<2x1x13x32xf32>
    %138 = vector.shape_cast %137 : vector<2x1x13x32xf32> to vector<2x13x32xf32>
    %139 = vector.shape_cast %136 : vector<2x13x32xf32> to vector<2x1x13x32xf32>
    tpu.vector_store %arg2[%c0_175, %c9_176, %c0_177, %c0_178], %139 {strides = array<i32>} : memref<2x13x13x32xf32, #tpu.memory_space<vmem>>, vector<2x1x13x32xf32>,
    %c0_179 = arith.constant 0 : index
    %c20 = arith.constant 20 : index
    %c0_180 = arith.constant 0 : index
    %c0_181 = arith.constant 0 : index
    %140 = vector.load %arg1[%c0_179, %c20, %c0_180, %c0_181] : memref<2x26x13x64xf32, #tpu.memory_space<vmem>>, vector<2x1x13x32xf32>
    %141 = vector.shape_cast %140 : vector<2x1x13x32xf32> to vector<2x13x32xf32>
    %c0_182 = arith.constant 0 : index
    %c20_183 = arith.constant 20 : index
    %c0_184 = arith.constant 0 : index
    %c32_185 = arith.constant 32 : index
    %142 = vector.load %arg1[%c0_182, %c20_183, %c0_184, %c32_185] : memref<2x26x13x64xf32, #tpu.memory_space<vmem>>, vector<2x1x13x32xf32>
    %143 = vector.shape_cast %142 : vector<2x1x13x32xf32> to vector<2x13x32xf32>
    %c0_186 = arith.constant 0 : index
    %c21 = arith.constant 21 : index
    %c0_187 = arith.constant 0 : index
    %c0_188 = arith.constant 0 : index
    %144 = vector.load %arg1[%c0_186, %c21, %c0_187, %c0_188] : memref<2x26x13x64xf32, #tpu.memory_space<vmem>>, vector<2x1x13x32xf32>
    %145 = vector.shape_cast %144 : vector<2x1x13x32xf32> to vector<2x13x32xf32>
    %c0_189 = arith.constant 0 : index
    %c21_190 = arith.constant 21 : index
    %c0_191 = arith.constant 0 : index
    %c32_192 = arith.constant 32 : index
    %146 = vector.load %arg1[%c0_189, %c21_190, %c0_191, %c32_192] : memref<2x26x13x64xf32, #tpu.memory_space<vmem>>, vector<2x1x13x32xf32>
    %147 = vector.shape_cast %146 : vector<2x1x13x32xf32> to vector<2x13x32xf32>
    %148 = arith.maximumf %141, %143 : vector<2x13x32xf32>
    %149 = arith.maximumf %145, %147 : vector<2x13x32xf32>
    %150 = arith.maximumf %148, %149 : vector<2x13x32xf32>
    %c0_193 = arith.constant 0 : index
    %c10_194 = arith.constant 10 : index
    %c0_195 = arith.constant 0 : index
    %c0_196 = arith.constant 0 : index
    %151 = vector.load %arg2[%c0_193, %c10_194, %c0_195, %c0_196] : memref<2x13x13x32xf32, #tpu.memory_space<vmem>>, vector<2x1x13x32xf32>
    %152 = vector.shape_cast %151 : vector<2x1x13x32xf32> to vector<2x13x32xf32>
    %153 = vector.shape_cast %150 : vector<2x13x32xf32> to vector<2x1x13x32xf32>
    tpu.vector_store %arg2[%c0_193, %c10_194, %c0_195, %c0_196], %153 {strides = array<i32>} : memref<2x13x13x32xf32, #tpu.memory_space<vmem>>, vector<2x1x13x32xf32>,
    %c0_197 = arith.constant 0 : index
    %c22 = arith.constant 22 : index
    %c0_198 = arith.constant 0 : index
    %c0_199 = arith.constant 0 : index
    %154 = vector.load %arg1[%c0_197, %c22, %c0_198, %c0_199] : memref<2x26x13x64xf32, #tpu.memory_space<vmem>>, vector<2x1x13x32xf32>
    %155 = vector.shape_cast %154 : vector<2x1x13x32xf32> to vector<2x13x32xf32>
    %c0_200 = arith.constant 0 : index
    %c22_201 = arith.constant 22 : index
    %c0_202 = arith.constant 0 : index
    %c32_203 = arith.constant 32 : index
    %156 = vector.load %arg1[%c0_200, %c22_201, %c0_202, %c32_203] : memref<2x26x13x64xf32, #tpu.memory_space<vmem>>, vector<2x1x13x32xf32>
    %157 = vector.shape_cast %156 : vector<2x1x13x32xf32> to vector<2x13x32xf32>
    %c0_204 = arith.constant 0 : index
    %c23 = arith.constant 23 : index
    %c0_205 = arith.constant 0 : index
    %c0_206 = arith.constant 0 : index
    %158 = vector.load %arg1[%c0_204, %c23, %c0_205, %c0_206] : memref<2x26x13x64xf32, #tpu.memory_space<vmem>>, vector<2x1x13x32xf32>
    %159 = vector.shape_cast %158 : vector<2x1x13x32xf32> to vector<2x13x32xf32>
    %c0_207 = arith.constant 0 : index
    %c23_208 = arith.constant 23 : index
    %c0_209 = arith.constant 0 : index
    %c32_210 = arith.constant 32 : index
    %160 = vector.load %arg1[%c0_207, %c23_208, %c0_209, %c32_210] : memref<2x26x13x64xf32, #tpu.memory_space<vmem>>, vector<2x1x13x32xf32>
    %161 = vector.shape_cast %160 : vector<2x1x13x32xf32> to vector<2x13x32xf32>
    %162 = arith.maximumf %155, %157 : vector<2x13x32xf32>
    %163 = arith.maximumf %159, %161 : vector<2x13x32xf32>
    %164 = arith.maximumf %162, %163 : vector<2x13x32xf32>
    %c0_211 = arith.constant 0 : index
    %c11_212 = arith.constant 11 : index
    %c0_213 = arith.constant 0 : index
    %c0_214 = arith.constant 0 : index
    %165 = vector.load %arg2[%c0_211, %c11_212, %c0_213, %c0_214] : memref<2x13x13x32xf32, #tpu.memory_space<vmem>>, vector<2x1x13x32xf32>
    %166 = vector.shape_cast %165 : vector<2x1x13x32xf32> to vector<2x13x32xf32>
    %167 = vector.shape_cast %164 : vector<2x13x32xf32> to vector<2x1x13x32xf32>
    tpu.vector_store %arg2[%c0_211, %c11_212, %c0_213, %c0_214], %167 {strides = array<i32>} : memref<2x13x13x32xf32, #tpu.memory_space<vmem>>, vector<2x1x13x32xf32>,
    %c0_215 = arith.constant 0 : index
    %c24 = arith.constant 24 : index
    %c0_216 = arith.constant 0 : index
    %c0_217 = arith.constant 0 : index
    %168 = vector.load %arg1[%c0_215, %c24, %c0_216, %c0_217] : memref<2x26x13x64xf32, #tpu.memory_space<vmem>>, vector<2x1x13x32xf32>
    %169 = vector.shape_cast %168 : vector<2x1x13x32xf32> to vector<2x13x32xf32>
    %c0_218 = arith.constant 0 : index
    %c24_219 = arith.constant 24 : index
    %c0_220 = arith.constant 0 : index
    %c32_221 = arith.constant 32 : index
    %170 = vector.load %arg1[%c0_218, %c24_219, %c0_220, %c32_221] : memref<2x26x13x64xf32, #tpu.memory_space<vmem>>, vector<2x1x13x32xf32>
    %171 = vector.shape_cast %170 : vector<2x1x13x32xf32> to vector<2x13x32xf32>
    %c0_222 = arith.constant 0 : index
    %c25 = arith.constant 25 : index
    %c0_223 = arith.constant 0 : index
    %c0_224 = arith.constant 0 : index
    %172 = vector.load %arg1[%c0_222, %c25, %c0_223, %c0_224] : memref<2x26x13x64xf32, #tpu.memory_space<vmem>>, vector<2x1x13x32xf32>
    %173 = vector.shape_cast %172 : vector<2x1x13x32xf32> to vector<2x13x32xf32>
    %c0_225 = arith.constant 0 : index
    %c25_226 = arith.constant 25 : index
    %c0_227 = arith.constant 0 : index
    %c32_228 = arith.constant 32 : index
    %174 = vector.load %arg1[%c0_225, %c25_226, %c0_227, %c32_228] : memref<2x26x13x64xf32, #tpu.memory_space<vmem>>, vector<2x1x13x32xf32>
    %175 = vector.shape_cast %174 : vector<2x1x13x32xf32> to vector<2x13x32xf32>
    %176 = arith.maximumf %169, %171 : vector<2x13x32xf32>
    %177 = arith.maximumf %173, %175 : vector<2x13x32xf32>
    %178 = arith.maximumf %176, %177 : vector<2x13x32xf32>
    %c0_229 = arith.constant 0 : index
    %c12_230 = arith.constant 12 : index
    %c0_231 = arith.constant 0 : index
    %c0_232 = arith.constant 0 : index
    %179 = vector.load %arg2[%c0_229, %c12_230, %c0_231, %c0_232] : memref<2x13x13x32xf32, #tpu.memory_space<vmem>>, vector<2x1x13x32xf32>
    %180 = vector.shape_cast %179 : vector<2x1x13x32xf32> to vector<2x13x32xf32>
    %181 = vector.shape_cast %178 : vector<2x13x32xf32> to vector<2x1x13x32xf32>
    tpu.vector_store %arg2[%c0_229, %c12_230, %c0_231, %c0_232], %181 {strides = array<i32>} : memref<2x13x13x32xf32, #tpu.memory_space<vmem>>, vector<2x1x13x32xf32>,
    return
  }
  func.func @transform_0(%arg0: i32) -> (i32, i32, i32, i32) {
    %c0_i32 = arith.constant 0 : i32
    %c0_i32_0 = arith.constant 0 : i32
    %c0_i32_1 = arith.constant 0 : i32
    %c0_i32_2 = arith.constant 0 : i32
    return %arg0, %c0_i32, %c0_i32_0, %c0_i32_1 : i32, i32, i32, i32
  }
  func.func @transform_1(%arg0: i32) -> (i32, i32, i32, i32) {
    %c0_i32 = arith.constant 0 : i32
    %c0_i32_0 = arith.constant 0 : i32
    %c0_i32_1 = arith.constant 0 : i32
    %c0_i32_2 = arith.constant 0 : i32
    return %arg0, %c0_i32, %c0_i32_0, %c0_i32_1 : i32, i32, i32, i32
  }
}

module attributes {stable_mosaic.version = 11 : i64} {
  func.func @_matmul_bias_kernel(%arg0: i32, %arg1: memref<242x288xf32, #tpu.memory_space<vmem>>, %arg2: memref<288x64xbf16, #tpu.memory_space<vmem>>, %arg3: memref<1x64xf32, #tpu.memory_space<vmem>>, %arg4: memref<242x64xf32, #tpu.memory_space<vmem>>) attributes {dimension_semantics = [#tpu.dimension_semantics<parallel>], iteration_bounds = array<i64: 1>, scalar_prefetch = 0 : i64, scratch_operands = 0 : i64, tpu.core_type = #tpu.core_type<tc>, window_params = [{transform_indices = @transform_0, window_bounds = array<i64: 242, 288>}, {pipeline_mode = #tpu.pipeline_mode<synchronous>, transform_indices = @transform_1, window_bounds = array<i64: 288, 64>}, {pipeline_mode = #tpu.pipeline_mode<synchronous>, transform_indices = @transform_2, window_bounds = array<i64: 1, 64>}, {transform_indices = @transform_3, window_bounds = array<i64: 242, 64>}]} {
    %c0 = arith.constant 0 : index
    %c0_0 = arith.constant 0 : index
    %0 = vector.load %arg1[%c0, %c0_0] : memref<242x288xf32, #tpu.memory_space<vmem>>, vector<242x288xf32>
    %1 = arith.truncf %0 : vector<242x288xf32> to vector<242x288xbf16>
    %c0_1 = arith.constant 0 : index
    %c0_2 = arith.constant 0 : index
    %2 = vector.load %arg2[%c0_1, %c0_2] : memref<288x64xbf16, #tpu.memory_space<vmem>>, vector<288x64xbf16>
    %cst = arith.constant dense<0.000000e+00> : vector<242x64xf32>
    %3 = tpu.matmul %1, %2, %cst {dimension_numbers = #tpu.dot_dimension_numbers<[1], [0], [0], [1], [0, 0, 1, 1], [], []>} : vector<242x288xbf16>, vector<288x64xbf16>, vector<242x64xf32> -> vector<242x64xf32>
    %c0_3 = arith.constant 0 : index
    %c0_4 = arith.constant 0 : index
    %4 = vector.load %arg3[%c0_3, %c0_4] : memref<1x64xf32, #tpu.memory_space<vmem>>, vector<1x64xf32>
    %5 = vector.broadcast %4 : vector<1x64xf32> to vector<242x64xf32>
    %6 = arith.addf %3, %5 : vector<242x64xf32>
    %cst_5 = arith.constant 0.000000e+00 : f32
    %7 = vector.broadcast %cst_5 : f32 to vector<242x64xf32>
    %8 = arith.maximumf %6, %7 : vector<242x64xf32>
    %c0_6 = arith.constant 0 : index
    %c0_7 = arith.constant 0 : index
    %9 = vector.load %arg4[%c0_6, %c0_7] : memref<242x64xf32, #tpu.memory_space<vmem>>, vector<242x64xf32>
    tpu.vector_store %arg4[%c0_6, %c0_7], %8 {strides = array<i32>} : memref<242x64xf32, #tpu.memory_space<vmem>>, vector<242x64xf32>,
    return
  }
  func.func @transform_0(%arg0: i32) -> (i32, i32) {
    %c0_i32 = arith.constant 0 : i32
    %c0_i32_0 = arith.constant 0 : i32
    return %arg0, %c0_i32 : i32, i32
  }
  func.func @transform_1(%arg0: i32) -> (i32, i32) {
    %c0_i32 = arith.constant 0 : i32
    %c0_i32_0 = arith.constant 0 : i32
    %c0_i32_1 = arith.constant 0 : i32
    return %c0_i32, %c0_i32_0 : i32, i32
  }
  func.func @transform_2(%arg0: i32) -> (i32, i32) {
    %c0_i32 = arith.constant 0 : i32
    %c0_i32_0 = arith.constant 0 : i32
    %c0_i32_1 = arith.constant 0 : i32
    return %c0_i32, %c0_i32_0 : i32, i32
  }
  func.func @transform_3(%arg0: i32) -> (i32, i32) {
    %c0_i32 = arith.constant 0 : i32
    %c0_i32_0 = arith.constant 0 : i32
    return %arg0, %c0_i32 : i32, i32
  }
}

module attributes {stable_mosaic.version = 11 : i64} {
  func.func @_maxpool2x2_kernel(%arg0: i32, %arg1: memref<2x10x5x128xf32, #tpu.memory_space<vmem>>, %arg2: memref<2x5x5x64xf32, #tpu.memory_space<vmem>>) attributes {dimension_semantics = [#tpu.dimension_semantics<parallel>], iteration_bounds = array<i64: 1>, scalar_prefetch = 0 : i64, scratch_operands = 0 : i64, tpu.core_type = #tpu.core_type<tc>, window_params = [{transform_indices = @transform_0, window_bounds = array<i64: 2, 10, 5, 128>}, {transform_indices = @transform_1, window_bounds = array<i64: 2, 5, 5, 64>}]} {
    %c0 = arith.constant 0 : index
    %c0_0 = arith.constant 0 : index
    %c0_1 = arith.constant 0 : index
    %c0_2 = arith.constant 0 : index
    %0 = vector.load %arg1[%c0, %c0_0, %c0_1, %c0_2] : memref<2x10x5x128xf32, #tpu.memory_space<vmem>>, vector<2x1x5x64xf32>
    %1 = vector.shape_cast %0 : vector<2x1x5x64xf32> to vector<2x5x64xf32>
    %c0_3 = arith.constant 0 : index
    %c0_4 = arith.constant 0 : index
    %c0_5 = arith.constant 0 : index
    %c64 = arith.constant 64 : index
    %2 = vector.load %arg1[%c0_3, %c0_4, %c0_5, %c64] : memref<2x10x5x128xf32, #tpu.memory_space<vmem>>, vector<2x1x5x64xf32>
    %3 = vector.shape_cast %2 : vector<2x1x5x64xf32> to vector<2x5x64xf32>
    %c0_6 = arith.constant 0 : index
    %c1 = arith.constant 1 : index
    %c0_7 = arith.constant 0 : index
    %c0_8 = arith.constant 0 : index
    %4 = vector.load %arg1[%c0_6, %c1, %c0_7, %c0_8] : memref<2x10x5x128xf32, #tpu.memory_space<vmem>>, vector<2x1x5x64xf32>
    %5 = vector.shape_cast %4 : vector<2x1x5x64xf32> to vector<2x5x64xf32>
    %c0_9 = arith.constant 0 : index
    %c1_10 = arith.constant 1 : index
    %c0_11 = arith.constant 0 : index
    %c64_12 = arith.constant 64 : index
    %6 = vector.load %arg1[%c0_9, %c1_10, %c0_11, %c64_12] : memref<2x10x5x128xf32, #tpu.memory_space<vmem>>, vector<2x1x5x64xf32>
    %7 = vector.shape_cast %6 : vector<2x1x5x64xf32> to vector<2x5x64xf32>
    %8 = arith.maximumf %1, %3 : vector<2x5x64xf32>
    %9 = arith.maximumf %5, %7 : vector<2x5x64xf32>
    %10 = arith.maximumf %8, %9 : vector<2x5x64xf32>
    %c0_13 = arith.constant 0 : index
    %c0_14 = arith.constant 0 : index
    %c0_15 = arith.constant 0 : index
    %c0_16 = arith.constant 0 : index
    %11 = vector.load %arg2[%c0_13, %c0_14, %c0_15, %c0_16] : memref<2x5x5x64xf32, #tpu.memory_space<vmem>>, vector<2x1x5x64xf32>
    %12 = vector.shape_cast %11 : vector<2x1x5x64xf32> to vector<2x5x64xf32>
    %13 = vector.shape_cast %10 : vector<2x5x64xf32> to vector<2x1x5x64xf32>
    tpu.vector_store %arg2[%c0_13, %c0_14, %c0_15, %c0_16], %13 {strides = array<i32>} : memref<2x5x5x64xf32, #tpu.memory_space<vmem>>, vector<2x1x5x64xf32>,
    %c0_17 = arith.constant 0 : index
    %c2 = arith.constant 2 : index
    %c0_18 = arith.constant 0 : index
    %c0_19 = arith.constant 0 : index
    %14 = vector.load %arg1[%c0_17, %c2, %c0_18, %c0_19] : memref<2x10x5x128xf32, #tpu.memory_space<vmem>>, vector<2x1x5x64xf32>
    %15 = vector.shape_cast %14 : vector<2x1x5x64xf32> to vector<2x5x64xf32>
    %c0_20 = arith.constant 0 : index
    %c2_21 = arith.constant 2 : index
    %c0_22 = arith.constant 0 : index
    %c64_23 = arith.constant 64 : index
    %16 = vector.load %arg1[%c0_20, %c2_21, %c0_22, %c64_23] : memref<2x10x5x128xf32, #tpu.memory_space<vmem>>, vector<2x1x5x64xf32>
    %17 = vector.shape_cast %16 : vector<2x1x5x64xf32> to vector<2x5x64xf32>
    %c0_24 = arith.constant 0 : index
    %c3 = arith.constant 3 : index
    %c0_25 = arith.constant 0 : index
    %c0_26 = arith.constant 0 : index
    %18 = vector.load %arg1[%c0_24, %c3, %c0_25, %c0_26] : memref<2x10x5x128xf32, #tpu.memory_space<vmem>>, vector<2x1x5x64xf32>
    %19 = vector.shape_cast %18 : vector<2x1x5x64xf32> to vector<2x5x64xf32>
    %c0_27 = arith.constant 0 : index
    %c3_28 = arith.constant 3 : index
    %c0_29 = arith.constant 0 : index
    %c64_30 = arith.constant 64 : index
    %20 = vector.load %arg1[%c0_27, %c3_28, %c0_29, %c64_30] : memref<2x10x5x128xf32, #tpu.memory_space<vmem>>, vector<2x1x5x64xf32>
    %21 = vector.shape_cast %20 : vector<2x1x5x64xf32> to vector<2x5x64xf32>
    %22 = arith.maximumf %15, %17 : vector<2x5x64xf32>
    %23 = arith.maximumf %19, %21 : vector<2x5x64xf32>
    %24 = arith.maximumf %22, %23 : vector<2x5x64xf32>
    %c0_31 = arith.constant 0 : index
    %c1_32 = arith.constant 1 : index
    %c0_33 = arith.constant 0 : index
    %c0_34 = arith.constant 0 : index
    %25 = vector.load %arg2[%c0_31, %c1_32, %c0_33, %c0_34] : memref<2x5x5x64xf32, #tpu.memory_space<vmem>>, vector<2x1x5x64xf32>
    %26 = vector.shape_cast %25 : vector<2x1x5x64xf32> to vector<2x5x64xf32>
    %27 = vector.shape_cast %24 : vector<2x5x64xf32> to vector<2x1x5x64xf32>
    tpu.vector_store %arg2[%c0_31, %c1_32, %c0_33, %c0_34], %27 {strides = array<i32>} : memref<2x5x5x64xf32, #tpu.memory_space<vmem>>, vector<2x1x5x64xf32>,
    %c0_35 = arith.constant 0 : index
    %c4 = arith.constant 4 : index
    %c0_36 = arith.constant 0 : index
    %c0_37 = arith.constant 0 : index
    %28 = vector.load %arg1[%c0_35, %c4, %c0_36, %c0_37] : memref<2x10x5x128xf32, #tpu.memory_space<vmem>>, vector<2x1x5x64xf32>
    %29 = vector.shape_cast %28 : vector<2x1x5x64xf32> to vector<2x5x64xf32>
    %c0_38 = arith.constant 0 : index
    %c4_39 = arith.constant 4 : index
    %c0_40 = arith.constant 0 : index
    %c64_41 = arith.constant 64 : index
    %30 = vector.load %arg1[%c0_38, %c4_39, %c0_40, %c64_41] : memref<2x10x5x128xf32, #tpu.memory_space<vmem>>, vector<2x1x5x64xf32>
    %31 = vector.shape_cast %30 : vector<2x1x5x64xf32> to vector<2x5x64xf32>
    %c0_42 = arith.constant 0 : index
    %c5 = arith.constant 5 : index
    %c0_43 = arith.constant 0 : index
    %c0_44 = arith.constant 0 : index
    %32 = vector.load %arg1[%c0_42, %c5, %c0_43, %c0_44] : memref<2x10x5x128xf32, #tpu.memory_space<vmem>>, vector<2x1x5x64xf32>
    %33 = vector.shape_cast %32 : vector<2x1x5x64xf32> to vector<2x5x64xf32>
    %c0_45 = arith.constant 0 : index
    %c5_46 = arith.constant 5 : index
    %c0_47 = arith.constant 0 : index
    %c64_48 = arith.constant 64 : index
    %34 = vector.load %arg1[%c0_45, %c5_46, %c0_47, %c64_48] : memref<2x10x5x128xf32, #tpu.memory_space<vmem>>, vector<2x1x5x64xf32>
    %35 = vector.shape_cast %34 : vector<2x1x5x64xf32> to vector<2x5x64xf32>
    %36 = arith.maximumf %29, %31 : vector<2x5x64xf32>
    %37 = arith.maximumf %33, %35 : vector<2x5x64xf32>
    %38 = arith.maximumf %36, %37 : vector<2x5x64xf32>
    %c0_49 = arith.constant 0 : index
    %c2_50 = arith.constant 2 : index
    %c0_51 = arith.constant 0 : index
    %c0_52 = arith.constant 0 : index
    %39 = vector.load %arg2[%c0_49, %c2_50, %c0_51, %c0_52] : memref<2x5x5x64xf32, #tpu.memory_space<vmem>>, vector<2x1x5x64xf32>
    %40 = vector.shape_cast %39 : vector<2x1x5x64xf32> to vector<2x5x64xf32>
    %41 = vector.shape_cast %38 : vector<2x5x64xf32> to vector<2x1x5x64xf32>
    tpu.vector_store %arg2[%c0_49, %c2_50, %c0_51, %c0_52], %41 {strides = array<i32>} : memref<2x5x5x64xf32, #tpu.memory_space<vmem>>, vector<2x1x5x64xf32>,
    %c0_53 = arith.constant 0 : index
    %c6 = arith.constant 6 : index
    %c0_54 = arith.constant 0 : index
    %c0_55 = arith.constant 0 : index
    %42 = vector.load %arg1[%c0_53, %c6, %c0_54, %c0_55] : memref<2x10x5x128xf32, #tpu.memory_space<vmem>>, vector<2x1x5x64xf32>
    %43 = vector.shape_cast %42 : vector<2x1x5x64xf32> to vector<2x5x64xf32>
    %c0_56 = arith.constant 0 : index
    %c6_57 = arith.constant 6 : index
    %c0_58 = arith.constant 0 : index
    %c64_59 = arith.constant 64 : index
    %44 = vector.load %arg1[%c0_56, %c6_57, %c0_58, %c64_59] : memref<2x10x5x128xf32, #tpu.memory_space<vmem>>, vector<2x1x5x64xf32>
    %45 = vector.shape_cast %44 : vector<2x1x5x64xf32> to vector<2x5x64xf32>
    %c0_60 = arith.constant 0 : index
    %c7 = arith.constant 7 : index
    %c0_61 = arith.constant 0 : index
    %c0_62 = arith.constant 0 : index
    %46 = vector.load %arg1[%c0_60, %c7, %c0_61, %c0_62] : memref<2x10x5x128xf32, #tpu.memory_space<vmem>>, vector<2x1x5x64xf32>
    %47 = vector.shape_cast %46 : vector<2x1x5x64xf32> to vector<2x5x64xf32>
    %c0_63 = arith.constant 0 : index
    %c7_64 = arith.constant 7 : index
    %c0_65 = arith.constant 0 : index
    %c64_66 = arith.constant 64 : index
    %48 = vector.load %arg1[%c0_63, %c7_64, %c0_65, %c64_66] : memref<2x10x5x128xf32, #tpu.memory_space<vmem>>, vector<2x1x5x64xf32>
    %49 = vector.shape_cast %48 : vector<2x1x5x64xf32> to vector<2x5x64xf32>
    %50 = arith.maximumf %43, %45 : vector<2x5x64xf32>
    %51 = arith.maximumf %47, %49 : vector<2x5x64xf32>
    %52 = arith.maximumf %50, %51 : vector<2x5x64xf32>
    %c0_67 = arith.constant 0 : index
    %c3_68 = arith.constant 3 : index
    %c0_69 = arith.constant 0 : index
    %c0_70 = arith.constant 0 : index
    %53 = vector.load %arg2[%c0_67, %c3_68, %c0_69, %c0_70] : memref<2x5x5x64xf32, #tpu.memory_space<vmem>>, vector<2x1x5x64xf32>
    %54 = vector.shape_cast %53 : vector<2x1x5x64xf32> to vector<2x5x64xf32>
    %55 = vector.shape_cast %52 : vector<2x5x64xf32> to vector<2x1x5x64xf32>
    tpu.vector_store %arg2[%c0_67, %c3_68, %c0_69, %c0_70], %55 {strides = array<i32>} : memref<2x5x5x64xf32, #tpu.memory_space<vmem>>, vector<2x1x5x64xf32>,
    %c0_71 = arith.constant 0 : index
    %c8 = arith.constant 8 : index
    %c0_72 = arith.constant 0 : index
    %c0_73 = arith.constant 0 : index
    %56 = vector.load %arg1[%c0_71, %c8, %c0_72, %c0_73] : memref<2x10x5x128xf32, #tpu.memory_space<vmem>>, vector<2x1x5x64xf32>
    %57 = vector.shape_cast %56 : vector<2x1x5x64xf32> to vector<2x5x64xf32>
    %c0_74 = arith.constant 0 : index
    %c8_75 = arith.constant 8 : index
    %c0_76 = arith.constant 0 : index
    %c64_77 = arith.constant 64 : index
    %58 = vector.load %arg1[%c0_74, %c8_75, %c0_76, %c64_77] : memref<2x10x5x128xf32, #tpu.memory_space<vmem>>, vector<2x1x5x64xf32>
    %59 = vector.shape_cast %58 : vector<2x1x5x64xf32> to vector<2x5x64xf32>
    %c0_78 = arith.constant 0 : index
    %c9 = arith.constant 9 : index
    %c0_79 = arith.constant 0 : index
    %c0_80 = arith.constant 0 : index
    %60 = vector.load %arg1[%c0_78, %c9, %c0_79, %c0_80] : memref<2x10x5x128xf32, #tpu.memory_space<vmem>>, vector<2x1x5x64xf32>
    %61 = vector.shape_cast %60 : vector<2x1x5x64xf32> to vector<2x5x64xf32>
    %c0_81 = arith.constant 0 : index
    %c9_82 = arith.constant 9 : index
    %c0_83 = arith.constant 0 : index
    %c64_84 = arith.constant 64 : index
    %62 = vector.load %arg1[%c0_81, %c9_82, %c0_83, %c64_84] : memref<2x10x5x128xf32, #tpu.memory_space<vmem>>, vector<2x1x5x64xf32>
    %63 = vector.shape_cast %62 : vector<2x1x5x64xf32> to vector<2x5x64xf32>
    %64 = arith.maximumf %57, %59 : vector<2x5x64xf32>
    %65 = arith.maximumf %61, %63 : vector<2x5x64xf32>
    %66 = arith.maximumf %64, %65 : vector<2x5x64xf32>
    %c0_85 = arith.constant 0 : index
    %c4_86 = arith.constant 4 : index
    %c0_87 = arith.constant 0 : index
    %c0_88 = arith.constant 0 : index
    %67 = vector.load %arg2[%c0_85, %c4_86, %c0_87, %c0_88] : memref<2x5x5x64xf32, #tpu.memory_space<vmem>>, vector<2x1x5x64xf32>
    %68 = vector.shape_cast %67 : vector<2x1x5x64xf32> to vector<2x5x64xf32>
    %69 = vector.shape_cast %66 : vector<2x5x64xf32> to vector<2x1x5x64xf32>
    tpu.vector_store %arg2[%c0_85, %c4_86, %c0_87, %c0_88], %69 {strides = array<i32>} : memref<2x5x5x64xf32, #tpu.memory_space<vmem>>, vector<2x1x5x64xf32>,
    return
  }
  func.func @transform_0(%arg0: i32) -> (i32, i32, i32, i32) {
    %c0_i32 = arith.constant 0 : i32
    %c0_i32_0 = arith.constant 0 : i32
    %c0_i32_1 = arith.constant 0 : i32
    %c0_i32_2 = arith.constant 0 : i32
    return %arg0, %c0_i32, %c0_i32_0, %c0_i32_1 : i32, i32, i32, i32
  }
  func.func @transform_1(%arg0: i32) -> (i32, i32, i32, i32) {
    %c0_i32 = arith.constant 0 : i32
    %c0_i32_0 = arith.constant 0 : i32
    %c0_i32_1 = arith.constant 0 : i32
    %c0_i32_2 = arith.constant 0 : i32
    return %arg0, %c0_i32, %c0_i32_0, %c0_i32_1 : i32, i32, i32, i32
  }
}

module attributes {stable_mosaic.version = 11 : i64} {
  func.func @_matmul_bias_kernel(%arg0: i32, %arg1: memref<18x576xf32, #tpu.memory_space<vmem>>, %arg2: memref<576x128xbf16, #tpu.memory_space<vmem>>, %arg3: memref<1x128xf32, #tpu.memory_space<vmem>>, %arg4: memref<18x128xf32, #tpu.memory_space<vmem>>) attributes {dimension_semantics = [#tpu.dimension_semantics<parallel>], iteration_bounds = array<i64: 1>, scalar_prefetch = 0 : i64, scratch_operands = 0 : i64, tpu.core_type = #tpu.core_type<tc>, window_params = [{transform_indices = @transform_0, window_bounds = array<i64: 18, 576>}, {pipeline_mode = #tpu.pipeline_mode<synchronous>, transform_indices = @transform_1, window_bounds = array<i64: 576, 128>}, {pipeline_mode = #tpu.pipeline_mode<synchronous>, transform_indices = @transform_2, window_bounds = array<i64: 1, 128>}, {transform_indices = @transform_3, window_bounds = array<i64: 18, 128>}]} {
    %c0 = arith.constant 0 : index
    %c0_0 = arith.constant 0 : index
    %0 = vector.load %arg1[%c0, %c0_0] : memref<18x576xf32, #tpu.memory_space<vmem>>, vector<18x576xf32>
    %1 = arith.truncf %0 : vector<18x576xf32> to vector<18x576xbf16>
    %c0_1 = arith.constant 0 : index
    %c0_2 = arith.constant 0 : index
    %2 = vector.load %arg2[%c0_1, %c0_2] : memref<576x128xbf16, #tpu.memory_space<vmem>>, vector<576x128xbf16>
    %cst = arith.constant dense<0.000000e+00> : vector<18x128xf32>
    %3 = tpu.matmul %1, %2, %cst {dimension_numbers = #tpu.dot_dimension_numbers<[1], [0], [0], [1], [0, 0, 1, 1], [], []>} : vector<18x576xbf16>, vector<576x128xbf16>, vector<18x128xf32> -> vector<18x128xf32>
    %c0_3 = arith.constant 0 : index
    %c0_4 = arith.constant 0 : index
    %4 = vector.load %arg3[%c0_3, %c0_4] : memref<1x128xf32, #tpu.memory_space<vmem>>, vector<1x128xf32>
    %5 = vector.broadcast %4 : vector<1x128xf32> to vector<18x128xf32>
    %6 = arith.addf %3, %5 : vector<18x128xf32>
    %cst_5 = arith.constant 0.000000e+00 : f32
    %7 = vector.broadcast %cst_5 : f32 to vector<18x128xf32>
    %8 = arith.maximumf %6, %7 : vector<18x128xf32>
    %c0_6 = arith.constant 0 : index
    %c0_7 = arith.constant 0 : index
    %9 = vector.load %arg4[%c0_6, %c0_7] : memref<18x128xf32, #tpu.memory_space<vmem>>, vector<18x128xf32>
    tpu.vector_store %arg4[%c0_6, %c0_7], %8 {strides = array<i32>} : memref<18x128xf32, #tpu.memory_space<vmem>>, vector<18x128xf32>,
    return
  }
  func.func @transform_0(%arg0: i32) -> (i32, i32) {
    %c0_i32 = arith.constant 0 : i32
    %c0_i32_0 = arith.constant 0 : i32
    return %arg0, %c0_i32 : i32, i32
  }
  func.func @transform_1(%arg0: i32) -> (i32, i32) {
    %c0_i32 = arith.constant 0 : i32
    %c0_i32_0 = arith.constant 0 : i32
    %c0_i32_1 = arith.constant 0 : i32
    return %c0_i32, %c0_i32_0 : i32, i32
  }
  func.func @transform_2(%arg0: i32) -> (i32, i32) {
    %c0_i32 = arith.constant 0 : i32
    %c0_i32_0 = arith.constant 0 : i32
    %c0_i32_1 = arith.constant 0 : i32
    return %c0_i32, %c0_i32_0 : i32, i32
  }
  func.func @transform_3(%arg0: i32) -> (i32, i32) {
    %c0_i32 = arith.constant 0 : i32
    %c0_i32_0 = arith.constant 0 : i32
    return %arg0, %c0_i32 : i32, i32
  }
}

module attributes {stable_mosaic.version = 11 : i64} {
  func.func @_matmul_bias_kernel(%arg0: i32, %arg1: memref<2x1152xf32, #tpu.memory_space<vmem>>, %arg2: memref<1152x128xbf16, #tpu.memory_space<vmem>>, %arg3: memref<1x128xf32, #tpu.memory_space<vmem>>, %arg4: memref<2x128xf32, #tpu.memory_space<vmem>>) attributes {dimension_semantics = [#tpu.dimension_semantics<parallel>], iteration_bounds = array<i64: 1>, scalar_prefetch = 0 : i64, scratch_operands = 0 : i64, tpu.core_type = #tpu.core_type<tc>, window_params = [{transform_indices = @transform_0, window_bounds = array<i64: 2, 1152>}, {pipeline_mode = #tpu.pipeline_mode<synchronous>, transform_indices = @transform_1, window_bounds = array<i64: 1152, 128>}, {pipeline_mode = #tpu.pipeline_mode<synchronous>, transform_indices = @transform_2, window_bounds = array<i64: 1, 128>}, {transform_indices = @transform_3, window_bounds = array<i64: 2, 128>}]} {
    %c0 = arith.constant 0 : index
    %c0_0 = arith.constant 0 : index
    %0 = vector.load %arg1[%c0, %c0_0] : memref<2x1152xf32, #tpu.memory_space<vmem>>, vector<2x1152xf32>
    %1 = arith.truncf %0 : vector<2x1152xf32> to vector<2x1152xbf16>
    %c0_1 = arith.constant 0 : index
    %c0_2 = arith.constant 0 : index
    %2 = vector.load %arg2[%c0_1, %c0_2] : memref<1152x128xbf16, #tpu.memory_space<vmem>>, vector<1152x128xbf16>
    %cst = arith.constant dense<0.000000e+00> : vector<2x128xf32>
    %3 = tpu.matmul %1, %2, %cst {dimension_numbers = #tpu.dot_dimension_numbers<[1], [0], [0], [1], [0, 0, 1, 1], [], []>} : vector<2x1152xbf16>, vector<1152x128xbf16>, vector<2x128xf32> -> vector<2x128xf32>
    %c0_3 = arith.constant 0 : index
    %c0_4 = arith.constant 0 : index
    %4 = vector.load %arg3[%c0_3, %c0_4] : memref<1x128xf32, #tpu.memory_space<vmem>>, vector<1x128xf32>
    %5 = vector.broadcast %4 : vector<1x128xf32> to vector<2x128xf32>
    %6 = arith.addf %3, %5 : vector<2x128xf32>
    %cst_5 = arith.constant 0.000000e+00 : f32
    %7 = vector.broadcast %cst_5 : f32 to vector<2x128xf32>
    %8 = arith.maximumf %6, %7 : vector<2x128xf32>
    %c0_6 = arith.constant 0 : index
    %c0_7 = arith.constant 0 : index
    %9 = vector.load %arg4[%c0_6, %c0_7] : memref<2x128xf32, #tpu.memory_space<vmem>>, vector<2x128xf32>
    tpu.vector_store %arg4[%c0_6, %c0_7], %8 {strides = array<i32>} : memref<2x128xf32, #tpu.memory_space<vmem>>, vector<2x128xf32>,
    return
  }
  func.func @transform_0(%arg0: i32) -> (i32, i32) {
    %c0_i32 = arith.constant 0 : i32
    %c0_i32_0 = arith.constant 0 : i32
    return %arg0, %c0_i32 : i32, i32
  }
  func.func @transform_1(%arg0: i32) -> (i32, i32) {
    %c0_i32 = arith.constant 0 : i32
    %c0_i32_0 = arith.constant 0 : i32
    %c0_i32_1 = arith.constant 0 : i32
    return %c0_i32, %c0_i32_0 : i32, i32
  }
  func.func @transform_2(%arg0: i32) -> (i32, i32) {
    %c0_i32 = arith.constant 0 : i32
    %c0_i32_0 = arith.constant 0 : i32
    %c0_i32_1 = arith.constant 0 : i32
    return %c0_i32, %c0_i32_0 : i32, i32
  }
  func.func @transform_3(%arg0: i32) -> (i32, i32) {
    %c0_i32 = arith.constant 0 : i32
    %c0_i32_0 = arith.constant 0 : i32
    return %arg0, %c0_i32 : i32, i32
  }
}

module attributes {stable_mosaic.version = 11 : i64} {
  func.func @_matmul_bias_kernel(%arg0: i32, %arg1: memref<2x128xf32, #tpu.memory_space<vmem>>, %arg2: memref<128x128xbf16, #tpu.memory_space<vmem>>, %arg3: memref<1x128xf32, #tpu.memory_space<vmem>>, %arg4: memref<2x128xf32, #tpu.memory_space<vmem>>) attributes {dimension_semantics = [#tpu.dimension_semantics<parallel>], iteration_bounds = array<i64: 1>, scalar_prefetch = 0 : i64, scratch_operands = 0 : i64, tpu.core_type = #tpu.core_type<tc>, window_params = [{transform_indices = @transform_0, window_bounds = array<i64: 2, 128>}, {pipeline_mode = #tpu.pipeline_mode<synchronous>, transform_indices = @transform_1, window_bounds = array<i64: 128, 128>}, {pipeline_mode = #tpu.pipeline_mode<synchronous>, transform_indices = @transform_2, window_bounds = array<i64: 1, 128>}, {transform_indices = @transform_3, window_bounds = array<i64: 2, 128>}]} {
    %c0 = arith.constant 0 : index
    %c0_0 = arith.constant 0 : index
    %0 = vector.load %arg1[%c0, %c0_0] : memref<2x128xf32, #tpu.memory_space<vmem>>, vector<2x128xf32>
    %1 = arith.truncf %0 : vector<2x128xf32> to vector<2x128xbf16>
    %c0_1 = arith.constant 0 : index
    %c0_2 = arith.constant 0 : index
    %2 = vector.load %arg2[%c0_1, %c0_2] : memref<128x128xbf16, #tpu.memory_space<vmem>>, vector<128x128xbf16>
    %cst = arith.constant dense<0.000000e+00> : vector<2x128xf32>
    %3 = tpu.matmul %1, %2, %cst {dimension_numbers = #tpu.dot_dimension_numbers<[1], [0], [0], [1], [0, 0, 1, 1], [], []>} : vector<2x128xbf16>, vector<128x128xbf16>, vector<2x128xf32> -> vector<2x128xf32>
    %c0_3 = arith.constant 0 : index
    %c0_4 = arith.constant 0 : index
    %4 = vector.load %arg3[%c0_3, %c0_4] : memref<1x128xf32, #tpu.memory_space<vmem>>, vector<1x128xf32>
    %5 = vector.broadcast %4 : vector<1x128xf32> to vector<2x128xf32>
    %6 = arith.addf %3, %5 : vector<2x128xf32>
    %c0_5 = arith.constant 0 : index
    %c0_6 = arith.constant 0 : index
    %7 = vector.load %arg4[%c0_5, %c0_6] : memref<2x128xf32, #tpu.memory_space<vmem>>, vector<2x128xf32>
    tpu.vector_store %arg4[%c0_5, %c0_6], %6 {strides = array<i32>} : memref<2x128xf32, #tpu.memory_space<vmem>>, vector<2x128xf32>,
    return
  }
  func.func @transform_0(%arg0: i32) -> (i32, i32) {
    %c0_i32 = arith.constant 0 : i32
    %c0_i32_0 = arith.constant 0 : i32
    return %arg0, %c0_i32 : i32, i32
  }
  func.func @transform_1(%arg0: i32) -> (i32, i32) {
    %c0_i32 = arith.constant 0 : i32
    %c0_i32_0 = arith.constant 0 : i32
    %c0_i32_1 = arith.constant 0 : i32
    return %c0_i32, %c0_i32_0 : i32, i32
  }
  func.func @transform_2(%arg0: i32) -> (i32, i32) {
    %c0_i32 = arith.constant 0 : i32
    %c0_i32_0 = arith.constant 0 : i32
    %c0_i32_1 = arith.constant 0 : i32
    return %c0_i32, %c0_i32_0 : i32, i32
  }
  func.func @transform_3(%arg0: i32) -> (i32, i32) {
    %c0_i32 = arith.constant 0 : i32
    %c0_i32_0 = arith.constant 0 : i32
    return %arg0, %c0_i32 : i32, i32
  }
}

</mosaic_0001>

<bundles_post_ra>
// kernel: cnn2_forward.7
= control target key start
LH: loop header
LB: loop body
LE: loop exit
PB: predicated region body
PF: predicated region fallthrough
CT: control target
= control target key end

     0   :  { %s1654_s12 = smov 0   ;;  %s1656_s13 = smov 0   ;;  %s2198_s0 = inlined_call_operand.vmem [shape: f32[1352,9], index: 0, kind: input, shape index: {}]   ;;  %s2199_s1 = inlined_call_operand.vmem [shape: bf16[9,32], index: 1, kind: input, shape index: {}]   ;;  %s2200_s2 = inlined_call_operand.vmem [shape: f32[1,32], index: 2, kind: input, shape index: {}]   ;;  %s2201_s3 = inlined_call_operand.vmem [shape: f32[1352,32], index: 3, kind: output, shape index: {}]  }
   0x1   :  { %s1658_s14 = smov 0  }
   0x2 LB: > { %s1667_s15 = sadd.s32 4294967295, %s1599_s14   ;;  %s1669_s16 = sadd.s32 1, %s1599_s14   ;;  %s1599_s14 = sphi %s1658_s14, %s2210_s14   ;;  %s1595_s13 = sphi %s1656_s13, %s2209_s13   ;;  %s1591_s12 = sphi %s1654_s12, %s2208_s12  }
   0x3   : > { %s85_s17 = ssub.s32 %s1599_s14, %s1669_s16  ;;  %s88_s18 = sadd.s32 1, %s1595_s13 }
   0x4   : > { %p86_p0 = scmp.eq.s32.totalorder %s85_s17, 0  ;;  %p98_p1 = scmp.ne.s32.totalorder %s1595_s13, %s1591_s12 }
   0x5   : > { %p99_p2 = scmp.eq.s32.totalorder %s1667_s15, 2  ;;  %p1296_p3 = scmp.ge.s32.totalorder %s1599_s14, 1 }
   0x6   : > { %s1677_s19 = scalar_select %p86_p0, %s1595_s13, %s88_s18  }
   0x7   : > { %p1679_p4 = por %p99_p2, %p98_p1  ;;  %p146_p5 = scmp.lt.s32.totalorder %s1599_s14, 4 }
   0x9   : > { %p147_p6 = pnand %p1296_p3, %p146_p5 }
   0xa   : > { %s1687_s23 = sshll.u32 (!%p147_p6), %s1667_s15, 6  ;;  %s170_s29 = sand.u32 (!%p147_p6), 1, %s1591_s12  }
   0xb   : > { %150 = sbr.rel (%p147_p6) target bundleno = 349 (0x15d), region = 32  ;;  %p178_p7 = scmp.lt.s32.totalorder (!%p147_p6), %s1687_s23, 168 }
   0xc   : > { %s1297_s5 = sshll.u32 (!%p147_p6), %s170_s29, 9 }
   0xd   : > { %s1802_s6 = scalar_lea.vmem (!%p147_p6), [#allocation2], %s1297_s5  }
  0x10   : > { %v1544_v0 = vld [vmem:[%s2199_s1] sm:$0x1f]   ;;  %vm400_vm0 = vcmask 1043456   ;;  %vm401_vm1 = vcmask 1044480   ;;  %v1633_v1 = vmov 65535   ;;  %s179_s24 = scalar_select %p178_p7, %s1687_s23, 168 }
  0x11   : > { %v402_v2 = vsel %vm400_vm0, 4294967295, %v1633_v1  ;;  %vm303_vm2 = vcmask 72704   ;;  %vm760_vm3 = vcmask 261120   ;;  %s833_s7 = ssub.s32 (%p1679_p4), 169, %s1687_s23  ;;  %s1351_s8 = sshll.u32 (%p1679_p4), %s1667_s15, 9 }
  0x12   : > { %v403_v3 = vsel %vm401_vm1, %v402_v2, 0  ;;  %s1299_s25 = sshll.u32 %s179_s24, 3  ;;  %p834_p8 = scmp.lt.s32.totalorder (%p1679_p4), %s833_s7, 64 }
  0x13   : > { %v405_v4 = vand.u32 %v1544_v0, %v403_v3  ;;  %s1694_s28 = scalar_lea.vmem %s2198_s0, %s1299_s25  ;;  %s1999_s11 = scalar_lea.vmem (%p1679_p4), %s2201_s3, %s1351_s8  }
  0x14   : > { %v193_v5 = vld [vmem:[%s1694_s28] sm:$0xff]  ;;  %v194_v6 = vld [vmem:[%s1694_s28 + $0x8] sm:$0xff]  ;;  %v195_v10 = vld [vmem:[%s1694_s28 + $0x10] sm:$0xff] }
  0x15   : > { %1387 = vmatprep.subr.bf16.mxu0 %v405_v4  ;;  %1453 = vmatprep.subr.bf16.mxu1 %v405_v4  ;;  %v225_v7 = vld [vmem:[%s1694_s28 + $0x100] sm:$0xff]  ;;  %v257_v8 = vpack.c.bf16 %v194_v6, %v193_v5  ;;  %v226_v9 = vld [vmem:[%s1694_s28 + $0x108] sm:$0xff]  ;;  %v196_v11 = vld [vmem:[%s1694_s28 + $0x18] sm:$0xff] }
  0x16   : > { %1388 = vmatpush3.bf16.msra.mxu0 %v405_v4  ;;  %1454 = vmatpush3.bf16.msra.mxu1 %v405_v4  ;;  %v273_v12 = vpack.c.bf16 %v226_v9, %v225_v7  ;;  %v258_v13 = vpack.c.bf16 %v196_v11, %v195_v10  ;;  %v227_v14 = vld [vmem:[%s1694_s28 + $0x110] sm:$0xff]  ;;  %v228_v15 = vld [vmem:[%s1694_s28 + $0x118] sm:$0xff]  ;;  %v197_v16 = vld [vmem:[%s1694_s28 + $0x20] sm:$0xff] }
  0x17   : > { %1389 = vmatprep.mubr.msk.bf16.mxu0 %vm303_vm2, %v257_v8  ;;  %v274_v17 = vpack.c.bf16 %v228_v15, %v227_v14  ;;  %v198_v18 = vld [vmem:[%s1694_s28 + $0x28] sm:$0xff]  ;;  %v229_v19 = vld [vmem:[%s1694_s28 + $0x120] sm:$0xff]  ;;  %v199_v23 = vld [vmem:[%s1694_s28 + $0x30] sm:$0xff] }
  0x18   : > { %v230_v20 = vld [vmem:[%s1694_s28 + $0x128] sm:$0xff]  ;;  %1421 = vmatprep.mubr.msk.bf16.mxu1 %vm303_vm2, %v273_v12  ;;  %v259_v21 = vpack.c.bf16 %v198_v18, %v197_v16  ;;  %v200_v24 = vld [vmem:[%s1694_s28 + $0x38] sm:$0xff]  ;;  %v231_v25 = vld [vmem:[%s1694_s28 + $0x130] sm:$0xff] }
  0x19   : > { %1390 = vmatmul.mubr.msk.bf16.vlgmr.msra.gmra.mxu0 %vm303_vm2, %v258_v13  ;;  %v275_v22 = vpack.c.bf16 %v230_v20, %v229_v19  ;;  %1422 = vmatmul.mubr.msk.bf16.vlgmr.msra.gmra.mxu1 %vm303_vm2, %v274_v17  ;;  %v232_v26 = vld [vmem:[%s1694_s28 + $0x138] sm:$0xff]  ;;  %v201_v27 = vld [vmem:[%s1694_s28 + $0x40] sm:$0xff]  ;;  %v202_v28 = vld [vmem:[%s1694_s28 + $0x48] sm:$0xff]  ;;  %v260_v31 = vpack.c.bf16 %v200_v24, %v199_v23 }
  0x1a   : > { %1393 = vmatprep.mubr.msk.bf16.mxu0 %vm303_vm2, %v259_v21  ;;  %v233_v29 = vld [vmem:[%s1694_s28 + $0x140] sm:$0xff]  ;;  %v234_v30 = vld [vmem:[%s1694_s28 + $0x148] sm:$0xff]  ;;  %v276_v32 = vpack.c.bf16 %v232_v26, %v231_v25  ;;  %v261_v33 = vpack.c.bf16 %v202_v28, %v201_v27  ;;  %v203_v35 = vld [vmem:[%s1694_s28 + $0x50] sm:$0xff] }
  0x1b   : > { %1425 = vmatprep.mubr.msk.bf16.mxu1 %vm303_vm2, %v275_v22  ;;  %v277_v34 = vpack.c.bf16 %v234_v30, %v233_v29  ;;  %v204_v36 = vld [vmem:[%s1694_s28 + $0x58] sm:$0xff]  ;;  %v235_v37 = vld [vmem:[%s1694_s28 + $0x150] sm:$0xff]  ;;  %v205_v39 = vld [vmem:[%s1694_s28 + $0x60] sm:$0xff] }
  0x1c   : > { %v236_v38 = vld [vmem:[%s1694_s28 + $0x158] sm:$0xff]  ;;  %v206_v40 = vld [vmem:[%s1694_s28 + $0x68] sm:$0xff]  ;;  %v237_v41 = vld [vmem:[%s1694_s28 + $0x160] sm:$0xff]  ;;  %v262_v43 = vpack.c.bf16 %v204_v36, %v203_v35 }
  0x1d   : > { %v238_v42 = vld [vmem:[%s1694_s28 + $0x168] sm:$0xff]  ;;  %v278_v44 = vpack.c.bf16 %v236_v38, %v235_v37  ;;  %v263_v45 = vpack.c.bf16 %v206_v40, %v205_v39  ;;  %v207_v47 = vld [vmem:[%s1694_s28 + $0x70] sm:$0xff]  ;;  %v208_v48 = vld [vmem:[%s1694_s28 + $0x78] sm:$0xff] }
  0x1e   : > { %v279_v46 = vpack.c.bf16 %v238_v42, %v237_v41  ;;  %v239_v49 = vld [vmem:[%s1694_s28 + $0x170] sm:$0xff]  ;;  %v240_v50 = vld [vmem:[%s1694_s28 + $0x178] sm:$0xff]  ;;  %v209_v51 = vld [vmem:[%s1694_s28 + $0x80] sm:$0xff]  ;;  %v264_v55 = vpack.c.bf16 %v208_v48, %v207_v47 }
  0x1f   : > { %v210_v52 = vld [vmem:[%s1694_s28 + $0x88] sm:$0xff]  ;;  %v241_v53 = vld [vmem:[%s1694_s28 + $0x180] sm:$0xff]  ;;  %v280_v56 = vpack.c.bf16 %v240_v50, %v239_v49  ;;  %v211_v59 = vld [vmem:[%s1694_s28 + $0x90] sm:$0xff] }
  0x20   : > { %v242_v54 = vld [vmem:[%s1694_s28 + $0x188] sm:$0xff]  ;;  %v265_v57 = vpack.c.bf16 %v210_v52, %v209_v51  ;;  %v212_v60 = vld [vmem:[%s1694_s28 + $0x98] sm:$0xff]  ;;  %v243_v61 = vld [vmem:[%s1694_s28 + $0x190] sm:$0xff] }
  0x21   : > { %1394 = vmatmul.mubr.msk.bf16.gmra.mxu0 %vm303_vm2, %v260_v31  ;;  %1426 = vmatmul.mubr.msk.bf16.gmra.mxu1 %vm303_vm2, %v276_v32  ;;  %v281_v58 = vpack.c.bf16 %v242_v54, %v241_v53  ;;  %v244_v62 = vld [vmem:[%s1694_s28 + $0x198] sm:$0xff]  ;;  %v213_v63 = vld [vmem:[%s1694_s28 + $0xa0] sm:$0xff]  ;;  %v214_v0 = vld [vmem:[%s1694_s28 + $0xa8] sm:$0xff]  ;;  %v266_v3 = vpack.c.bf16 %v212_v60, %v211_v59 }
  0x22   : > { %1397 = vmatprep.mubr.msk.bf16.mxu0 %vm303_vm2, %v261_v33  ;;  %1429 = vmatprep.mubr.msk.bf16.mxu1 %vm303_vm2, %v277_v34  ;;  %v245_v1 = vld [vmem:[%s1694_s28 + $0x1a0] sm:$0xff]  ;;  %v246_v2 = vld [vmem:[%s1694_s28 + $0x1a8] sm:$0xff]  ;;  %v282_v4 = vpack.c.bf16 %v244_v62, %v243_v61  ;;  %v267_v5 = vpack.c.bf16 %v214_v0, %v213_v63  ;;  %v215_v7 = vld [vmem:[%s1694_s28 + $0xb0] sm:$0xff] }
  0x23   : > { %v283_v6 = vpack.c.bf16 %v246_v2, %v245_v1  ;;  %v216_v8 = vld [vmem:[%s1694_s28 + $0xb8] sm:$0xff]  ;;  %v247_v9 = vld [vmem:[%s1694_s28 + $0x1b0] sm:$0xff]  ;;  %v217_v11 = vld [vmem:[%s1694_s28 + $0xc0] sm:$0xff] }
  0x24   : > { %v248_v10 = vld [vmem:[%s1694_s28 + $0x1b8] sm:$0xff]  ;;  %v218_v12 = vld [vmem:[%s1694_s28 + $0xc8] sm:$0xff]  ;;  %v249_v13 = vld [vmem:[%s1694_s28 + $0x1c0] sm:$0xff]  ;;  %v268_v15 = vpack.c.bf16 %v216_v8, %v215_v7 }
  0x25   : > { %v250_v14 = vld [vmem:[%s1694_s28 + $0x1c8] sm:$0xff]  ;;  %v284_v16 = vpack.c.bf16 %v248_v10, %v247_v9  ;;  %v269_v17 = vpack.c.bf16 %v218_v12, %v217_v11  ;;  %v219_v19 = vld [vmem:[%s1694_s28 + $0xd0] sm:$0xff]  ;;  %v220_v20 = vld [vmem:[%s1694_s28 + $0xd8] sm:$0xff] }
  0x26   : > { %v285_v18 = vpack.c.bf16 %v250_v14, %v249_v13  ;;  %v251_v21 = vld [vmem:[%s1694_s28 + $0x1d0] sm:$0xff]  ;;  %v252_v22 = vld [vmem:[%s1694_s28 + $0x1d8] sm:$0xff]  ;;  %v221_v23 = vld [vmem:[%s1694_s28 + $0xe0] sm:$0xff]  ;;  %v270_v27 = vpack.c.bf16 %v220_v20, %v219_v19 }
  0x27   : > { %v222_v24 = vld [vmem:[%s1694_s28 + $0xe8] sm:$0xff]  ;;  %v253_v25 = vld [vmem:[%s1694_s28 + $0x1e0] sm:$0xff]  ;;  %v286_v28 = vpack.c.bf16 %v252_v22, %v251_v21  ;;  %v223_v31 = vld [vmem:[%s1694_s28 + $0xf0] sm:$0xff] }
  0x28   : > { %v254_v26 = vld [vmem:[%s1694_s28 + $0x1e8] sm:$0xff]  ;;  %v271_v29 = vpack.c.bf16 %v222_v24, %v221_v23  ;;  %v224_v32 = vld [vmem:[%s1694_s28 + $0xf8] sm:$0xff]  ;;  %v255_v33 = vld [vmem:[%s1694_s28 + $0x1f0] sm:$0xff] }
  0x29   : > { %1398 = vmatmul.mubr.msk.bf16.gmra.mxu0 %vm303_vm2, %v262_v43  ;;  %1430 = vmatmul.mubr.msk.bf16.gmra.mxu1 %vm303_vm2, %v278_v44  ;;  %v287_v30 = vpack.c.bf16 %v254_v26, %v253_v25  ;;  %v256_v34 = vld [vmem:[%s1694_s28 + $0x1f8] sm:$0xff]  ;;  %v272_v35 = vpack.c.bf16 %v224_v32, %v223_v31  ;;  %v1796_v37 = vld [vmem:[%s2200_s2] ss:$0 sm:$0xff] }
  0x2a   : > { %1401 = vmatprep.mubr.msk.bf16.mxu0 %vm303_vm2, %v263_v45  ;;  %1433 = vmatprep.mubr.msk.bf16.mxu1 %vm303_vm2, %v279_v46  ;;  %v288_v36 = vpack.c.bf16 %v256_v34, %v255_v33 }
  0x31   : > { %1402 = vmatmul.mubr.msk.bf16.gmra.mxu0 %vm303_vm2, %v264_v55  ;;  %1434 = vmatmul.mubr.msk.bf16.gmra.mxu1 %vm303_vm2, %v280_v56 }
  0x32   : > { %1405 = vmatprep.mubr.msk.bf16.mxu0 %vm303_vm2, %v265_v57  ;;  %1437 = vmatprep.mubr.msk.bf16.mxu1 %vm303_vm2, %v281_v58 }
  0x39   : > { %1406 = vmatmul.mubr.msk.bf16.gmra.mxu0 %vm303_vm2, %v266_v3  ;;  %1438 = vmatmul.mubr.msk.bf16.gmra.mxu1 %vm303_vm2, %v282_v4 }
  0x3a   : > { %1409 = vmatprep.mubr.msk.bf16.mxu0 %vm303_vm2, %v267_v5  ;;  %1441 = vmatprep.mubr.msk.bf16.mxu1 %vm303_vm2, %v283_v6 }
  0x41   : > { %1410 = vmatmul.mubr.msk.bf16.gmra.mxu0 %vm303_vm2, %v268_v15  ;;  %1442 = vmatmul.mubr.msk.bf16.gmra.mxu1 %vm303_vm2, %v284_v16 }
  0x42   : > { %1413 = vmatprep.mubr.msk.bf16.mxu0 %vm303_vm2, %v269_v17  ;;  %1445 = vmatprep.mubr.msk.bf16.mxu1 %vm303_vm2, %v285_v18 }
  0x49   : > { %1414 = vmatmul.mubr.msk.bf16.gmra.mxu0 %vm303_vm2, %v270_v27  ;;  %1446 = vmatmul.mubr.msk.bf16.gmra.mxu1 %vm303_vm2, %v286_v28 }
  0x4a   : > { %1417 = vmatprep.mubr.msk.bf16.mxu0 %vm303_vm2, %v271_v29  ;;  %1449 = vmatprep.mubr.msk.bf16.mxu1 %vm303_vm2, %v287_v30 }
  0x51   : > { %1418 = vmatmul.mubr.msk.bf16.gmra.mxu0 %vm303_vm2, %v272_v35  ;;  %1450 = vmatmul.mubr.msk.bf16.gmra.mxu1 %vm303_vm2, %v288_v36 }
  0xd9   : > { %v1391_v38 = vpop.f32.mrf.mxu0  ;;  %v1423_v40 = vpop.f32.mrf.mxu1 }
  0xda   : > { %v450_v39 = vadd.f32 %v1391_v38, %v1796_v37  ;;  %v578_v41 = vadd.f32 %v1423_v40, %v1796_v37 }
  0xdb   : > { %v441_v42 = vpop.f32.mrf.mxu0  ;;  %v569_v45 = vpop.f32.mrf.mxu1 }
  0xdc   : > { %v698_v43 = vmax.f32 %v450_v39, 0.0  ;;  %v442_v44 = vadd.f32 %v1796_v37, %v441_v42  ;;  %v730_v46 = vmax.f32 %v578_v41, 0.0  ;;  %v570_v47 = vadd.f32 %v1796_v37, %v569_v45 }
  0xdd   : > { %v1392_v48 = vpop.f32.mrf.mxu0  ;;  %v1424_v51 = vpop.f32.mrf.mxu1 }
  0xde   : > { %763 = vst.msk [vmem:[%s1802_s6 + $0x10] sm:$0xff] %vm760_vm3, %v698_v43  ;;  %v696_v49 = vmax.f32 %v442_v44, 0.0  ;;  %v453_v50 = vadd.f32 %v1392_v48, %v1796_v37  ;;  %795 = vst.msk [vmem:[%s1802_s6 + $0x110] sm:$0xff] %vm760_vm3, %v730_v46  ;;  %v728_v52 = vmax.f32 %v570_v47, 0.0  ;;  %v581_v53 = vadd.f32 %v1424_v51, %v1796_v37 }
  0xdf   : > { %v444_v54 = vpop.f32.mrf.mxu0  ;;  %v572_v57 = vpop.f32.mrf.mxu1 }
  0xe0   : > { %761 = vst.msk [vmem:[%s1802_s6] sm:$0xff] %vm760_vm3, %v696_v49  ;;  %v699_v55 = vmax.f32 %v453_v50, 0.0  ;;  %v445_v56 = vadd.f32 %v1796_v37, %v444_v54  ;;  %793 = vst.msk [vmem:[%s1802_s6 + $0x100] sm:$0xff] %vm760_vm3, %v728_v52  ;;  %v731_v58 = vmax.f32 %v581_v53, 0.0  ;;  %v573_v59 = vadd.f32 %v1796_v37, %v572_v57 }
  0xe1   : > { %v1395_v60 = vpop.f32.mrf.mxu0  ;;  %v1427_v63 = vpop.f32.mrf.mxu1 }
  0xe2   : > { %764 = vst.msk [vmem:[%s1802_s6 + $0x18] sm:$0xff] %vm760_vm3, %v699_v55  ;;  %v697_v61 = vmax.f32 %v445_v56, 0.0  ;;  %v466_v62 = vadd.f32 %v1395_v60, %v1796_v37  ;;  %796 = vst.msk [vmem:[%s1802_s6 + $0x118] sm:$0xff] %vm760_vm3, %v731_v58  ;;  %v729_v0 = vmax.f32 %v573_v59, 0.0  ;;  %v594_v1 = vadd.f32 %v1427_v63, %v1796_v37 }
  0xe3   : > { %v457_v2 = vpop.f32.mrf.mxu0  ;;  %v585_v5 = vpop.f32.mrf.mxu1 }
  0xe4   : > { %762 = vst.msk [vmem:[%s1802_s6 + $0x8] sm:$0xff] %vm760_vm3, %v697_v61  ;;  %v702_v3 = vmax.f32 %v466_v62, 0.0  ;;  %v458_v4 = vadd.f32 %v1796_v37, %v457_v2  ;;  %794 = vst.msk [vmem:[%s1802_s6 + $0x108] sm:$0xff] %vm760_vm3, %v729_v0  ;;  %v734_v6 = vmax.f32 %v594_v1, 0.0  ;;  %v586_v7 = vadd.f32 %v1796_v37, %v585_v5 }
  0xe5   : > { %v1396_v8 = vpop.f32.mrf.mxu0  ;;  %v1428_v11 = vpop.f32.mrf.mxu1 }
  0xe6   : > { %767 = vst.msk [vmem:[%s1802_s6 + $0x30] sm:$0xff] %vm760_vm3, %v702_v3  ;;  %v700_v9 = vmax.f32 %v458_v4, 0.0  ;;  %v469_v10 = vadd.f32 %v1396_v8, %v1796_v37  ;;  %799 = vst.msk [vmem:[%s1802_s6 + $0x130] sm:$0xff] %vm760_vm3, %v734_v6  ;;  %v732_v12 = vmax.f32 %v586_v7, 0.0  ;;  %v597_v13 = vadd.f32 %v1428_v11, %v1796_v37 }
  0xe7   : > { %v460_v14 = vpop.f32.mrf.mxu0  ;;  %v588_v17 = vpop.f32.mrf.mxu1 }
  0xe8   : > { %765 = vst.msk [vmem:[%s1802_s6 + $0x20] sm:$0xff] %vm760_vm3, %v700_v9  ;;  %v703_v15 = vmax.f32 %v469_v10, 0.0  ;;  %v461_v16 = vadd.f32 %v1796_v37, %v460_v14  ;;  %797 = vst.msk [vmem:[%s1802_s6 + $0x120] sm:$0xff] %vm760_vm3, %v732_v12  ;;  %v735_v18 = vmax.f32 %v597_v13, 0.0  ;;  %v589_v19 = vadd.f32 %v1796_v37, %v588_v17 }
  0xe9   : > { %v1399_v20 = vpop.f32.mrf.mxu0  ;;  %v1431_v23 = vpop.f32.mrf.mxu1 }
  0xea   : > { %768 = vst.msk [vmem:[%s1802_s6 + $0x38] sm:$0xff] %vm760_vm3, %v703_v15  ;;  %v701_v21 = vmax.f32 %v461_v16, 0.0  ;;  %v482_v22 = vadd.f32 %v1399_v20, %v1796_v37  ;;  %800 = vst.msk [vmem:[%s1802_s6 + $0x138] sm:$0xff] %vm760_vm3, %v735_v18  ;;  %v733_v24 = vmax.f32 %v589_v19, 0.0  ;;  %v610_v25 = vadd.f32 %v1431_v23, %v1796_v37 }
  0xeb   : > { %v473_v26 = vpop.f32.mrf.mxu0  ;;  %v601_v29 = vpop.f32.mrf.mxu1 }
  0xec   : > { %766 = vst.msk [vmem:[%s1802_s6 + $0x28] sm:$0xff] %vm760_vm3, %v701_v21  ;;  %v706_v27 = vmax.f32 %v482_v22, 0.0  ;;  %v474_v28 = vadd.f32 %v1796_v37, %v473_v26  ;;  %798 = vst.msk [vmem:[%s1802_s6 + $0x128] sm:$0xff] %vm760_vm3, %v733_v24  ;;  %v738_v30 = vmax.f32 %v610_v25, 0.0  ;;  %v602_v31 = vadd.f32 %v1796_v37, %v601_v29 }
  0xed   : > { %v1400_v32 = vpop.f32.mrf.mxu0  ;;  %v1432_v35 = vpop.f32.mrf.mxu1 }
  0xee   : > { %771 = vst.msk [vmem:[%s1802_s6 + $0x50] sm:$0xff] %vm760_vm3, %v706_v27  ;;  %v704_v33 = vmax.f32 %v474_v28, 0.0  ;;  %v485_v34 = vadd.f32 %v1400_v32, %v1796_v37  ;;  %803 = vst.msk [vmem:[%s1802_s6 + $0x150] sm:$0xff] %vm760_vm3, %v738_v30  ;;  %v736_v36 = vmax.f32 %v602_v31, 0.0  ;;  %v613_v38 = vadd.f32 %v1432_v35, %v1796_v37 }
  0xef   : > { %v476_v39 = vpop.f32.mrf.mxu0  ;;  %v604_v42 = vpop.f32.mrf.mxu1 }
  0xf0   : > { %769 = vst.msk [vmem:[%s1802_s6 + $0x40] sm:$0xff] %vm760_vm3, %v704_v33  ;;  %v707_v40 = vmax.f32 %v485_v34, 0.0  ;;  %v477_v41 = vadd.f32 %v1796_v37, %v476_v39  ;;  %801 = vst.msk [vmem:[%s1802_s6 + $0x140] sm:$0xff] %vm760_vm3, %v736_v36  ;;  %v739_v43 = vmax.f32 %v613_v38, 0.0  ;;  %v605_v44 = vadd.f32 %v1796_v37, %v604_v42 }
  0xf1   : > { %v1403_v45 = vpop.f32.mrf.mxu0  ;;  %v1435_v48 = vpop.f32.mrf.mxu1 }
  0xf2   : > { %772 = vst.msk [vmem:[%s1802_s6 + $0x58] sm:$0xff] %vm760_vm3, %v707_v40  ;;  %v705_v46 = vmax.f32 %v477_v41, 0.0  ;;  %v498_v47 = vadd.f32 %v1403_v45, %v1796_v37  ;;  %804 = vst.msk [vmem:[%s1802_s6 + $0x158] sm:$0xff] %vm760_vm3, %v739_v43  ;;  %v737_v49 = vmax.f32 %v605_v44, 0.0  ;;  %v626_v50 = vadd.f32 %v1435_v48, %v1796_v37 }
  0xf3   : > { %v489_v51 = vpop.f32.mrf.mxu0  ;;  %v617_v54 = vpop.f32.mrf.mxu1 }
  0xf4   : > { %770 = vst.msk [vmem:[%s1802_s6 + $0x48] sm:$0xff] %vm760_vm3, %v705_v46  ;;  %v710_v52 = vmax.f32 %v498_v47, 0.0  ;;  %v490_v53 = vadd.f32 %v1796_v37, %v489_v51  ;;  %802 = vst.msk [vmem:[%s1802_s6 + $0x148] sm:$0xff] %vm760_vm3, %v737_v49  ;;  %v742_v55 = vmax.f32 %v626_v50, 0.0  ;;  %v618_v56 = vadd.f32 %v1796_v37, %v617_v54 }
  0xf5   : > { %v1404_v57 = vpop.f32.mrf.mxu0  ;;  %v1436_v60 = vpop.f32.mrf.mxu1 }
  0xf6   : > { %775 = vst.msk [vmem:[%s1802_s6 + $0x70] sm:$0xff] %vm760_vm3, %v710_v52  ;;  %v708_v58 = vmax.f32 %v490_v53, 0.0  ;;  %v501_v59 = vadd.f32 %v1404_v57, %v1796_v37  ;;  %807 = vst.msk [vmem:[%s1802_s6 + $0x170] sm:$0xff] %vm760_vm3, %v742_v55  ;;  %v740_v61 = vmax.f32 %v618_v56, 0.0  ;;  %v629_v62 = vadd.f32 %v1436_v60, %v1796_v37 }
  0xf7   : > { %v492_v63 = vpop.f32.mrf.mxu0  ;;  %v620_v2 = vpop.f32.mrf.mxu1 }
  0xf8   : > { %773 = vst.msk [vmem:[%s1802_s6 + $0x60] sm:$0xff] %vm760_vm3, %v708_v58  ;;  %v711_v0 = vmax.f32 %v501_v59, 0.0  ;;  %v493_v1 = vadd.f32 %v1796_v37, %v492_v63  ;;  %805 = vst.msk [vmem:[%s1802_s6 + $0x160] sm:$0xff] %vm760_vm3, %v740_v61  ;;  %v743_v3 = vmax.f32 %v629_v62, 0.0  ;;  %v621_v4 = vadd.f32 %v1796_v37, %v620_v2 }
  0xf9   : > { %v1407_v5 = vpop.f32.mrf.mxu0  ;;  %v1439_v8 = vpop.f32.mrf.mxu1 }
  0xfa   : > { %776 = vst.msk [vmem:[%s1802_s6 + $0x78] sm:$0xff] %vm760_vm3, %v711_v0  ;;  %v709_v6 = vmax.f32 %v493_v1, 0.0  ;;  %v514_v7 = vadd.f32 %v1407_v5, %v1796_v37  ;;  %808 = vst.msk [vmem:[%s1802_s6 + $0x178] sm:$0xff] %vm760_vm3, %v743_v3  ;;  %v741_v9 = vmax.f32 %v621_v4, 0.0  ;;  %v642_v10 = vadd.f32 %v1439_v8, %v1796_v37 }
  0xfb   : > { %v505_v11 = vpop.f32.mrf.mxu0  ;;  %v633_v14 = vpop.f32.mrf.mxu1 }
  0xfc   : > { %774 = vst.msk [vmem:[%s1802_s6 + $0x68] sm:$0xff] %vm760_vm3, %v709_v6  ;;  %v714_v12 = vmax.f32 %v514_v7, 0.0  ;;  %v506_v13 = vadd.f32 %v1796_v37, %v505_v11  ;;  %806 = vst.msk [vmem:[%s1802_s6 + $0x168] sm:$0xff] %vm760_vm3, %v741_v9  ;;  %v746_v15 = vmax.f32 %v642_v10, 0.0  ;;  %v634_v16 = vadd.f32 %v1796_v37, %v633_v14 }
  0xfd   : > { %v1408_v17 = vpop.f32.mrf.mxu0  ;;  %v1440_v20 = vpop.f32.mrf.mxu1 }
  0xfe   : > { %779 = vst.msk [vmem:[%s1802_s6 + $0x90] sm:$0xff] %vm760_vm3, %v714_v12  ;;  %v712_v18 = vmax.f32 %v506_v13, 0.0  ;;  %v517_v19 = vadd.f32 %v1408_v17, %v1796_v37  ;;  %811 = vst.msk [vmem:[%s1802_s6 + $0x190] sm:$0xff] %vm760_vm3, %v746_v15  ;;  %v744_v21 = vmax.f32 %v634_v16, 0.0  ;;  %v645_v22 = vadd.f32 %v1440_v20, %v1796_v37 }
  0xff   : > { %v508_v23 = vpop.f32.mrf.mxu0  ;;  %v636_v26 = vpop.f32.mrf.mxu1 }
 0x100   : > { %777 = vst.msk [vmem:[%s1802_s6 + $0x80] sm:$0xff] %vm760_vm3, %v712_v18  ;;  %v715_v24 = vmax.f32 %v517_v19, 0.0  ;;  %v509_v25 = vadd.f32 %v1796_v37, %v508_v23  ;;  %809 = vst.msk [vmem:[%s1802_s6 + $0x180] sm:$0xff] %vm760_vm3, %v744_v21  ;;  %v747_v27 = vmax.f32 %v645_v22, 0.0  ;;  %v637_v28 = vadd.f32 %v1796_v37, %v636_v26 }
 0x101   : > { %v1411_v29 = vpop.f32.mrf.mxu0  ;;  %v1443_v32 = vpop.f32.mrf.mxu1 }
 0x102   : > { %780 = vst.msk [vmem:[%s1802_s6 + $0x98] sm:$0xff] %vm760_vm3, %v715_v24  ;;  %v713_v30 = vmax.f32 %v509_v25, 0.0  ;;  %v530_v31 = vadd.f32 %v1411_v29, %v1796_v37  ;;  %812 = vst.msk [vmem:[%s1802_s6 + $0x198] sm:$0xff] %vm760_vm3, %v747_v27  ;;  %v745_v33 = vmax.f32 %v637_v28, 0.0  ;;  %v658_v34 = vadd.f32 %v1443_v32, %v1796_v37 }
 0x103   : > { %v521_v35 = vpop.f32.mrf.mxu0  ;;  %v649_v39 = vpop.f32.mrf.mxu1 }
 0x104   : > { %778 = vst.msk [vmem:[%s1802_s6 + $0x88] sm:$0xff] %vm760_vm3, %v713_v30  ;;  %v718_v36 = vmax.f32 %v530_v31, 0.0  ;;  %v522_v38 = vadd.f32 %v1796_v37, %v521_v35  ;;  %810 = vst.msk [vmem:[%s1802_s6 + $0x188] sm:$0xff] %vm760_vm3, %v745_v33  ;;  %v750_v40 = vmax.f32 %v658_v34, 0.0  ;;  %v650_v41 = vadd.f32 %v1796_v37, %v649_v39 }
 0x105   : > { %v1412_v42 = vpop.f32.mrf.mxu0  ;;  %v1444_v45 = vpop.f32.mrf.mxu1 }
 0x106   : > { %783 = vst.msk [vmem:[%s1802_s6 + $0xb0] sm:$0xff] %vm760_vm3, %v718_v36  ;;  %v716_v43 = vmax.f32 %v522_v38, 0.0  ;;  %v533_v44 = vadd.f32 %v1412_v42, %v1796_v37  ;;  %815 = vst.msk [vmem:[%s1802_s6 + $0x1b0] sm:$0xff] %vm760_vm3, %v750_v40  ;;  %v748_v46 = vmax.f32 %v650_v41, 0.0  ;;  %v661_v47 = vadd.f32 %v1444_v45, %v1796_v37 }
 0x107   : > { %v524_v48 = vpop.f32.mrf.mxu0  ;;  %v652_v51 = vpop.f32.mrf.mxu1 }
 0x108   : > { %781 = vst.msk [vmem:[%s1802_s6 + $0xa0] sm:$0xff] %vm760_vm3, %v716_v43  ;;  %v719_v49 = vmax.f32 %v533_v44, 0.0  ;;  %v525_v50 = vadd.f32 %v1796_v37, %v524_v48  ;;  %813 = vst.msk [vmem:[%s1802_s6 + $0x1a0] sm:$0xff] %vm760_vm3, %v748_v46  ;;  %v751_v52 = vmax.f32 %v661_v47, 0.0  ;;  %v653_v53 = vadd.f32 %v1796_v37, %v652_v51 }
 0x109   : > { %v1415_v54 = vpop.f32.mrf.mxu0  ;;  %v1447_v57 = vpop.f32.mrf.mxu1 }
 0x10a   : > { %784 = vst.msk [vmem:[%s1802_s6 + $0xb8] sm:$0xff] %vm760_vm3, %v719_v49  ;;  %v717_v55 = vmax.f32 %v525_v50, 0.0  ;;  %v546_v56 = vadd.f32 %v1415_v54, %v1796_v37  ;;  %816 = vst.msk [vmem:[%s1802_s6 + $0x1b8] sm:$0xff] %vm760_vm3, %v751_v52  ;;  %v749_v58 = vmax.f32 %v653_v53, 0.0  ;;  %v674_v59 = vadd.f32 %v1447_v57, %v1796_v37 }
 0x10b   : > { %v537_v60 = vpop.f32.mrf.mxu0  ;;  %v665_v63 = vpop.f32.mrf.mxu1 }
 0x10c   : > { %782 = vst.msk [vmem:[%s1802_s6 + $0xa8] sm:$0xff] %vm760_vm3, %v717_v55  ;;  %v722_v61 = vmax.f32 %v546_v56, 0.0  ;;  %v538_v62 = vadd.f32 %v1796_v37, %v537_v60  ;;  %814 = vst.msk [vmem:[%s1802_s6 + $0x1a8] sm:$0xff] %vm760_vm3, %v749_v58  ;;  %v754_v0 = vmax.f32 %v674_v59, 0.0  ;;  %v666_v1 = vadd.f32 %v1796_v37, %v665_v63 }
 0x10d   : > { %v1416_v2 = vpop.f32.mrf.mxu0  ;;  %v1448_v5 = vpop.f32.mrf.mxu1 }
 0x10e   : > { %787 = vst.msk [vmem:[%s1802_s6 + $0xd0] sm:$0xff] %vm760_vm3, %v722_v61  ;;  %v720_v3 = vmax.f32 %v538_v62, 0.0  ;;  %v549_v4 = vadd.f32 %v1416_v2, %v1796_v37  ;;  %819 = vst.msk [vmem:[%s1802_s6 + $0x1d0] sm:$0xff] %vm760_vm3, %v754_v0  ;;  %v752_v6 = vmax.f32 %v666_v1, 0.0  ;;  %v677_v7 = vadd.f32 %v1448_v5, %v1796_v37 }
 0x10f   : > { %v540_v8 = vpop.f32.mrf.mxu0  ;;  %v668_v11 = vpop.f32.mrf.mxu1 }
 0x110   : > { %785 = vst.msk [vmem:[%s1802_s6 + $0xc0] sm:$0xff] %vm760_vm3, %v720_v3  ;;  %v723_v9 = vmax.f32 %v549_v4, 0.0  ;;  %v541_v10 = vadd.f32 %v1796_v37, %v540_v8  ;;  %817 = vst.msk [vmem:[%s1802_s6 + $0x1c0] sm:$0xff] %vm760_vm3, %v752_v6  ;;  %v755_v12 = vmax.f32 %v677_v7, 0.0  ;;  %v669_v13 = vadd.f32 %v1796_v37, %v668_v11 }
 0x111   : > { %v1419_v14 = vpop.f32.mrf.mxu0  ;;  %v1451_v17 = vpop.f32.mrf.mxu1 }
 0x112   : > { %788 = vst.msk [vmem:[%s1802_s6 + $0xd8] sm:$0xff] %vm760_vm3, %v723_v9  ;;  %v721_v15 = vmax.f32 %v541_v10, 0.0  ;;  %v562_v16 = vadd.f32 %v1419_v14, %v1796_v37  ;;  %820 = vst.msk [vmem:[%s1802_s6 + $0x1d8] sm:$0xff] %vm760_vm3, %v755_v12  ;;  %v753_v18 = vmax.f32 %v669_v13, 0.0  ;;  %v690_v19 = vadd.f32 %v1451_v17, %v1796_v37 }
 0x113   : > { %v553_v20 = vpop.f32.mrf.mxu0  ;;  %v681_v23 = vpop.f32.mrf.mxu1 }
 0x114   : > { %786 = vst.msk [vmem:[%s1802_s6 + $0xc8] sm:$0xff] %vm760_vm3, %v721_v15  ;;  %v726_v21 = vmax.f32 %v562_v16, 0.0  ;;  %v554_v22 = vadd.f32 %v1796_v37, %v553_v20  ;;  %818 = vst.msk [vmem:[%s1802_s6 + $0x1c8] sm:$0xff] %vm760_vm3, %v753_v18  ;;  %v758_v24 = vmax.f32 %v690_v19, 0.0  ;;  %v682_v25 = vadd.f32 %v1796_v37, %v681_v23 }
 0x115   : > { %v1420_v26 = vpop.f32.mrf.mxu0  ;;  %v1452_v29 = vpop.f32.mrf.mxu1 }
 0x116   : > { %791 = vst.msk [vmem:[%s1802_s6 + $0xf0] sm:$0xff] %vm760_vm3, %v726_v21  ;;  %v724_v27 = vmax.f32 %v554_v22, 0.0  ;;  %v565_v28 = vadd.f32 %v1420_v26, %v1796_v37  ;;  %823 = vst.msk [vmem:[%s1802_s6 + $0x1f0] sm:$0xff] %vm760_vm3, %v758_v24  ;;  %v756_v30 = vmax.f32 %v682_v25, 0.0  ;;  %v693_v31 = vadd.f32 %v1452_v29, %v1796_v37 }
 0x117   : > { %v556_v32 = vpop.f32.mrf.mxu0  ;;  %v684_v35 = vpop.f32.mrf.mxu1 }
 0x118   : > { %789 = vst.msk [vmem:[%s1802_s6 + $0xe0] sm:$0xff] %vm760_vm3, %v724_v27  ;;  %v727_v33 = vmax.f32 %v565_v28, 0.0  ;;  %v557_v34 = vadd.f32 %v1796_v37, %v556_v32  ;;  %821 = vst.msk [vmem:[%s1802_s6 + $0x1e0] sm:$0xff] %vm760_vm3, %v756_v30  ;;  %v759_v36 = vmax.f32 %v693_v31, 0.0  ;;  %v685_v38 = vadd.f32 %v1796_v37, %v684_v35  ;;  %831 = sbr.rel (!%p1679_p4) target bundleno = 349 (0x15d), region = 36 }
 0x11a   : > { %792 = vst.msk [vmem:[%s1802_s6 + $0xf8] sm:$0xff] %vm760_vm3, %v727_v33  ;;  %v725_v39 = vmax.f32 %v557_v34, 0.0  ;;  %824 = vst.msk [vmem:[%s1802_s6 + $0x1f8] sm:$0xff] %vm760_vm3, %v759_v36  ;;  %v757_v40 = vmax.f32 %v685_v38, 0.0 }
 0x11c   : > { %790 = vst.msk [vmem:[%s1802_s6 + $0xe8] sm:$0xff] %vm760_vm3, %v725_v39  ;;  %822 = vst.msk [vmem:[%s1802_s6 + $0x1e8] sm:$0xff] %vm760_vm3, %v757_v40 }
 0x11d   : > { %s2212_s7 = smov (!%p834_p8, %s833_s7), 64 }
 0x11e   : > { %s1336_s12 = sshll.u32 %s2212_s7, 7 }
 0x11f   : > { %p1339_p9 = scmp.eq.s32.totalorder %s1336_s12, 0 }
 0x120   : > { %s2005_s14 = sshrl.u32 (!%p1339_p9), %s2212_s7, 6 }
 0x121   : > { %842 = sbr.rel (%p1339_p9) target bundleno = 349 (0x15d), region = 40  ;;  %p1340_p10 = scmp.le.s32.totalorder (!%p1339_p9), %s2005_s14, 0 }
 0x126   : > { %1249 = sbr.rel (%p1340_p10) target bundleno = 332 (0x14c), region = 116  ;;  %s2203_s15 = smov (!%p1340_p10), %s1999_s11 }
 0x127   : > { %s2204_s17 = smov (!%p1340_p10), %s1802_s6  ;;  %s2014_s18 = smov (!%p1340_p10), 0  }
 0x128   : > { %s2016_s20 = smov (!%p1340_p10), 0  }
 0x12b LB: >> { %v1031_v37 = vld [vmem:[%s1607_s17] sm:$0xff]  ;;  %v1033_v41 = vld [vmem:[%s1607_s17 + $0x8] sm:$0xff]  ;;  %v1035_v42 = vld [vmem:[%s1607_s17 + $0x10] sm:$0xff]  ;;  %s1159_s21 = sadd.s32 1, %s1611_s18  ;;  %s1025_s20 = sadd.s32 1, %s1615_s20   ;;  %s1615_s20 = sphi %s2016_s20, %s1025_s20   ;;  %s1611_s18 = sphi %s2014_s18, %s2207_s18   ;;  %s1607_s17 = sphi %s2204_s17, %s2206_s17   ;;  %s1603_s15 = sphi %s2203_s15, %s2205_s15  }
 0x12c   : >> { %1032 = vst [vmem:[%s1603_s15] sm:$0xff] %v1031_v37  ;;  %1034 = vst [vmem:[%s1603_s15 + $0x8] sm:$0xff] %v1033_v41  ;;  %v1037_v43 = vld [vmem:[%s1607_s17 + $0x18] sm:$0xff]  ;;  %v1039_v44 = vld [vmem:[%s1607_s17 + $0x20] sm:$0xff]  ;;  %p1160_p11 = scmp.ge.s32.totalorder %s1159_s21, %s2005_s14  ;;  %p1024_p12 = scmp.ge.s32.totalorder %s1025_s20, %s2005_s14 }
 0x12d   : >> { %1036 = vst [vmem:[%s1603_s15 + $0x10] sm:$0xff] %v1035_v42  ;;  %v1041_v45 = vld [vmem:[%s1607_s17 + $0x28] sm:$0xff]  ;;  %1038 = vst [vmem:[%s1603_s15 + $0x18] sm:$0xff] %v1037_v43  ;;  %v1043_v46 = vld [vmem:[%s1607_s17 + $0x30] sm:$0xff] }
 0x12e   : >> { %1040 = vst [vmem:[%s1603_s15 + $0x20] sm:$0xff] %v1039_v44  ;;  %1042 = vst [vmem:[%s1603_s15 + $0x28] sm:$0xff] %v1041_v45  ;;  %v1045_v47 = vld [vmem:[%s1607_s17 + $0x38] sm:$0xff]  ;;  %v1047_v48 = vld [vmem:[%s1607_s17 + $0x40] sm:$0xff]  ;;  %s2214_s21 = smov (%p1160_p11, %s1159_s21), 0 }
 0x12f   : >> { %1044 = vst [vmem:[%s1603_s15 + $0x30] sm:$0xff] %v1043_v46  ;;  %1046 = vst [vmem:[%s1603_s15 + $0x38] sm:$0xff] %v1045_v47  ;;  %v1049_v49 = vld [vmem:[%s1607_s17 + $0x48] sm:$0xff]  ;;  %v1051_v50 = vld [vmem:[%s1607_s17 + $0x50] sm:$0xff]  ;;  %s1341_s22 = sshll.u32 %s2214_s21, 9  ;;  %s2207_s18 = smov %s2214_s21 }
 0x130   : >> { %1048 = vst [vmem:[%s1603_s15 + $0x40] sm:$0xff] %v1047_v48  ;;  %v1053_v51 = vld [vmem:[%s1607_s17 + $0x58] sm:$0xff]  ;;  %1050 = vst [vmem:[%s1603_s15 + $0x48] sm:$0xff] %v1049_v49  ;;  %v1055_v52 = vld [vmem:[%s1607_s17 + $0x60] sm:$0xff]  ;;  %s2072_s23 = scalar_lea.vmem %s1802_s6, %s1341_s22 [#allocation2]   ;;  %s2075_s24 = scalar_lea.vmem %s1999_s11, %s1341_s22  }
 0x131   : >> { %1052 = vst [vmem:[%s1603_s15 + $0x50] sm:$0xff] %v1051_v50  ;;  %1054 = vst [vmem:[%s1603_s15 + $0x58] sm:$0xff] %v1053_v51  ;;  %v1057_v53 = vld [vmem:[%s1607_s17 + $0x68] sm:$0xff]  ;;  %v1059_v54 = vld [vmem:[%s1607_s17 + $0x70] sm:$0xff] }
 0x132   : >> { %1056 = vst [vmem:[%s1603_s15 + $0x60] sm:$0xff] %v1055_v52  ;;  %1058 = vst [vmem:[%s1603_s15 + $0x68] sm:$0xff] %v1057_v53  ;;  %v1061_v55 = vld [vmem:[%s1607_s17 + $0x78] sm:$0xff]  ;;  %v1063_v56 = vld [vmem:[%s1607_s17 + $0x80] sm:$0xff] }
 0x133   : >> { %1060 = vst [vmem:[%s1603_s15 + $0x70] sm:$0xff] %v1059_v54  ;;  %v1065_v57 = vld [vmem:[%s1607_s17 + $0x88] sm:$0xff]  ;;  %1062 = vst [vmem:[%s1603_s15 + $0x78] sm:$0xff] %v1061_v55  ;;  %v1067_v58 = vld [vmem:[%s1607_s17 + $0x90] sm:$0xff] }
 0x134   : >> { %1064 = vst [vmem:[%s1603_s15 + $0x80] sm:$0xff] %v1063_v56  ;;  %1066 = vst [vmem:[%s1603_s15 + $0x88] sm:$0xff] %v1065_v57  ;;  %v1069_v59 = vld [vmem:[%s1607_s17 + $0x98] sm:$0xff]  ;;  %v1071_v60 = vld [vmem:[%s1607_s17 + $0xa0] sm:$0xff] }
 0x135   : >> { %1068 = vst [vmem:[%s1603_s15 + $0x90] sm:$0xff] %v1067_v58  ;;  %1070 = vst [vmem:[%s1603_s15 + $0x98] sm:$0xff] %v1069_v59  ;;  %v1073_v61 = vld [vmem:[%s1607_s17 + $0xa8] sm:$0xff]  ;;  %v1075_v62 = vld [vmem:[%s1607_s17 + $0xb0] sm:$0xff] }
 0x136   : >> { %1072 = vst [vmem:[%s1603_s15 + $0xa0] sm:$0xff] %v1071_v60  ;;  %v1077_v63 = vld [vmem:[%s1607_s17 + $0xb8] sm:$0xff]  ;;  %1074 = vst [vmem:[%s1603_s15 + $0xa8] sm:$0xff] %v1073_v61  ;;  %v1079_v0 = vld [vmem:[%s1607_s17 + $0xc0] sm:$0xff] }
 0x137   : >> { %1076 = vst [vmem:[%s1603_s15 + $0xb0] sm:$0xff] %v1075_v62  ;;  %1078 = vst [vmem:[%s1603_s15 + $0xb8] sm:$0xff] %v1077_v63  ;;  %v1081_v1 = vld [vmem:[%s1607_s17 + $0xc8] sm:$0xff]  ;;  %v1083_v2 = vld [vmem:[%s1607_s17 + $0xd0] sm:$0xff] }
 0x138   : >> { %1080 = vst [vmem:[%s1603_s15 + $0xc0] sm:$0xff] %v1079_v0  ;;  %1082 = vst [vmem:[%s1603_s15 + $0xc8] sm:$0xff] %v1081_v1  ;;  %v1085_v3 = vld [vmem:[%s1607_s17 + $0xd8] sm:$0xff]  ;;  %v1087_v4 = vld [vmem:[%s1607_s17 + $0xe0] sm:$0xff] }
 0x139   : >> { %1084 = vst [vmem:[%s1603_s15 + $0xd0] sm:$0xff] %v1083_v2  ;;  %v1089_v5 = vld [vmem:[%s1607_s17 + $0xe8] sm:$0xff]  ;;  %1086 = vst [vmem:[%s1603_s15 + $0xd8] sm:$0xff] %v1085_v3  ;;  %v1091_v6 = vld [vmem:[%s1607_s17 + $0xf0] sm:$0xff] }
 0x13a   : >> { %1088 = vst [vmem:[%s1603_s15 + $0xe0] sm:$0xff] %v1087_v4  ;;  %1090 = vst [vmem:[%s1603_s15 + $0xe8] sm:$0xff] %v1089_v5  ;;  %v1093_v7 = vld [vmem:[%s1607_s17 + $0xf8] sm:$0xff]  ;;  %v1095_v8 = vld [vmem:[%s1607_s17 + $0x100] sm:$0xff] }
 0x13b   : >> { %1092 = vst [vmem:[%s1603_s15 + $0xf0] sm:$0xff] %v1091_v6  ;;  %1094 = vst [vmem:[%s1603_s15 + $0xf8] sm:$0xff] %v1093_v7  ;;  %v1097_v9 = vld [vmem:[%s1607_s17 + $0x108] sm:$0xff]  ;;  %v1099_v10 = vld [vmem:[%s1607_s17 + $0x110] sm:$0xff] }
 0x13c   : >> { %1096 = vst [vmem:[%s1603_s15 + $0x100] sm:$0xff] %v1095_v8  ;;  %v1101_v11 = vld [vmem:[%s1607_s17 + $0x118] sm:$0xff]  ;;  %1098 = vst [vmem:[%s1603_s15 + $0x108] sm:$0xff] %v1097_v9  ;;  %v1103_v12 = vld [vmem:[%s1607_s17 + $0x120] sm:$0xff] }
 0x13d   : >> { %1100 = vst [vmem:[%s1603_s15 + $0x110] sm:$0xff] %v1099_v10  ;;  %1102 = vst [vmem:[%s1603_s15 + $0x118] sm:$0xff] %v1101_v11  ;;  %v1105_v13 = vld [vmem:[%s1607_s17 + $0x128] sm:$0xff]  ;;  %v1107_v14 = vld [vmem:[%s1607_s17 + $0x130] sm:$0xff] }
 0x13e   : >> { %1104 = vst [vmem:[%s1603_s15 + $0x120] sm:$0xff] %v1103_v12  ;;  %1106 = vst [vmem:[%s1603_s15 + $0x128] sm:$0xff] %v1105_v13  ;;  %v1109_v15 = vld [vmem:[%s1607_s17 + $0x138] sm:$0xff]  ;;  %v1111_v16 = vld [vmem:[%s1607_s17 + $0x140] sm:$0xff] }
 0x13f   : >> { %1108 = vst [vmem:[%s1603_s15 + $0x130] sm:$0xff] %v1107_v14  ;;  %v1113_v17 = vld [vmem:[%s1607_s17 + $0x148] sm:$0xff]  ;;  %1110 = vst [vmem:[%s1603_s15 + $0x138] sm:$0xff] %v1109_v15  ;;  %v1115_v18 = vld [vmem:[%s1607_s17 + $0x150] sm:$0xff] }
 0x140   : >> { %1112 = vst [vmem:[%s1603_s15 + $0x140] sm:$0xff] %v1111_v16  ;;  %1114 = vst [vmem:[%s1603_s15 + $0x148] sm:$0xff] %v1113_v17  ;;  %v1117_v19 = vld [vmem:[%s1607_s17 + $0x158] sm:$0xff]  ;;  %v1119_v20 = vld [vmem:[%s1607_s17 + $0x160] sm:$0xff] }
 0x141   : >> { %1116 = vst [vmem:[%s1603_s15 + $0x150] sm:$0xff] %v1115_v18  ;;  %1118 = vst [vmem:[%s1603_s15 + $0x158] sm:$0xff] %v1117_v19  ;;  %v1121_v21 = vld [vmem:[%s1607_s17 + $0x168] sm:$0xff]  ;;  %v1123_v22 = vld [vmem:[%s1607_s17 + $0x170] sm:$0xff] }
 0x142   : >> { %1120 = vst [vmem:[%s1603_s15 + $0x160] sm:$0xff] %v1119_v20  ;;  %v1125_v23 = vld [vmem:[%s1607_s17 + $0x178] sm:$0xff]  ;;  %1122 = vst [vmem:[%s1603_s15 + $0x168] sm:$0xff] %v1121_v21  ;;  %v1127_v24 = vld [vmem:[%s1607_s17 + $0x180] sm:$0xff] }
 0x143   : >> { %1124 = vst [vmem:[%s1603_s15 + $0x170] sm:$0xff] %v1123_v22  ;;  %1126 = vst [vmem:[%s1603_s15 + $0x178] sm:$0xff] %v1125_v23  ;;  %v1129_v25 = vld [vmem:[%s1607_s17 + $0x188] sm:$0xff]  ;;  %v1131_v26 = vld [vmem:[%s1607_s17 + $0x190] sm:$0xff] }
 0x144   : >> { %1128 = vst [vmem:[%s1603_s15 + $0x180] sm:$0xff] %v1127_v24  ;;  %1130 = vst [vmem:[%s1603_s15 + $0x188] sm:$0xff] %v1129_v25  ;;  %v1133_v27 = vld [vmem:[%s1607_s17 + $0x198] sm:$0xff]  ;;  %v1135_v28 = vld [vmem:[%s1607_s17 + $0x1a0] sm:$0xff] }
 0x145   : >> { %1132 = vst [vmem:[%s1603_s15 + $0x190] sm:$0xff] %v1131_v26  ;;  %v1137_v29 = vld [vmem:[%s1607_s17 + $0x1a8] sm:$0xff]  ;;  %1134 = vst [vmem:[%s1603_s15 + $0x198] sm:$0xff] %v1133_v27  ;;  %v1139_v30 = vld [vmem:[%s1607_s17 + $0x1b0] sm:$0xff] }
 0x146   : >> { %1136 = vst [vmem:[%s1603_s15 + $0x1a0] sm:$0xff] %v1135_v28  ;;  %1138 = vst [vmem:[%s1603_s15 + $0x1a8] sm:$0xff] %v1137_v29  ;;  %v1141_v31 = vld [vmem:[%s1607_s17 + $0x1b8] sm:$0xff]  ;;  %v1143_v32 = vld [vmem:[%s1607_s17 + $0x1c0] sm:$0xff] }
 0x147   : >> { %1140 = vst [vmem:[%s1603_s15 + $0x1b0] sm:$0xff] %v1139_v30  ;;  %1142 = vst [vmem:[%s1603_s15 + $0x1b8] sm:$0xff] %v1141_v31  ;;  %v1145_v33 = vld [vmem:[%s1607_s17 + $0x1c8] sm:$0xff]  ;;  %v1147_v34 = vld [vmem:[%s1607_s17 + $0x1d0] sm:$0xff]  ;;  %1027 = sbr.rel (!%p1024_p12) target bundleno = 299 (0x12b), region = 122 }
 0x148   : >> { %1144 = vst [vmem:[%s1603_s15 + $0x1c0] sm:$0xff] %v1143_v32  ;;  %v1149_v35 = vld [vmem:[%s1607_s17 + $0x1d8] sm:$0xff]  ;;  %1146 = vst [vmem:[%s1603_s15 + $0x1c8] sm:$0xff] %v1145_v33  ;;  %v1151_v36 = vld [vmem:[%s1607_s17 + $0x1e0] sm:$0xff] }
 0x149   : >> { %1148 = vst [vmem:[%s1603_s15 + $0x1d0] sm:$0xff] %v1147_v34  ;;  %1150 = vst [vmem:[%s1603_s15 + $0x1d8] sm:$0xff] %v1149_v35  ;;  %v1153_v38 = vld [vmem:[%s1607_s17 + $0x1e8] sm:$0xff]  ;;  %v1155_v39 = vld [vmem:[%s1607_s17 + $0x1f0] sm:$0xff] }
 0x14a   : >> { %1152 = vst [vmem:[%s1603_s15 + $0x1e0] sm:$0xff] %v1151_v36  ;;  %1154 = vst [vmem:[%s1603_s15 + $0x1e8] sm:$0xff] %v1153_v38  ;;  %v1157_v40 = vld [vmem:[%s1607_s17 + $0x1f8] sm:$0xff]  ;;  %s2206_s17 = smov %s2072_s23 }
 0x14b   : >> { %1156 = vst [vmem:[%s1603_s15 + $0x1f0] sm:$0xff] %v1155_v39  ;;  %1158 = vst [vmem:[%s1603_s15 + $0x1f8] sm:$0xff] %v1157_v40  ;;  %s2205_s15 = smov %s2075_s24 }
 0x14c PF: > { %s2180_s25 = sand.u32 63, %s2212_s7   ;;  %s1352_s26 = sshll.u32 %s2005_s14, 9 }
 0x14d   : > { %s1170_s27 = scalar_lea.vmem %s1802_s6, %s1352_s26 [#allocation2]   ;;  %s1172_s28 = scalar_lea.vmem %s1999_s11, %s1352_s26  }
 0x14e   : > { %p1346_p13 = scmp.le.s32.totalorder %s2180_s25, 0 }
 0x14f   : > { %s1617_s29 = smov (!%p1346_p13), %s1172_s28   ;;  %s1621_s30 = smov (!%p1346_p13), %s1170_s27  }
 0x150   : > { %1263 = sbr.rel (%p1346_p13) target bundleno = 349 (0x15d), region = 127  ;;  %s1625_s4 = smov (!%p1346_p13), 0  }
 0x151   : > { %s1629_s5 = smov (!%p1346_p13), 0  }
 0x155 LB: >> { %v1182_v37 = vld [vmem:[%s1623_s30] sm:$0xff]  ;;  %s1184_s7 = sadd.s32 1, %s1627_s4  ;;  %s1176_s5 = sadd.s32 1, %s1631_s5   ;;  %s1631_s5 = sphi %s1629_s5, %s1176_s5   ;;  %s1627_s4 = sphi %s1625_s4, %s1626_s4   ;;  %s1623_s30 = sphi %s1621_s30, %s1189_s30   ;;  %s1619_s29 = sphi %s1617_s29, %s1190_s29  }
 0x156   : >> { %1183 = vst [vmem:[%s1619_s29] sm:$0xff] %v1182_v37  ;;  %p1185_p0 = scmp.ge.s32.totalorder %s1184_s7, %s2180_s25  ;;  %p1175_p1 = scmp.ge.s32.totalorder %s1176_s5, %s2180_s25 }
 0x158   : >> { %s2216_s7 = smov (%p1185_p0, %s1184_s7), 0  ;;  %1178 = sbr.rel (!%p1175_p1) target bundleno = 341 (0x155), region = 133 }
 0x159   : >> { %s1347_s6 = sshll.u32 %s2216_s7, 3  ;;  %s1626_s4 = smov %s2216_s7  }
 0x15a   : >> { %s1189_s30 = scalar_lea.vmem %s1170_s27, %s1347_s6 [#allocation2]   ;;  %s1190_s29 = scalar_lea.vmem %s1172_s28, %s1347_s6  }
 0x15d PF: > { %p10_p2 = scmp.ge.s32.totalorder %s1669_s16, 5   ;;  %s2208_s12 = smov %s1595_s13 }
 0x15e   : > { %s2209_s13 = smov %s1677_s19  ;;  %s2210_s14 = smov %s1669_s16 }
 0x15f   :  { %12 = sbr.rel (!%p10_p2) target bundleno = 2 (0x2), region = 144 }

// kernel: cnn2_forward.8
= control target key start
LH: loop header
LB: loop body
LE: loop exit
PB: predicated region body
PF: predicated region fallthrough
CT: control target
= control target key end

     0   :  { %s928_s10 = smov 96   ;;  %vm63_vm0 = vcmask 258048   ;;  %vm61_vm1 = vcmask 261120   ;;  %s1979_s0 = inlined_call_operand.vmem [shape: f32[2,26,13,64], index: 0, kind: input, shape index: {}]   ;;  %s1980_s1 = inlined_call_operand.vmem [shape: f32[2,13,13,32], index: 1, kind: output, shape index: {}]  }
   0x1   :  { %v942_v0 = vld [vmem:[%s1979_s0 + $0x1a0] sm:$0xff]  ;;  %v956_v2 = vld [vmem:[%s1979_s0 + $0x1a8] sm:$0x1f]  ;;  %v970_v4 = vld [vmem:[%s1979_s0 + $0x18] sm:$0x1f] }
   0x2   :  { %v947_v1 = vld [vmem:[%s1979_s0] sm:$0xff]  ;;  %25 = vrot.lane.b32.xlu1 %v942_v0, %s928_s10  ;;  %v961_v3 = vld [vmem:[%s1979_s0 + $0x8] sm:$0x1f]  ;;  %v975_v5 = vld [vmem:[%s1979_s0 + $0x10] sm:$0xff] }
   0x3   :  { %21 = vrot.lane.b32.xlu0 %v947_v1, %s928_s10  ;;  %v984_v6 = vld [vmem:[%s1979_s0 + $0x1b8] sm:$0x1f]  ;;  %v989_v7 = vld [vmem:[%s1979_s0 + $0x1b0] sm:$0xff]  ;;  %v998_v8 = vld [vmem:[%s1979_s0 + $0x28] sm:$0x1f] }
   0x4   :  { %v1003_v9 = vld [vmem:[%s1979_s0 + $0x20] sm:$0xff]  ;;  %v1012_v10 = vld [vmem:[%s1979_s0 + $0x1c8] sm:$0x1f]  ;;  %v1026_v12 = vld [vmem:[%s1979_s0 + $0x38] sm:$0x1f] }
   0x5   :  { %v1017_v11 = vld [vmem:[%s1979_s0 + $0x1c0] sm:$0xff]  ;;  %v1031_v13 = vld [vmem:[%s1979_s0 + $0x30] sm:$0xff]  ;;  %v1040_v14 = vld [vmem:[%s1979_s0 + $0x1d8] sm:$0x1f] }
   0x6   :  { %27 = vrot.lane.b32.xlu1 %v956_v2, %s928_s10  ;;  %v1045_v15 = vld [vmem:[%s1979_s0 + $0x1d0] sm:$0xff]  ;;  %v1054_v16 = vld [vmem:[%s1979_s0 + $0x48] sm:$0x1f]  ;;  %v1059_v17 = vld [vmem:[%s1979_s0 + $0x40] sm:$0xff] }
   0x7   :  { %23 = vrot.lane.b32.xlu0 %v961_v3, %s928_s10  ;;  %v1068_v18 = vld [vmem:[%s1979_s0 + $0x1e8] sm:$0x1f]  ;;  %v1073_v19 = vld [vmem:[%s1979_s0 + $0x1e0] sm:$0xff]  ;;  %v1082_v20 = vld [vmem:[%s1979_s0 + $0x58] sm:$0x1f] }
   0x8   :  { %v1087_v21 = vld [vmem:[%s1979_s0 + $0x50] sm:$0xff]  ;;  %v1096_v22 = vld [vmem:[%s1979_s0 + $0x1f8] sm:$0x1f]  ;;  %v1110_v24 = vld [vmem:[%s1979_s0 + $0x68] sm:$0x1f] }
   0x9   :  { %v1101_v23 = vld [vmem:[%s1979_s0 + $0x1f0] sm:$0xff]  ;;  %v1115_v25 = vld [vmem:[%s1979_s0 + $0x60] sm:$0xff]  ;;  %v1124_v26 = vld [vmem:[%s1979_s0 + $0x208] sm:$0x1f] }
   0xa   :  { %43 = vrot.lane.b32.xlu1 %v970_v4, %s928_s10  ;;  %v1129_v27 = vld [vmem:[%s1979_s0 + $0x200] sm:$0xff]  ;;  %v1138_v28 = vld [vmem:[%s1979_s0 + $0x78] sm:$0x1f]  ;;  %v1143_v29 = vld [vmem:[%s1979_s0 + $0x70] sm:$0xff] }
   0xb   :  { %41 = vrot.lane.b32.xlu0 %v975_v5, %s928_s10  ;;  %v1152_v30 = vld [vmem:[%s1979_s0 + $0x218] sm:$0x1f]  ;;  %v1157_v31 = vld [vmem:[%s1979_s0 + $0x210] sm:$0xff]  ;;  %v1166_v32 = vld [vmem:[%s1979_s0 + $0x88] sm:$0x1f] }
   0xc   :  { %v1171_v33 = vld [vmem:[%s1979_s0 + $0x80] sm:$0xff]  ;;  %v1180_v34 = vld [vmem:[%s1979_s0 + $0x228] sm:$0x1f]  ;;  %v1194_v36 = vld [vmem:[%s1979_s0 + $0x98] sm:$0x1f] }
   0xd   :  { %v1185_v35 = vld [vmem:[%s1979_s0 + $0x220] sm:$0xff]  ;;  %v1199_v37 = vld [vmem:[%s1979_s0 + $0x90] sm:$0xff]  ;;  %v1208_v38 = vld [vmem:[%s1979_s0 + $0x238] sm:$0x1f] }
   0xe   :  { %47 = vrot.lane.b32.xlu1 %v984_v6, %s928_s10  ;;  %v1213_v39 = vld [vmem:[%s1979_s0 + $0x230] sm:$0xff]  ;;  %v1222_v40 = vld [vmem:[%s1979_s0 + $0xa8] sm:$0x1f]  ;;  %v1227_v41 = vld [vmem:[%s1979_s0 + $0xa0] sm:$0xff] }
   0xf   :  { %45 = vrot.lane.b32.xlu0 %v989_v7, %s928_s10  ;;  %v1236_v42 = vld [vmem:[%s1979_s0 + $0x248] sm:$0x1f]  ;;  %v1241_v43 = vld [vmem:[%s1979_s0 + $0x240] sm:$0xff]  ;;  %v1250_v44 = vld [vmem:[%s1979_s0 + $0xb8] sm:$0x1f] }
  0x10   :  { %v1255_v45 = vld [vmem:[%s1979_s0 + $0xb0] sm:$0xff]  ;;  %v1264_v46 = vld [vmem:[%s1979_s0 + $0x258] sm:$0x1f]  ;;  %v1278_v48 = vld [vmem:[%s1979_s0 + $0xc8] sm:$0x1f] }
  0x11   :  { %v1269_v47 = vld [vmem:[%s1979_s0 + $0x250] sm:$0xff]  ;;  %v1283_v49 = vld [vmem:[%s1979_s0 + $0xc0] sm:$0xff]  ;;  %v1292_v50 = vld [vmem:[%s1979_s0 + $0x268] sm:$0x1f] }
  0x12   :  { %83 = vrot.lane.b32.xlu1 %v998_v8, %s928_s10  ;;  %1996 = vst [vmem:[#allocation2_spill] sm:$0xff] %v1292_v50  ;;  %v1297_v51 = vld [vmem:[%s1979_s0 + $0x260] sm:$0xff]  ;;  %v1306_v52 = vld [vmem:[%s1979_s0 + $0xd8] sm:$0x1f]  ;;  %v1311_v53 = vld [vmem:[%s1979_s0 + $0xd0] sm:$0xff] }
  0x13   :  { %81 = vrot.lane.b32.xlu0 %v1003_v9, %s928_s10  ;;  %1997 = vst [vmem:[#allocation3_spill] sm:$0xff] %v1297_v51  ;;  %1998 = vst [vmem:[#allocation4_spill] sm:$0xff] %v1306_v52  ;;  %v1320_v54 = vld [vmem:[%s1979_s0 + $0x278] sm:$0x1f]  ;;  %v1325_v55 = vld [vmem:[%s1979_s0 + $0x270] sm:$0xff] }
  0x14   :  { %1999 = vst [vmem:[#allocation5_spill] sm:$0xff] %v1311_v53  ;;  %2000 = vst [vmem:[#allocation6_spill] sm:$0xff] %v1320_v54  ;;  %v1334_v56 = vld [vmem:[%s1979_s0 + $0xe8] sm:$0x1f]  ;;  %v1339_v57 = vld [vmem:[%s1979_s0 + $0xe0] sm:$0xff] }
  0x15   :  { %2001 = vst [vmem:[#allocation7_spill] sm:$0xff] %v1325_v55  ;;  %2002 = vst [vmem:[#allocation8_spill] sm:$0xff] %v1334_v56  ;;  %v1348_v58 = vld [vmem:[%s1979_s0 + $0x288] sm:$0x1f]  ;;  %v1353_v59 = vld [vmem:[%s1979_s0 + $0x280] sm:$0xff] }
  0x16   :  { %87 = vrot.lane.b32.xlu1 %v1012_v10, %s928_s10  ;;  %2003 = vst [vmem:[#allocation9_spill] sm:$0xff] %v1339_v57  ;;  %2004 = vst [vmem:[#allocation10_spill] sm:$0xff] %v1348_v58  ;;  %v1362_v62 = vld [vmem:[%s1979_s0 + $0xf8] sm:$0x1f]  ;;  %v1367_v63 = vld [vmem:[%s1979_s0 + $0xf0] sm:$0xff] }
  0x17   :  { %85 = vrot.lane.b32.xlu0 %v1017_v11, %s928_s10  ;;  %2005 = vst [vmem:[#allocation11_spill] sm:$0xff] %v1353_v59  ;;  %2006 = vst [vmem:[#allocation12_spill] sm:$0xff] %v1362_v62 }
  0x18   :  { %2007 = vst [vmem:[#allocation13_spill] sm:$0xff] %v1367_v63 }
  0x1a   :  { %103 = vrot.lane.b32.xlu1 %v1026_v12, %s928_s10 }
  0x1b   :  { %101 = vrot.lane.b32.xlu0 %v1031_v13, %s928_s10 }
  0x1e   :  { %107 = vrot.lane.b32.xlu1 %v1040_v14, %s928_s10 }
  0x1f   :  { %105 = vrot.lane.b32.xlu0 %v1045_v15, %s928_s10 }
  0x22   :  { %142 = vrot.lane.b32.xlu1 %v1054_v16, %s928_s10 }
  0x23   :  { %140 = vrot.lane.b32.xlu0 %v1059_v17, %s928_s10 }
  0x26   :  { %146 = vrot.lane.b32.xlu1 %v1068_v18, %s928_s10 }
  0x27   :  { %144 = vrot.lane.b32.xlu0 %v1073_v19, %s928_s10 }
  0x2a   :  { %162 = vrot.lane.b32.xlu1 %v1082_v20, %s928_s10 }
  0x2b   :  { %160 = vrot.lane.b32.xlu0 %v1087_v21, %s928_s10 }
  0x2e   :  { %166 = vrot.lane.b32.xlu1 %v1096_v22, %s928_s10 }
  0x2f   :  { %164 = vrot.lane.b32.xlu0 %v1101_v23, %s928_s10 }
  0x32   :  { %201 = vrot.lane.b32.xlu1 %v1110_v24, %s928_s10 }
  0x33   :  { %199 = vrot.lane.b32.xlu0 %v1115_v25, %s928_s10 }
  0x36   :  { %205 = vrot.lane.b32.xlu1 %v1124_v26, %s928_s10 }
  0x37   :  { %203 = vrot.lane.b32.xlu0 %v1129_v27, %s928_s10 }
  0x3a   :  { %221 = vrot.lane.b32.xlu1 %v1138_v28, %s928_s10 }
  0x3b   :  { %219 = vrot.lane.b32.xlu0 %v1143_v29, %s928_s10 }
  0x3e   :  { %225 = vrot.lane.b32.xlu1 %v1152_v30, %s928_s10 }
  0x3f   :  { %223 = vrot.lane.b32.xlu0 %v1157_v31, %s928_s10 }
  0x42   :  { %260 = vrot.lane.b32.xlu1 %v1166_v32, %s928_s10 }
  0x43   :  { %258 = vrot.lane.b32.xlu0 %v1171_v33, %s928_s10 }
  0x46   :  { %264 = vrot.lane.b32.xlu1 %v1180_v34, %s928_s10 }
  0x47   :  { %262 = vrot.lane.b32.xlu0 %v1185_v35, %s928_s10 }
  0x4a   :  { %280 = vrot.lane.b32.xlu1 %v1194_v36, %s928_s10 }
  0x4b   :  { %278 = vrot.lane.b32.xlu0 %v1199_v37, %s928_s10 }
  0x4e   :  { %284 = vrot.lane.b32.xlu1 %v1208_v38, %s928_s10 }
  0x4f   :  { %282 = vrot.lane.b32.xlu0 %v1213_v39, %s928_s10 }
  0x52   :  { %319 = vrot.lane.b32.xlu1 %v1222_v40, %s928_s10 }
  0x53   :  { %317 = vrot.lane.b32.xlu0 %v1227_v41, %s928_s10 }
  0x56   :  { %323 = vrot.lane.b32.xlu1 %v1236_v42, %s928_s10 }
  0x57   :  { %321 = vrot.lane.b32.xlu0 %v1241_v43, %s928_s10 }
  0x5a   :  { %339 = vrot.lane.b32.xlu1 %v1250_v44, %s928_s10 }
  0x5b   :  { %337 = vrot.lane.b32.xlu0 %v1255_v45, %s928_s10 }
  0x5e   :  { %343 = vrot.lane.b32.xlu1 %v1264_v46, %s928_s10 }
  0x5f   :  { %341 = vrot.lane.b32.xlu0 %v1269_v47, %s928_s10 }
  0x62   :  { %378 = vrot.lane.b32.xlu1 %v1278_v48, %s928_s10 }
  0x63   :  { %376 = vrot.lane.b32.xlu0 %v1283_v49, %s928_s10 }
  0x66   :  { %382 = vrot.lane.b32.xlu1 %v1292_v50, %s928_s10 }
  0x67   :  { %380 = vrot.lane.b32.xlu0 %v1297_v51, %s928_s10 }
  0x6a   :  { %398 = vrot.lane.b32.xlu1 %v1306_v52, %s928_s10 }
  0x6b   :  { %396 = vrot.lane.b32.xlu0 %v1311_v53, %s928_s10 }
  0x6e   :  { %402 = vrot.lane.b32.xlu1 %v1320_v54, %s928_s10 }
  0x6f   :  { %400 = vrot.lane.b32.xlu0 %v1325_v55, %s928_s10 }
  0x72   :  { %437 = vrot.lane.b32.xlu1 %v1334_v56, %s928_s10 }
  0x73   :  { %435 = vrot.lane.b32.xlu0 %v1339_v57, %s928_s10 }
  0x74   :  { %v26_v60 = vpop.permute.xlu1 %25 }
  0x75   :  { %v22_v61 = vpop.permute.xlu0 %21 }
  0x76   :  { %441 = vrot.lane.b32.xlu1 %v1348_v58, %s928_s10  ;;  %v1381_v58 = vld [vmem:[%s1979_s0 + $0x290] sm:$0xff]  ;;  %v33_v51 = vmax.f32 %v947_v1, %v22_v61  ;;  %v1394_v1 = vld [vmem:[%s1979_s0 + $0x108] sm:$0x1f] }
  0x77   :  { %439 = vrot.lane.b32.xlu0 %v1353_v59, %s928_s10  ;;  %v1376_v59 = vld [vmem:[%s1979_s0 + $0x298] sm:$0x1f] }
  0x78   :  { %v28_v57 = vpop.permute.xlu1 %27 }
  0x79   :  { %v24_v56 = vpop.permute.xlu0 %23 }
  0x7a   :  { %457 = vrot.lane.b32.xlu1 %v1362_v62, %s928_s10  ;;  %v34_v50 = vmax.f32 %v961_v3, %v24_v56  ;;  %v1399_v3 = vld [vmem:[%s1979_s0 + $0x100] sm:$0xff]  ;;  %v1442_v56 = vld [vmem:[%s1979_s0 + $0x118] sm:$0x1f] }
  0x7b   :  { %455 = vrot.lane.b32.xlu0 %v1367_v63, %s928_s10 }
  0x7c   :  { %v44_v55 = vpop.permute.xlu1 %43 }
  0x7d   :  { %v42_v54 = vpop.permute.xlu0 %41  ;;  %v54_v62 = vmax.f32 %v970_v4, %v44_v55  ;;  %v36_v55 = vmax.f32 %v956_v2, %v28_v57  ;;  %v1447_v57 = vld [vmem:[%s1979_s0 + $0x110] sm:$0xff] }
  0x7e   :  { %v53_v63 = vmax.f32 %v975_v5, %v42_v54  ;;  %461 = vrot.lane.b32.xlu1 %v1376_v59, %s928_s10  ;;  %v35_v54 = vmax.f32 %v942_v0, %v26_v60 }
  0x7f   :  { %459 = vrot.lane.b32.xlu0 %v1381_v58, %s928_s10  ;;  %v58_v53 = vmax.f32 %v34_v50, %v54_v62  ;;  %v1456_v62 = vld [vmem:[%s1979_s0 + $0x2b8] sm:$0x1f] }
  0x80   :  { %v57_v52 = vmax.f32 %v33_v51, %v53_v63  ;;  %v48_v4 = vpop.permute.xlu1 %47  ;;  %v1461_v63 = vld [vmem:[%s1979_s0 + $0x2b0] sm:$0xff] }
  0x81   :  { %v46_v5 = vpop.permute.xlu0 %45  ;;  %64 = vst.msk [vmem:[%s1980_s1 + $0x8] sm:$0x1f] %vm63_vm0, %v58_v53  ;;  %v56_v50 = vmax.f32 %v984_v6, %v48_v4  ;;  %v1420_v53 = vld [vmem:[%s1979_s0 + $0x2a8] sm:$0x1f] }
  0x82   :  { %62 = vst.msk [vmem:[%s1980_s1] sm:$0xff] %vm61_vm1, %v57_v52  ;;  %v55_v51 = vmax.f32 %v989_v7, %v46_v5  ;;  %496 = vrot.lane.b32.xlu1 %v1394_v1, %s928_s10  ;;  %v1425_v52 = vld [vmem:[%s1979_s0 + $0x2a0] sm:$0xff] }
  0x83   :  { %494 = vrot.lane.b32.xlu0 %v1399_v3, %s928_s10  ;;  %v60_v0 = vmax.f32 %v36_v55, %v56_v50  ;;  %2008 = vst [vmem:[#allocation14_spill] sm:$0xff] %v1425_v52 }
  0x84   :  { %v59_v2 = vmax.f32 %v35_v54, %v55_v51  ;;  %v84_v6 = vpop.permute.xlu1 %83 }
  0x85   :  { %v82_v7 = vpop.permute.xlu0 %81  ;;  %66 = vst.msk [vmem:[%s1980_s1 + $0xd8] sm:$0x1f] %vm63_vm0, %v60_v0  ;;  %v94_v54 = vmax.f32 %v998_v8, %v84_v6  ;;  %v1479_v8 = vld [vmem:[%s1979_s0 + $0x120] sm:$0xff] }
  0x86   :  { %65 = vst.msk [vmem:[%s1980_s1 + $0xd0] sm:$0xff] %vm61_vm1, %v59_v2  ;;  %500 = vrot.lane.b32.xlu1 %v1420_v53, %s928_s10  ;;  %v93_v55 = vmax.f32 %v1003_v9, %v82_v7 }
  0x87   :  { %498 = vrot.lane.b32.xlu0 %v1425_v52, %s928_s10  ;;  %v1474_v52 = vld [vmem:[%s1979_s0 + $0x128] sm:$0x1f] }
  0x88   :  { %v88_v60 = vpop.permute.xlu1 %87 }
  0x89   :  { %v86_v61 = vpop.permute.xlu0 %85 }
  0x8a   :  { %516 = vrot.lane.b32.xlu1 %v1442_v56, %s928_s10  ;;  %v95_v6 = vmax.f32 %v1017_v11, %v86_v61  ;;  %v1505_v61 = vld [vmem:[%s1979_s0 + $0x2c0] sm:$0xff] }
  0x8b   :  { %514 = vrot.lane.b32.xlu0 %v1447_v57, %s928_s10 }
  0x8c   :  { %v104_v4 = vpop.permute.xlu1 %103 }
  0x8d   :  { %v102_v5 = vpop.permute.xlu0 %101  ;;  %v114_v50 = vmax.f32 %v1026_v12, %v104_v4 }
  0x8e   :  { %v113_v51 = vmax.f32 %v1031_v13, %v102_v5  ;;  %520 = vrot.lane.b32.xlu1 %v1456_v62, %s928_s10  ;;  %v96_v13 = vmax.f32 %v1012_v10, %v88_v60  ;;  %v1500_v60 = vld [vmem:[%s1979_s0 + $0x2c8] sm:$0x1f]  ;;  %v1522_v5 = vld [vmem:[%s1979_s0 + $0x138] sm:$0x1f] }
  0x8f   :  { %518 = vrot.lane.b32.xlu0 %v1461_v63, %s928_s10  ;;  %v118_v0 = vmax.f32 %v94_v54, %v114_v50  ;;  %v1527_v54 = vld [vmem:[%s1979_s0 + $0x130] sm:$0xff] }
  0x90   :  { %v117_v2 = vmax.f32 %v93_v55, %v113_v51  ;;  %v108_v9 = vpop.permute.xlu1 %107  ;;  %v1536_v51 = vld [vmem:[%s1979_s0 + $0x2d8] sm:$0x1f] }
  0x91   :  { %v106_v12 = vpop.permute.xlu0 %105  ;;  %792 = vst.msk [vmem:[%s1980_s1 + $0x18] sm:$0x1f] %vm63_vm0, %v118_v0  ;;  %v116_v7 = vmax.f32 %v1040_v14, %v108_v9  ;;  %v1541_v0 = vld [vmem:[%s1979_s0 + $0x2d0] sm:$0xff] }
  0x92   :  { %791 = vst.msk [vmem:[%s1980_s1 + $0x10] sm:$0xff] %vm61_vm1, %v117_v2  ;;  %v115_v4 = vmax.f32 %v1045_v15, %v106_v12  ;;  %555 = vrot.lane.b32.xlu1 %v1474_v52, %s928_s10 }
  0x93   :  { %553 = vrot.lane.b32.xlu0 %v1479_v8, %s928_s10  ;;  %v120_v10 = vmax.f32 %v96_v13, %v116_v7 }
  0x94   :  { %v119_v11 = vmax.f32 %v95_v6, %v115_v4  ;;  %v143_v14 = vpop.permute.xlu1 %142 }
  0x95   :  { %v141_v15 = vpop.permute.xlu0 %140  ;;  %794 = vst.msk [vmem:[%s1980_s1 + $0xe8] sm:$0x1f] %vm63_vm0, %v120_v10  ;;  %v153_v12 = vmax.f32 %v1054_v16, %v143_v14  ;;  %v1559_v16 = vld [vmem:[%s1979_s0 + $0x140] sm:$0xff] }
  0x96   :  { %793 = vst.msk [vmem:[%s1980_s1 + $0xe0] sm:$0xff] %vm61_vm1, %v119_v11  ;;  %559 = vrot.lane.b32.xlu1 %v1500_v60, %s928_s10  ;;  %v152_v13 = vmax.f32 %v1059_v17, %v141_v15  ;;  %v1554_v11 = vld [vmem:[%s1979_s0 + $0x148] sm:$0x1f] }
  0x97   :  { %557 = vrot.lane.b32.xlu0 %v1505_v61, %s928_s10 }
  0x98   :  { %v147_v55 = vpop.permute.xlu1 %146 }
  0x99   :  { %v145_v50 = vpop.permute.xlu0 %144 }
  0x9a   :  { %575 = vrot.lane.b32.xlu1 %v1522_v5, %s928_s10  ;;  %v154_v14 = vmax.f32 %v1073_v19, %v145_v50  ;;  %v1585_v50 = vld [vmem:[%s1979_s0 + $0x2e0] sm:$0xff] }
  0x9b   :  { %573 = vrot.lane.b32.xlu0 %v1527_v54, %s928_s10 }
  0x9c   :  { %v163_v2 = vpop.permute.xlu1 %162 }
  0x9d   :  { %v161_v9 = vpop.permute.xlu0 %160  ;;  %v173_v6 = vmax.f32 %v1082_v20, %v163_v2 }
  0x9e   :  { %v172_v7 = vmax.f32 %v1087_v21, %v161_v9  ;;  %579 = vrot.lane.b32.xlu1 %v1536_v51, %s928_s10  ;;  %v155_v21 = vmax.f32 %v1068_v18, %v147_v55  ;;  %v1580_v55 = vld [vmem:[%s1979_s0 + $0x2e8] sm:$0x1f]  ;;  %v1602_v9 = vld [vmem:[%s1979_s0 + $0x158] sm:$0x1f] }
  0x9f   :  { %577 = vrot.lane.b32.xlu0 %v1541_v0, %s928_s10  ;;  %v177_v4 = vmax.f32 %v153_v12, %v173_v6  ;;  %v1607_v12 = vld [vmem:[%s1979_s0 + $0x150] sm:$0xff] }
  0xa0   :  { %v176_v10 = vmax.f32 %v152_v13, %v172_v7  ;;  %v167_v17 = vpop.permute.xlu1 %166  ;;  %v1616_v7 = vld [vmem:[%s1979_s0 + $0x2f8] sm:$0x1f] }
  0xa1   :  { %v165_v20 = vpop.permute.xlu0 %164  ;;  %804 = vst.msk [vmem:[%s1980_s1 + $0x28] sm:$0x1f] %vm63_vm0, %v177_v4  ;;  %v175_v15 = vmax.f32 %v1096_v22, %v167_v17  ;;  %v1621_v4 = vld [vmem:[%s1979_s0 + $0x2f0] sm:$0xff] }
  0xa2   :  { %803 = vst.msk [vmem:[%s1980_s1 + $0x20] sm:$0xff] %vm61_vm1, %v176_v10  ;;  %v174_v2 = vmax.f32 %v1101_v23, %v165_v20  ;;  %614 = vrot.lane.b32.xlu1 %v1554_v11, %s928_s10 }
  0xa3   :  { %612 = vrot.lane.b32.xlu0 %v1559_v16, %s928_s10  ;;  %v179_v18 = vmax.f32 %v155_v21, %v175_v15 }
  0xa4   :  { %v178_v19 = vmax.f32 %v154_v14, %v174_v2  ;;  %v202_v22 = vpop.permute.xlu1 %201 }
  0xa5   :  { %v200_v23 = vpop.permute.xlu0 %199  ;;  %806 = vst.msk [vmem:[%s1980_s1 + $0xf8] sm:$0x1f] %vm63_vm0, %v179_v18  ;;  %v212_v20 = vmax.f32 %v1110_v24, %v202_v22  ;;  %v1639_v24 = vld [vmem:[%s1979_s0 + $0x160] sm:$0xff] }
  0xa6   :  { %805 = vst.msk [vmem:[%s1980_s1 + $0xf0] sm:$0xff] %vm61_vm1, %v178_v19  ;;  %618 = vrot.lane.b32.xlu1 %v1580_v55, %s928_s10  ;;  %v211_v21 = vmax.f32 %v1115_v25, %v200_v23  ;;  %v1634_v19 = vld [vmem:[%s1979_s0 + $0x168] sm:$0x1f] }
  0xa7   :  { %616 = vrot.lane.b32.xlu0 %v1585_v50, %s928_s10 }
  0xa8   :  { %v206_v13 = vpop.permute.xlu1 %205 }
  0xa9   :  { %v204_v6 = vpop.permute.xlu0 %203 }
  0xaa   :  { %634 = vrot.lane.b32.xlu1 %v1602_v9, %s928_s10  ;;  %v213_v22 = vmax.f32 %v1129_v27, %v204_v6  ;;  %v1665_v6 = vld [vmem:[%s1979_s0 + $0x300] sm:$0xff] }
  0xab   :  { %632 = vrot.lane.b32.xlu0 %v1607_v12, %s928_s10 }
  0xac   :  { %v222_v10 = vpop.permute.xlu1 %221 }
  0xad   :  { %v220_v17 = vpop.permute.xlu0 %219  ;;  %v232_v14 = vmax.f32 %v1138_v28, %v222_v10 }
  0xae   :  { %v231_v15 = vmax.f32 %v1143_v29, %v220_v17  ;;  %638 = vrot.lane.b32.xlu1 %v1616_v7, %s928_s10  ;;  %v214_v29 = vmax.f32 %v1124_v26, %v206_v13  ;;  %v1660_v13 = vld [vmem:[%s1979_s0 + $0x308] sm:$0x1f]  ;;  %v1682_v17 = vld [vmem:[%s1979_s0 + $0x178] sm:$0x1f] }
  0xaf   :  { %636 = vrot.lane.b32.xlu0 %v1621_v4, %s928_s10  ;;  %v236_v2 = vmax.f32 %v212_v20, %v232_v14  ;;  %v1687_v20 = vld [vmem:[%s1979_s0 + $0x170] sm:$0xff] }
  0xb0   :  { %v235_v18 = vmax.f32 %v211_v21, %v231_v15  ;;  %v226_v25 = vpop.permute.xlu1 %225  ;;  %v1696_v15 = vld [vmem:[%s1979_s0 + $0x318] sm:$0x1f] }
  0xb1   :  { %v224_v28 = vpop.permute.xlu0 %223  ;;  %816 = vst.msk [vmem:[%s1980_s1 + $0x38] sm:$0x1f] %vm63_vm0, %v236_v2  ;;  %v234_v23 = vmax.f32 %v1152_v30, %v226_v25  ;;  %v1701_v2 = vld [vmem:[%s1979_s0 + $0x310] sm:$0xff] }
  0xb2   :  { %815 = vst.msk [vmem:[%s1980_s1 + $0x30] sm:$0xff] %vm61_vm1, %v235_v18  ;;  %v233_v10 = vmax.f32 %v1157_v31, %v224_v28  ;;  %673 = vrot.lane.b32.xlu1 %v1634_v19, %s928_s10 }
  0xb3   :  { %671 = vrot.lane.b32.xlu0 %v1639_v24, %s928_s10  ;;  %v238_v26 = vmax.f32 %v214_v29, %v234_v23 }
  0xb4   :  { %v237_v27 = vmax.f32 %v213_v22, %v233_v10  ;;  %v261_v30 = vpop.permute.xlu1 %260 }
  0xb5   :  { %v259_v31 = vpop.permute.xlu0 %258  ;;  %818 = vst.msk [vmem:[%s1980_s1 + $0x108] sm:$0x1f] %vm63_vm0, %v238_v26  ;;  %v271_v28 = vmax.f32 %v1166_v32, %v261_v30  ;;  %v1719_v32 = vld [vmem:[%s1979_s0 + $0x180] sm:$0xff] }
  0xb6   :  { %817 = vst.msk [vmem:[%s1980_s1 + $0x100] sm:$0xff] %vm61_vm1, %v237_v27  ;;  %677 = vrot.lane.b32.xlu1 %v1660_v13, %s928_s10  ;;  %v270_v29 = vmax.f32 %v1171_v33, %v259_v31  ;;  %v1714_v27 = vld [vmem:[%s1979_s0 + $0x188] sm:$0x1f] }
  0xb7   :  { %675 = vrot.lane.b32.xlu0 %v1665_v6, %s928_s10 }
  0xb8   :  { %v265_v21 = vpop.permute.xlu1 %264 }
  0xb9   :  { %v263_v14 = vpop.permute.xlu0 %262 }
  0xba   :  { %693 = vrot.lane.b32.xlu1 %v1682_v17, %s928_s10  ;;  %v272_v30 = vmax.f32 %v1185_v35, %v263_v14  ;;  %v1745_v14 = vld [vmem:[%s1979_s0 + $0x320] sm:$0xff] }
  0xbb   :  { %691 = vrot.lane.b32.xlu0 %v1687_v20, %s928_s10  ;;  %2010 = vst [vmem:[#allocation16_spill] sm:$0xff] %v1745_v14 }
  0xbc   :  { %v281_v18 = vpop.permute.xlu1 %280 }
  0xbd   :  { %v279_v25 = vpop.permute.xlu0 %278  ;;  %v291_v22 = vmax.f32 %v1194_v36, %v281_v18 }
  0xbe   :  { %v290_v23 = vmax.f32 %v1199_v37, %v279_v25  ;;  %697 = vrot.lane.b32.xlu1 %v1696_v15, %s928_s10  ;;  %v273_v37 = vmax.f32 %v1180_v34, %v265_v21  ;;  %v1740_v21 = vld [vmem:[%s1979_s0 + $0x328] sm:$0x1f]  ;;  %v1762_v25 = vld [vmem:[%s1979_s0 + $0x198] sm:$0x1f] }
  0xbf   :  { %695 = vrot.lane.b32.xlu0 %v1701_v2, %s928_s10  ;;  %v295_v10 = vmax.f32 %v271_v28, %v291_v22  ;;  %2009 = vst [vmem:[#allocation15_spill] sm:$0xff] %v1740_v21  ;;  %v1767_v28 = vld [vmem:[%s1979_s0 + $0x190] sm:$0xff] }
  0xc0   :  { %v294_v26 = vmax.f32 %v270_v29, %v290_v23  ;;  %v285_v33 = vpop.permute.xlu1 %284  ;;  %v1776_v23 = vld [vmem:[%s1979_s0 + $0x338] sm:$0x1f] }
  0xc1   :  { %v283_v36 = vpop.permute.xlu0 %282  ;;  %828 = vst.msk [vmem:[%s1980_s1 + $0x48] sm:$0x1f] %vm63_vm0, %v295_v10  ;;  %v293_v31 = vmax.f32 %v1208_v38, %v285_v33  ;;  %v1781_v10 = vld [vmem:[%s1979_s0 + $0x330] sm:$0xff] }
  0xc2   :  { %827 = vst.msk [vmem:[%s1980_s1 + $0x40] sm:$0xff] %vm61_vm1, %v294_v26  ;;  %v292_v18 = vmax.f32 %v1213_v39, %v283_v36  ;;  %732 = vrot.lane.b32.xlu1 %v1714_v27, %s928_s10 }
  0xc3   :  { %730 = vrot.lane.b32.xlu0 %v1719_v32, %s928_s10  ;;  %v297_v34 = vmax.f32 %v273_v37, %v293_v31 }
  0xc4   :  { %v296_v35 = vmax.f32 %v272_v30, %v292_v18  ;;  %v320_v38 = vpop.permute.xlu1 %319 }
  0xc5   :  { %v318_v39 = vpop.permute.xlu0 %317  ;;  %830 = vst.msk [vmem:[%s1980_s1 + $0x118] sm:$0x1f] %vm63_vm0, %v297_v34  ;;  %v330_v36 = vmax.f32 %v1222_v40, %v320_v38 }
  0xc6   :  { %829 = vst.msk [vmem:[%s1980_s1 + $0x110] sm:$0xff] %vm61_vm1, %v296_v35  ;;  %736 = vrot.lane.b32.xlu1 %v1740_v21, %s928_s10  ;;  %v329_v37 = vmax.f32 %v1227_v41, %v318_v39 }
  0xc7   :  { %734 = vrot.lane.b32.xlu0 %v1745_v14, %s928_s10 }
  0xc8   :  { %v324_v29 = vpop.permute.xlu1 %323 }
  0xc9   :  { %v322_v22 = vpop.permute.xlu0 %321  ;;  %v332_v21 = vmax.f32 %v1236_v42, %v324_v29 }
  0xca   :  { %752 = vrot.lane.b32.xlu1 %v1762_v25, %s928_s10  ;;  %v331_v40 = vmax.f32 %v1241_v43, %v322_v22 }
  0xcb   :  { %750 = vrot.lane.b32.xlu0 %v1767_v28, %s928_s10 }
  0xcc   :  { %v340_v26 = vpop.permute.xlu1 %339 }
  0xcd   :  { %v338_v33 = vpop.permute.xlu0 %337  ;;  %v350_v30 = vmax.f32 %v1250_v44, %v340_v26 }
  0xce   :  { %v349_v31 = vmax.f32 %v1255_v45, %v338_v33  ;;  %756 = vrot.lane.b32.xlu1 %v1776_v23, %s928_s10  ;;  %v2012_v33 = vld [vmem:[#allocation5_spill] sm:$0xff] }
  0xcf   :  { %754 = vrot.lane.b32.xlu0 %v1781_v10, %s928_s10  ;;  %v354_v18 = vmax.f32 %v330_v36, %v350_v30 }
  0xd0   :  { %v353_v34 = vmax.f32 %v329_v37, %v349_v31  ;;  %v344_v35 = vpop.permute.xlu1 %343 }
  0xd1   :  { %v342_v14 = vpop.permute.xlu0 %341  ;;  %840 = vst.msk [vmem:[%s1980_s1 + $0x58] sm:$0x1f] %vm63_vm0, %v354_v18  ;;  %v352_v41 = vmax.f32 %v1264_v46, %v344_v35 }
  0xd2   :  { %839 = vst.msk [vmem:[%s1980_s1 + $0x50] sm:$0xff] %vm61_vm1, %v353_v34  ;;  %v351_v44 = vmax.f32 %v1269_v47, %v342_v14  ;;  %v2011_v14 = vld [vmem:[#allocation4_spill] sm:$0xff]  ;;  %v2013_v34 = vld [vmem:[#allocation2_spill] sm:$0xff] }
  0xd3   :  { %v356_v45 = vmax.f32 %v332_v21, %v352_v41 }
  0xd4   :  { %v355_v38 = vmax.f32 %v331_v40, %v351_v44  ;;  %v379_v39 = vpop.permute.xlu1 %378  ;;  %v2014_v40 = vld [vmem:[#allocation3_spill] sm:$0xff] }
  0xd5   :  { %v377_v42 = vpop.permute.xlu0 %376  ;;  %842 = vst.msk [vmem:[%s1980_s1 + $0x128] sm:$0x1f] %vm63_vm0, %v356_v45  ;;  %v389_v47 = vmax.f32 %v1278_v48, %v379_v39  ;;  %v2015_v48 = vld [vmem:[#allocation6_spill] sm:$0xff]  ;;  %v2016_v44 = vld [vmem:[#allocation7_spill] sm:$0xff] }
  0xd6   :  { %841 = vst.msk [vmem:[%s1980_s1 + $0x120] sm:$0xff] %vm61_vm1, %v355_v38  ;;  %v388_v21 = vmax.f32 %v1283_v49, %v377_v42 }
  0xd8   :  { %v383_v43 = vpop.permute.xlu1 %382 }
  0xd9   :  { %v381_v29 = vpop.permute.xlu0 %380  ;;  %v391_v35 = vmax.f32 %v2013_v34, %v383_v43 }
  0xda   :  { %v390_v41 = vmax.f32 %v2014_v40, %v381_v29 }
  0xdc   :  { %v399_v22 = vpop.permute.xlu1 %398 }
  0xdd   :  { %v397_v46 = vpop.permute.xlu0 %396  ;;  %v409_v26 = vmax.f32 %v2011_v14, %v399_v22 }
  0xde   :  { %v408_v36 = vmax.f32 %v2012_v33, %v397_v46 }
  0xdf   :  { %v413_v37 = vmax.f32 %v389_v47, %v409_v26  ;;  %v2018_v26 = vld [vmem:[#allocation9_spill] sm:$0xff] }
  0xe0   :  { %v412_v30 = vmax.f32 %v388_v21, %v408_v36  ;;  %v403_v31 = vpop.permute.xlu1 %402  ;;  %v2017_v21 = vld [vmem:[#allocation8_spill] sm:$0xff] }
  0xe1   :  { %v401_v18 = vpop.permute.xlu0 %400  ;;  %852 = vst.msk [vmem:[%s1980_s1 + $0x68] sm:$0x1f] %vm63_vm0, %v413_v37  ;;  %v411_v49 = vmax.f32 %v2015_v48, %v403_v31  ;;  %v2019_v36 = vld [vmem:[#allocation12_spill] sm:$0xff] }
  0xe2   :  { %851 = vst.msk [vmem:[%s1980_s1 + $0x60] sm:$0xff] %vm61_vm1, %v412_v30  ;;  %v410_v45 = vmax.f32 %v2016_v44, %v401_v18  ;;  %v2020_v30 = vld [vmem:[#allocation13_spill] sm:$0xff] }
  0xe3   :  { %v415_v38 = vmax.f32 %v391_v35, %v411_v49  ;;  %v2022_v49 = vld [vmem:[#allocation11_spill] sm:$0xff] }
  0xe4   :  { %v414_v39 = vmax.f32 %v390_v41, %v410_v45  ;;  %v438_v42 = vpop.permute.xlu1 %437  ;;  %v2021_v41 = vld [vmem:[#allocation10_spill] sm:$0xff] }
  0xe5   :  { %v436_v43 = vpop.permute.xlu0 %435  ;;  %854 = vst.msk [vmem:[%s1980_s1 + $0x138] sm:$0x1f] %vm63_vm0, %v415_v38  ;;  %v448_v14 = vmax.f32 %v2017_v21, %v438_v42 }
  0xe6   :  { %853 = vst.msk [vmem:[%s1980_s1 + $0x130] sm:$0xff] %vm61_vm1, %v414_v39  ;;  %v447_v33 = vmax.f32 %v2018_v26, %v436_v43 }
  0xe8   :  { %v442_v29 = vpop.permute.xlu1 %441 }
  0xe9   :  { %v440_v22 = vpop.permute.xlu0 %439  ;;  %v450_v48 = vmax.f32 %v2021_v41, %v442_v29 }
  0xea   :  { %v449_v44 = vmax.f32 %v2022_v49, %v440_v22 }
  0xec   :  { %v458_v46 = vpop.permute.xlu1 %457 }
  0xed   :  { %v456_v47 = vpop.permute.xlu0 %455  ;;  %v468_v37 = vmax.f32 %v2019_v36, %v458_v46 }
  0xee   :  { %v467_v31 = vmax.f32 %v2020_v30, %v456_v47 }
  0xef   :  { %v472_v18 = vmax.f32 %v448_v14, %v468_v37 }
  0xf0   :  { %v471_v34 = vmax.f32 %v447_v33, %v467_v31  ;;  %v462_v35 = vpop.permute.xlu1 %461 }
  0xf1   :  { %v460_v40 = vpop.permute.xlu0 %459  ;;  %864 = vst.msk [vmem:[%s1980_s1 + $0x78] sm:$0x1f] %vm63_vm0, %v472_v18  ;;  %v470_v45 = vmax.f32 %v1376_v59, %v462_v35  ;;  %v2023_v18 = vld [vmem:[#allocation14_spill] sm:$0xff] }
  0xf2   :  { %863 = vst.msk [vmem:[%s1980_s1 + $0x70] sm:$0xff] %vm61_vm1, %v471_v34  ;;  %v469_v38 = vmax.f32 %v1381_v58, %v460_v40 }
  0xf3   :  { %v474_v39 = vmax.f32 %v450_v48, %v470_v45 }
  0xf4   :  { %v473_v42 = vmax.f32 %v449_v44, %v469_v38  ;;  %v497_v43 = vpop.permute.xlu1 %496 }
  0xf5   :  { %v495_v29 = vpop.permute.xlu0 %494  ;;  %866 = vst.msk [vmem:[%s1980_s1 + $0x148] sm:$0x1f] %vm63_vm0, %v474_v39  ;;  %v507_v58 = vmax.f32 %v1394_v1, %v497_v43 }
  0xf6   :  { %865 = vst.msk [vmem:[%s1980_s1 + $0x140] sm:$0xff] %vm61_vm1, %v473_v42  ;;  %v506_v21 = vmax.f32 %v1399_v3, %v495_v29 }
  0xf8   :  { %v501_v22 = vpop.permute.xlu1 %500 }
  0xf9   :  { %v499_v46 = vpop.permute.xlu0 %498  ;;  %v509_v31 = vmax.f32 %v1420_v53, %v501_v22 }
  0xfa   :  { %v508_v34 = vmax.f32 %v2023_v18, %v499_v46 }
  0xfc   :  { %v517_v47 = vpop.permute.xlu1 %516 }
  0xfd   :  { %v515_v59 = vpop.permute.xlu0 %514  ;;  %v527_v14 = vmax.f32 %v1442_v56, %v517_v47 }
  0xfe   :  { %v526_v26 = vmax.f32 %v1447_v57, %v515_v59 }
  0xff   :  { %v531_v33 = vmax.f32 %v507_v58, %v527_v14 }
 0x100   :  { %v530_v36 = vmax.f32 %v506_v21, %v526_v26  ;;  %v521_v37 = vpop.permute.xlu1 %520 }
 0x101   :  { %v519_v30 = vpop.permute.xlu0 %518  ;;  %876 = vst.msk [vmem:[%s1980_s1 + $0x88] sm:$0x1f] %vm63_vm0, %v531_v33  ;;  %v529_v1 = vmax.f32 %v1456_v62, %v521_v37 }
 0x102   :  { %875 = vst.msk [vmem:[%s1980_s1 + $0x80] sm:$0xff] %vm61_vm1, %v530_v36  ;;  %v528_v3 = vmax.f32 %v1461_v63, %v519_v30 }
 0x103   :  { %v533_v56 = vmax.f32 %v509_v31, %v529_v1 }
 0x104   :  { %v532_v57 = vmax.f32 %v508_v34, %v528_v3  ;;  %v556_v35 = vpop.permute.xlu1 %555 }
 0x105   :  { %v554_v53 = vpop.permute.xlu0 %553  ;;  %878 = vst.msk [vmem:[%s1980_s1 + $0x158] sm:$0x1f] %vm63_vm0, %v533_v56  ;;  %v566_v63 = vmax.f32 %v1474_v52, %v556_v35 }
 0x106   :  { %877 = vst.msk [vmem:[%s1980_s1 + $0x150] sm:$0xff] %vm61_vm1, %v532_v57  ;;  %v565_v49 = vmax.f32 %v1479_v8, %v554_v53 }
 0x108   :  { %v560_v40 = vpop.permute.xlu1 %559 }
 0x109   :  { %v558_v41 = vpop.permute.xlu0 %557  ;;  %v568_v29 = vmax.f32 %v1500_v60, %v560_v40 }
 0x10a   :  { %v567_v22 = vmax.f32 %v1505_v61, %v558_v41 }
 0x10c   :  { %v576_v48 = vpop.permute.xlu1 %575 }
 0x10d   :  { %v574_v62 = vpop.permute.xlu0 %573  ;;  %v586_v44 = vmax.f32 %v1522_v5, %v576_v48 }
 0x10e   :  { %v585_v45 = vmax.f32 %v1527_v54, %v574_v62 }
 0x10f   :  { %v590_v38 = vmax.f32 %v566_v63, %v586_v44 }
 0x110   :  { %v589_v39 = vmax.f32 %v565_v49, %v585_v45  ;;  %v580_v42 = vpop.permute.xlu1 %579 }
 0x111   :  { %v578_v43 = vpop.permute.xlu0 %577  ;;  %888 = vst.msk [vmem:[%s1980_s1 + $0x98] sm:$0x1f] %vm63_vm0, %v590_v38  ;;  %v588_v52 = vmax.f32 %v1536_v51, %v580_v42 }
 0x112   :  { %887 = vst.msk [vmem:[%s1980_s1 + $0x90] sm:$0xff] %vm61_vm1, %v589_v39  ;;  %v587_v8 = vmax.f32 %v1541_v0, %v578_v43 }
 0x113   :  { %v592_v5 = vmax.f32 %v568_v29, %v588_v52  ;;  %v2024_v52 = vld [vmem:[#allocation15_spill] sm:$0xff] }
 0x114   :  { %v591_v54 = vmax.f32 %v567_v22, %v587_v8  ;;  %v615_v46 = vpop.permute.xlu1 %614 }
 0x115   :  { %v613_v60 = vpop.permute.xlu0 %612  ;;  %890 = vst.msk [vmem:[%s1980_s1 + $0x168] sm:$0x1f] %vm63_vm0, %v592_v5  ;;  %v625_v0 = vmax.f32 %v1554_v11, %v615_v46  ;;  %v2025_v5 = vld [vmem:[#allocation16_spill] sm:$0xff] }
 0x116   :  { %889 = vst.msk [vmem:[%s1980_s1 + $0x160] sm:$0xff] %vm61_vm1, %v591_v54  ;;  %v624_v58 = vmax.f32 %v1559_v16, %v613_v60 }
 0x118   :  { %v619_v61 = vpop.permute.xlu1 %618 }
 0x119   :  { %v617_v47 = vpop.permute.xlu0 %616  ;;  %v627_v30 = vmax.f32 %v1580_v55, %v619_v61 }
 0x11a   :  { %v626_v31 = vmax.f32 %v1585_v50, %v617_v47 }
 0x11c   :  { %v635_v59 = vpop.permute.xlu1 %634 }
 0x11d   :  { %v633_v51 = vpop.permute.xlu0 %632  ;;  %v645_v21 = vmax.f32 %v1602_v9, %v635_v59 }
 0x11e   :  { %v644_v14 = vmax.f32 %v1607_v12, %v633_v51 }
 0x11f   :  { %v649_v26 = vmax.f32 %v625_v0, %v645_v21 }
 0x120   :  { %v648_v33 = vmax.f32 %v624_v58, %v644_v14  ;;  %v639_v36 = vpop.permute.xlu1 %638 }
 0x121   :  { %v637_v37 = vpop.permute.xlu0 %636  ;;  %900 = vst.msk [vmem:[%s1980_s1 + $0xa8] sm:$0x1f] %vm63_vm0, %v649_v26  ;;  %v647_v11 = vmax.f32 %v1616_v7, %v639_v36 }
 0x122   :  { %899 = vst.msk [vmem:[%s1980_s1 + $0xa0] sm:$0xff] %vm61_vm1, %v648_v33  ;;  %v646_v16 = vmax.f32 %v1621_v4, %v637_v37 }
 0x123   :  { %v651_v9 = vmax.f32 %v627_v30, %v647_v11 }
 0x124   :  { %v650_v12 = vmax.f32 %v626_v31, %v646_v16  ;;  %v674_v18 = vpop.permute.xlu1 %673 }
 0x125   :  { %v672_v55 = vpop.permute.xlu0 %671  ;;  %902 = vst.msk [vmem:[%s1980_s1 + $0x178] sm:$0x1f] %vm63_vm0, %v651_v9  ;;  %v684_v4 = vmax.f32 %v1634_v19, %v674_v18 }
 0x126   :  { %901 = vst.msk [vmem:[%s1980_s1 + $0x170] sm:$0xff] %vm61_vm1, %v650_v12  ;;  %v683_v3 = vmax.f32 %v1639_v24, %v672_v55 }
 0x128   :  { %v678_v50 = vpop.permute.xlu1 %677 }
 0x129   :  { %v676_v34 = vpop.permute.xlu0 %675  ;;  %v686_v48 = vmax.f32 %v1660_v13, %v678_v50 }
 0x12a   :  { %v685_v62 = vmax.f32 %v1665_v6, %v676_v34 }
 0x12c   :  { %v694_v1 = vpop.permute.xlu1 %693 }
 0x12d   :  { %v692_v7 = vpop.permute.xlu0 %691  ;;  %v704_v56 = vmax.f32 %v1682_v17, %v694_v1 }
 0x12e   :  { %v703_v57 = vmax.f32 %v1687_v20, %v692_v7 }
 0x12f   :  { %v708_v35 = vmax.f32 %v684_v4, %v704_v56 }
 0x130   :  { %v707_v53 = vmax.f32 %v683_v3, %v703_v57  ;;  %v698_v40 = vpop.permute.xlu1 %697 }
 0x131   :  { %v696_v41 = vpop.permute.xlu0 %695  ;;  %912 = vst.msk [vmem:[%s1980_s1 + $0xb8] sm:$0x1f] %vm63_vm0, %v708_v35  ;;  %v706_v19 = vmax.f32 %v1696_v15, %v698_v40 }
 0x132   :  { %911 = vst.msk [vmem:[%s1980_s1 + $0xb0] sm:$0xff] %vm61_vm1, %v707_v53  ;;  %v705_v24 = vmax.f32 %v1701_v2, %v696_v41 }
 0x133   :  { %v710_v17 = vmax.f32 %v686_v48, %v706_v19 }
 0x134   :  { %v709_v20 = vmax.f32 %v685_v62, %v705_v24  ;;  %v733_v63 = vpop.permute.xlu1 %732 }
 0x135   :  { %v731_v13 = vpop.permute.xlu0 %730  ;;  %914 = vst.msk [vmem:[%s1980_s1 + $0x188] sm:$0x1f] %vm63_vm0, %v710_v17  ;;  %v743_v2 = vmax.f32 %v1714_v27, %v733_v63 }
 0x136   :  { %913 = vst.msk [vmem:[%s1980_s1 + $0x180] sm:$0xff] %vm61_vm1, %v709_v20  ;;  %v742_v45 = vmax.f32 %v1719_v32, %v731_v13 }
 0x138   :  { %v737_v6 = vpop.permute.xlu1 %736 }
 0x139   :  { %v735_v49 = vpop.permute.xlu0 %734  ;;  %v745_v8 = vmax.f32 %v2024_v52, %v737_v6 }
 0x13a   :  { %v744_v54 = vmax.f32 %v2025_v5, %v735_v49 }
 0x13c   :  { %v753_v44 = vpop.permute.xlu1 %752 }
 0x13d   :  { %v751_v15 = vpop.permute.xlu0 %750  ;;  %v763_v38 = vmax.f32 %v1762_v25, %v753_v44 }
 0x13e   :  { %v762_v39 = vmax.f32 %v1767_v28, %v751_v15 }
 0x13f   :  { %v767_v42 = vmax.f32 %v743_v2, %v763_v38 }
 0x140   :  { %v766_v43 = vmax.f32 %v742_v45, %v762_v39  ;;  %v757_v29 = vpop.permute.xlu1 %756 }
 0x141   :  { %v755_v22 = vpop.permute.xlu0 %754  ;;  %924 = vst.msk [vmem:[%s1980_s1 + $0xc8] sm:$0x1f] %vm63_vm0, %v767_v42  ;;  %v765_v27 = vmax.f32 %v1776_v23, %v757_v29 }
 0x142   :  { %923 = vst.msk [vmem:[%s1980_s1 + $0xc0] sm:$0xff] %vm61_vm1, %v766_v43  ;;  %v764_v32 = vmax.f32 %v1781_v10, %v755_v22 }
 0x143   :  { %v769_v25 = vmax.f32 %v745_v8, %v765_v27 }
 0x144   :  { %v768_v28 = vmax.f32 %v744_v54, %v764_v32 }
 0x145   :  { %926 = vst.msk [vmem:[%s1980_s1 + $0x198] sm:$0x1f] %vm63_vm0, %v769_v25 }
 0x146   :  { %925 = vst.msk [vmem:[%s1980_s1 + $0x190] sm:$0xff] %vm61_vm1, %v768_v28 }

// kernel: cnn2_forward.9
= control target key start
LH: loop header
LB: loop body
LE: loop exit
PB: predicated region body
PF: predicated region fallthrough
CT: control target
= control target key end

     0   :  { %vm307_vm0 = vcmask 261120   ;;  %vm707_vm1 = vcmask 523264   ;;  %vm738_vm2 = vcmask 517120   ;;  %s1537_s1 = inlined_call_operand.vmem [shape: bf16[288,64], index: 1, kind: input, shape index: {}]   ;;  %s1538_s0 = inlined_call_operand.vmem [shape: f32[242,288], index: 0, kind: input, shape index: {}]   ;;  %s1539_s2 = inlined_call_operand.vmem [shape: f32[1,64], index: 2, kind: input, shape index: {}]   ;;  %s1540_s3 = inlined_call_operand.vmem [shape: f32[242,64], index: 3, kind: output, shape index: {}]  }
   0x1   :  { %v961_v0 = vld [vmem:[%s1537_s1 + $0x78] sm:$0xff]   ;;  %v963_v2 = vld [vmem:[%s1537_s1 + $0x70] sm:$0xff]   ;;  %v965_v4 = vld [vmem:[%s1537_s1 + $0x68] sm:$0xff]  }
   0x2   :  { %v962_v1 = vld [vmem:[%s1537_s1 + $0x38] sm:$0xff]   ;;  %779 = vmatprep.subr.bf16.mxu0 %v961_v0  ;;  %945 = vmatprep.subr.bf16.mxu1 %v961_v0  ;;  %v964_v3 = vld [vmem:[%s1537_s1 + $0x30] sm:$0xff]   ;;  %v966_v5 = vld [vmem:[%s1537_s1 + $0x28] sm:$0xff]  }
   0x3   :  { %780 = vmatpush3.bf16.msra.mxu0 %v962_v1  ;;  %953 = vmatpush3.bf16.msra.mxu1 %v962_v1  ;;  %v967_v6 = vld [vmem:[%s1537_s1 + $0x60] sm:$0xff]   ;;  %v969_v8 = vld [vmem:[%s1537_s1 + $0x58] sm:$0xff]   ;;  %v971_v10 = vld [vmem:[%s1537_s1 + $0x50] sm:$0xff]  }
   0x4   :  { %781 = vmatprep.subr.bf16.mxu0 %v963_v2  ;;  %946 = vmatprep.subr.bf16.mxu1 %v963_v2  ;;  %v968_v7 = vld [vmem:[%s1537_s1 + $0x20] sm:$0xff]   ;;  %v970_v9 = vld [vmem:[%s1537_s1 + $0x18] sm:$0xff]   ;;  %v16_v11 = vld [vmem:[%s1538_s0 + $0x8] sm:$0xff] }
   0x5   :  { %v19_v12 = vld [vmem:[%s1538_s0 + $0x20] sm:$0xff]  ;;  %v88_v13 = vld [vmem:[%s1538_s0 + $0x248] sm:$0xff]  ;;  %v972_v17 = vld [vmem:[%s1537_s1 + $0x10] sm:$0xff]  }
   0x6   :  { %v109_v14 = vpack.c.bf16 %v19_v12, %v16_v11  ;;  %v91_v15 = vld [vmem:[%s1538_s0 + $0x260] sm:$0xff]  ;;  %v973_v18 = vld [vmem:[%s1537_s1 + $0x48] sm:$0xff]   ;;  %v18_v23 = vld [vmem:[%s1538_s0 + $0x18] sm:$0xff] }
   0x7   :  { %782 = vmatpush3.bf16.msra.mxu0 %v964_v3  ;;  %954 = vmatpush3.bf16.msra.mxu1 %v964_v3  ;;  %v145_v16 = vpack.c.bf16 %v91_v15, %v88_v13  ;;  %v974_v19 = vld [vmem:[%s1537_s1 + $0x8] sm:$0xff]   ;;  %v975_v20 = vld [vmem:[%s1537_s1 + $0x40] sm:$0xff]   ;;  %v90_v25 = vld [vmem:[%s1538_s0 + $0x258] sm:$0xff] }
   0x8   :  { %783 = vmatprep.subr.bf16.mxu0 %v965_v4  ;;  %947 = vmatprep.subr.bf16.mxu1 %v965_v4  ;;  %v976_v21 = vld [vmem:[%s1537_s1] sm:$0xff]   ;;  %v977_v26 = vld [vmem:[%s1537_s1 + $0x88] sm:$0xff]   ;;  %v22_v27 = vld [vmem:[%s1538_s0 + $0x38] sm:$0xff] }
   0x9   :  { %388 = vmatprep.mubr.bf16.mxu0 %v109_v14  ;;  %484 = vmatprep.mubr.bf16.mxu1 %v145_v16  ;;  %v15_v22 = vld [vmem:[%s1538_s0] sm:$0xff]  ;;  %v25_v28 = vld [vmem:[%s1538_s0 + $0x50] sm:$0xff]  ;;  %v94_v29 = vld [vmem:[%s1538_s0 + $0x278] sm:$0xff] }
   0xa   :  { %v87_v24 = vld [vmem:[%s1538_s0 + $0x240] sm:$0xff]  ;;  %v97_v30 = vld [vmem:[%s1538_s0 + $0x290] sm:$0xff]  ;;  %v108_v31 = vpack.c.bf16 %v18_v23, %v15_v22  ;;  %v112_v33 = vpack.c.bf16 %v25_v28, %v22_v27  ;;  %v24_v37 = vld [vmem:[%s1538_s0 + $0x48] sm:$0xff] }
   0xb   :  { %784 = vmatpush3.bf16.msra.mxu0 %v966_v5  ;;  %955 = vmatpush3.bf16.msra.mxu1 %v966_v5  ;;  %v144_v32 = vpack.c.bf16 %v90_v25, %v87_v24  ;;  %v148_v34 = vpack.c.bf16 %v97_v30, %v94_v29  ;;  %v978_v35 = vld [vmem:[%s1537_s1 + $0x80] sm:$0xff]   ;;  %v21_v36 = vld [vmem:[%s1538_s0 + $0x30] sm:$0xff]  ;;  %v96_v39 = vld [vmem:[%s1538_s0 + $0x288] sm:$0xff] }
   0xc   :  { %785 = vmatprep.subr.bf16.mxu0 %v967_v6  ;;  %948 = vmatprep.subr.bf16.mxu1 %v967_v6  ;;  %v93_v38 = vld [vmem:[%s1538_s0 + $0x270] sm:$0xff]  ;;  %v28_v40 = vld [vmem:[%s1538_s0 + $0x68] sm:$0xff]  ;;  %v31_v41 = vld [vmem:[%s1538_s0 + $0x80] sm:$0xff]  ;;  %v111_v44 = vpack.c.bf16 %v24_v37, %v21_v36 }
   0xd   :  { %v100_v42 = vld [vmem:[%s1538_s0 + $0x2a8] sm:$0xff]  ;;  %v103_v43 = vld [vmem:[%s1538_s0 + $0x2c0] sm:$0xff]  ;;  %v147_v45 = vpack.c.bf16 %v96_v39, %v93_v38  ;;  %v115_v46 = vpack.c.bf16 %v31_v41, %v28_v40  ;;  %v30_v49 = vld [vmem:[%s1538_s0 + $0x78] sm:$0xff] }
   0xe   :  { %v151_v47 = vpack.c.bf16 %v103_v43, %v100_v42  ;;  %v27_v48 = vld [vmem:[%s1538_s0 + $0x60] sm:$0xff]  ;;  %v102_v51 = vld [vmem:[%s1538_s0 + $0x2b8] sm:$0xff]  ;;  %v37_v53 = vld [vmem:[%s1538_s0 + $0xb0] sm:$0xff] }
   0xf   :  { %786 = vmatpush3.bf16.msra.mxu0 %v968_v7  ;;  %956 = vmatpush3.bf16.msra.mxu1 %v968_v7  ;;  %v99_v50 = vld [vmem:[%s1538_s0 + $0x2a0] sm:$0xff]  ;;  %v34_v52 = vld [vmem:[%s1538_s0 + $0x98] sm:$0xff]  ;;  %v114_v55 = vpack.c.bf16 %v30_v49, %v27_v48  ;;  %v33_v59 = vld [vmem:[%s1538_s0 + $0x90] sm:$0xff] }
  0x10   :  { %787 = vmatprep.subr.bf16.mxu0 %v969_v8  ;;  %949 = vmatprep.subr.bf16.mxu1 %v969_v8  ;;  %v106_v54 = vld [vmem:[%s1538_s0 + $0x2d8] sm:$0x3]  ;;  %v150_v56 = vpack.c.bf16 %v102_v51, %v99_v50  ;;  %v118_v57 = vpack.c.bf16 %v37_v53, %v34_v52  ;;  %v36_v60 = vld [vmem:[%s1538_s0 + $0xa8] sm:$0xff]  ;;  %v105_v61 = vld [vmem:[%s1538_s0 + $0x2d0] sm:$0x3] }
  0x11   :  { %v154_v58 = vpack.c.bf16 %v106_v54, %v106_v54  ;;  %v40_v62 = vld [vmem:[%s1538_s0 + $0xc8] sm:$0xff]  ;;  %v43_v63 = vld [vmem:[%s1538_s0 + $0xe0] sm:$0xff]  ;;  %v17_v0 = vld [vmem:[%s1538_s0 + $0x10] sm:$0xff]  ;;  %v117_v2 = vpack.c.bf16 %v36_v60, %v33_v59  ;;  %v153_v3 = vpack.c.bf16 %v105_v61, %v105_v61 }
  0x12   :  { %v20_v1 = vld [vmem:[%s1538_s0 + $0x28] sm:$0xff]  ;;  %v121_v4 = vpack.c.bf16 %v43_v63, %v40_v62  ;;  %v39_v6 = vld [vmem:[%s1538_s0 + $0xc0] sm:$0xff]  ;;  %v42_v7 = vld [vmem:[%s1538_s0 + $0xd8] sm:$0xff] }
  0x13   :  { %788 = vmatpush3.bf16.msra.mxu0 %v970_v9  ;;  %957 = vmatpush3.bf16.msra.mxu1 %v970_v9  ;;  %v110_v5 = vpack.c.bf16 %v20_v1, %v17_v0  ;;  %v23_v8 = vld [vmem:[%s1538_s0 + $0x40] sm:$0xff]  ;;  %v26_v9 = vld [vmem:[%s1538_s0 + $0x58] sm:$0xff]  ;;  %v49_v11 = vld [vmem:[%s1538_s0 + $0x110] sm:$0xff]  ;;  %v120_v14 = vpack.c.bf16 %v42_v7, %v39_v6 }
  0x14   :  { %789 = vmatprep.subr.bf16.mxu0 %v971_v10  ;;  %950 = vmatprep.subr.bf16.mxu1 %v971_v10  ;;  %v46_v10 = vld [vmem:[%s1538_s0 + $0xf8] sm:$0xff]  ;;  %v29_v12 = vld [vmem:[%s1538_s0 + $0x70] sm:$0xff]  ;;  %v32_v13 = vld [vmem:[%s1538_s0 + $0x88] sm:$0xff]  ;;  %v113_v15 = vpack.c.bf16 %v26_v9, %v23_v8 }
  0x15   :  { %v124_v16 = vpack.c.bf16 %v49_v11, %v46_v10  ;;  %v52_v22 = vld [vmem:[%s1538_s0 + $0x128] sm:$0xff]  ;;  %v55_v23 = vld [vmem:[%s1538_s0 + $0x140] sm:$0xff]  ;;  %v41_v24 = vld [vmem:[%s1538_s0 + $0xd0] sm:$0xff] }
  0x16   :  { %v44_v25 = vld [vmem:[%s1538_s0 + $0xe8] sm:$0xff]  ;;  %v127_v28 = vpack.c.bf16 %v55_v23, %v52_v22  ;;  %v51_v30 = vld [vmem:[%s1538_s0 + $0x120] sm:$0xff]  ;;  %v53_v36 = vld [vmem:[%s1538_s0 + $0x130] sm:$0xff] }
  0x17   :  { %790 = vmatpush3.bf16.msra.mxu0 %v972_v17  ;;  %958 = vmatpush3.bf16.msra.mxu1 %v972_v17  ;;  %v116_v17 = vpack.c.bf16 %v32_v13, %v29_v12  ;;  %v122_v29 = vpack.c.bf16 %v44_v25, %v41_v24  ;;  %v56_v37 = vld [vmem:[%s1538_s0 + $0x148] sm:$0xff]  ;;  %v57_v42 = vld [vmem:[%s1538_s0 + $0x150] sm:$0xff]  ;;  %v63_v54 = vld [vmem:[%s1538_s0 + $0x180] sm:$0xff] }
  0x18   :  { %791 = vmatprep.subr.bf16.mxu0 %v973_v18  ;;  %951 = vmatprep.subr.bf16.mxu1 %v973_v18  ;;  %v45_v18 = vld [vmem:[%s1538_s0 + $0xf0] sm:$0xff]  ;;  %v128_v41 = vpack.c.bf16 %v56_v37, %v53_v36  ;;  %v60_v43 = vld [vmem:[%s1538_s0 + $0x168] sm:$0xff]  ;;  %v79_v7 = vld [vmem:[%s1538_s0 + $0x200] sm:$0xff] }
  0x19   :  { %v65_v48 = vld [vmem:[%s1538_s0 + $0x190] sm:$0xff]  ;;  %v68_v49 = vld [vmem:[%s1538_s0 + $0x1a8] sm:$0xff]  ;;  %v129_v50 = vpack.c.bf16 %v60_v43, %v57_v42 }
  0x1a   :  { %v134_v53 = vpack.c.bf16 %v68_v49, %v65_v48  ;;  %v73_v59 = vld [vmem:[%s1538_s0 + $0x1d0] sm:$0xff]  ;;  %v80_v61 = vld [vmem:[%s1538_s0 + $0x208] sm:$0xff] }
  0x1b   :  { %792 = vmatpush3.bf16.msra.mxu0 %v974_v19  ;;  %959 = vmatpush3.bf16.msra.mxu1 %v974_v19  ;;  %v48_v19 = vld [vmem:[%s1538_s0 + $0x108] sm:$0xff]  ;;  %v77_v60 = vld [vmem:[%s1538_s0 + $0x1f0] sm:$0xff] }
  0x1c   :  { %793 = vmatprep.subr.bf16.mxu0 %v975_v20  ;;  %952 = vmatprep.subr.bf16.mxu1 %v975_v20  ;;  %v35_v20 = vld [vmem:[%s1538_s0 + $0xa0] sm:$0xff]  ;;  %v140_v1 = vpack.c.bf16 %v80_v61, %v77_v60  ;;  %v76_v6 = vld [vmem:[%s1538_s0 + $0x1e8] sm:$0xff]  ;;  %v89_v8 = vld [vmem:[%s1538_s0 + $0x250] sm:$0xff] }
  0x1d   :  { %v92_v9 = vld [vmem:[%s1538_s0 + $0x268] sm:$0xff]  ;;  %v139_v12 = vpack.c.bf16 %v79_v7, %v76_v6  ;;  %v1367_v7 = vld [vmem:[%s1539_s2] ss:$0 sm:$0xff] }
  0x1e   :  { %v146_v13 = vpack.c.bf16 %v92_v9, %v89_v8 }
  0x1f   :  { %794 = vmatpush3.bf16.msra.mxu0 %v976_v21  ;;  %960 = vmatpush3.bf16.msra.mxu1 %v976_v21  ;;  %v38_v21 = vld [vmem:[%s1538_s0 + $0xb8] sm:$0xff] }
  0x20   :  { %909 = vmatprep.subr.bf16.mxu1 %v977_v26  ;;  %v119_v27 = vpack.c.bf16 %v38_v21, %v35_v20  ;;  %v101_v20 = vld [vmem:[%s1538_s0 + $0x2b0] sm:$0xff]  ;;  %v104_v21 = vld [vmem:[%s1538_s0 + $0x2c8] sm:$0xff] }
  0x21   :  { %v152_v25 = vpack.c.bf16 %v104_v21, %v101_v20 }
  0x22   :  { %389 = vmatmul.mubr.bf16.vlgmr.msra.gmra.mxu0 %v108_v31  ;;  %485 = vmatmul.mubr.bf16.vlgmr.msra.gmra.mxu1 %v144_v32  ;;  %v54_v31 = vld [vmem:[%s1538_s0 + $0x138] sm:$0xff]  ;;  %v47_v32 = vld [vmem:[%s1538_s0 + $0x100] sm:$0xff] }
  0x23   :  { %910 = vmatpush3.bf16.msra.mxu1 %v977_v26  ;;  %396 = vmatprep.mubr.bf16.mxu0 %v112_v33  ;;  %v123_v26 = vpack.c.bf16 %v48_v19, %v45_v18  ;;  %v50_v33 = vld [vmem:[%s1538_s0 + $0x118] sm:$0xff]  ;;  %v126_v38 = vpack.c.bf16 %v54_v31, %v51_v30  ;;  %v85_v19 = vld [vmem:[%s1538_s0 + $0x230] sm:$0xff] }
  0x24   :  { %492 = vmatprep.mubr.bf16.mxu1 %v148_v34  ;;  %911 = vmatprep.subr.bf16.mxu1 %v978_v35  ;;  %v58_v34 = vld [vmem:[%s1538_s0 + $0x158] sm:$0xff]  ;;  %v125_v39 = vpack.c.bf16 %v50_v33, %v47_v32 }
  0x25   :  { %v82_v18 = vld [vmem:[%s1538_s0 + $0x218] sm:$0xff] }
  0x26   :  { %v142_v24 = vpack.c.bf16 %v85_v19, %v82_v18 }
  0x27   :  { %912 = vmatpush3.bf16.msra.mxu1 %v978_v35  ;;  %v61_v35 = vld [vmem:[%s1538_s0 + $0x170] sm:$0xff] }
  0x28   :  { %v130_v40 = vpack.c.bf16 %v61_v35, %v58_v34 }
  0x2a   :  { %397 = vmatmul.mubr.bf16.gmra.mxu0 %v111_v44  ;;  %493 = vmatmul.mubr.bf16.gmra.mxu1 %v147_v45  ;;  %v59_v44 = vld [vmem:[%s1538_s0 + $0x160] sm:$0xff]  ;;  %v62_v45 = vld [vmem:[%s1538_s0 + $0x178] sm:$0xff] }
  0x2b   :  { %404 = vmatprep.mubr.bf16.mxu0 %v115_v46  ;;  %500 = vmatprep.mubr.bf16.mxu1 %v151_v47  ;;  %v64_v46 = vld [vmem:[%s1538_s0 + $0x188] sm:$0xff]  ;;  %v67_v47 = vld [vmem:[%s1538_s0 + $0x1a0] sm:$0xff]  ;;  %v131_v51 = vpack.c.bf16 %v62_v45, %v59_v44 }
  0x2c   :  { %v133_v52 = vpack.c.bf16 %v67_v47, %v64_v46 }
  0x32   :  { %405 = vmatmul.mubr.bf16.gmra.mxu0 %v114_v55  ;;  %501 = vmatmul.mubr.bf16.gmra.mxu1 %v150_v56  ;;  %v66_v55 = vld [vmem:[%s1538_s0 + $0x198] sm:$0xff]  ;;  %v71_v56 = vld [vmem:[%s1538_s0 + $0x1c0] sm:$0xff] }
  0x33   :  { %412 = vmatprep.mubr.bf16.mxu0 %v118_v57  ;;  %508 = vmatprep.mubr.bf16.mxu1 %v154_v58  ;;  %v74_v57 = vld [vmem:[%s1538_s0 + $0x1d8] sm:$0xff]  ;;  %v132_v62 = vpack.c.bf16 %v66_v55, %v63_v54 }
  0x34   :  { %v70_v58 = vld [vmem:[%s1538_s0 + $0x1b8] sm:$0xff]  ;;  %v137_v63 = vpack.c.bf16 %v74_v57, %v71_v56 }
  0x35   :  { %v136_v0 = vpack.c.bf16 %v73_v59, %v70_v58 }
  0x3a   :  { %413 = vmatmul.mubr.bf16.gmra.mxu0 %v117_v2  ;;  %509 = vmatmul.mubr.bf16.gmra.mxu1 %v153_v3  ;;  %v69_v2 = vld [vmem:[%s1538_s0 + $0x1b0] sm:$0xff]  ;;  %v72_v3 = vld [vmem:[%s1538_s0 + $0x1c8] sm:$0xff] }
  0x3b   :  { %420 = vmatprep.mubr.bf16.mxu0 %v121_v4  ;;  %913 = vmatprep.mubr.msk.bf16.mxu1 %vm307_vm0, %v110_v5  ;;  %v83_v4 = vld [vmem:[%s1538_s0 + $0x220] sm:$0xff]  ;;  %v86_v5 = vld [vmem:[%s1538_s0 + $0x238] sm:$0xff]  ;;  %v135_v10 = vpack.c.bf16 %v72_v3, %v69_v2 }
  0x3c   :  { %v143_v11 = vpack.c.bf16 %v86_v5, %v83_v4 }
  0x42   :  { %421 = vmatmul.mubr.bf16.gmra.mxu0 %v120_v14  ;;  %914 = vmatmul.mubr.msk.bf16.vlgmr.msra.gmra.mxu1 %vm307_vm0, %v113_v15  ;;  %v75_v14 = vld [vmem:[%s1538_s0 + $0x1e0] sm:$0xff]  ;;  %v78_v15 = vld [vmem:[%s1538_s0 + $0x1f8] sm:$0xff] }
  0x43   :  { %428 = vmatprep.mubr.bf16.mxu0 %v124_v16  ;;  %917 = vmatprep.mubr.msk.bf16.mxu1 %vm307_vm0, %v116_v17  ;;  %v95_v16 = vld [vmem:[%s1538_s0 + $0x280] sm:$0xff]  ;;  %v98_v17 = vld [vmem:[%s1538_s0 + $0x298] sm:$0xff]  ;;  %v138_v22 = vpack.c.bf16 %v78_v15, %v75_v14 }
  0x44   :  { %v149_v23 = vpack.c.bf16 %v98_v17, %v95_v16 }
  0x4a   :  { %429 = vmatmul.mubr.bf16.gmra.mxu0 %v123_v26  ;;  %918 = vmatmul.mubr.msk.bf16.gmra.mxu1 %vm307_vm0, %v119_v27  ;;  %v81_v26 = vld [vmem:[%s1538_s0 + $0x210] sm:$0xff]  ;;  %v84_v27 = vld [vmem:[%s1538_s0 + $0x228] sm:$0xff] }
  0x4b   :  { %436 = vmatprep.mubr.bf16.mxu0 %v127_v28  ;;  %921 = vmatprep.mubr.msk.bf16.mxu1 %vm307_vm0, %v122_v29  ;;  %v107_v28 = vld [vmem:[%s1538_s0 + $0x2e0] sm:$0x3]  ;;  %v141_v29 = vpack.c.bf16 %v84_v27, %v81_v26 }
  0x4c   :  { %v155_v30 = vpack.c.bf16 %v107_v28, %v107_v28 }
  0x52   :  { %437 = vmatmul.mubr.bf16.gmra.mxu0 %v126_v38  ;;  %922 = vmatmul.mubr.msk.bf16.gmra.mxu1 %vm307_vm0, %v125_v39 }
  0x53   :  { %444 = vmatprep.mubr.bf16.mxu0 %v130_v40  ;;  %925 = vmatprep.mubr.msk.bf16.mxu1 %vm307_vm0, %v128_v41 }
  0x5a   :  { %445 = vmatmul.mubr.bf16.gmra.mxu0 %v129_v50  ;;  %926 = vmatmul.mubr.msk.bf16.gmra.mxu1 %vm307_vm0, %v131_v51 }
  0x5b   :  { %452 = vmatprep.mubr.bf16.mxu0 %v133_v52  ;;  %929 = vmatprep.mubr.msk.bf16.mxu1 %vm307_vm0, %v134_v53 }
  0x62   :  { %453 = vmatmul.mubr.bf16.gmra.mxu0 %v132_v62  ;;  %930 = vmatmul.mubr.msk.bf16.gmra.mxu1 %vm307_vm0, %v137_v63 }
  0x63   :  { %460 = vmatprep.mubr.bf16.mxu0 %v136_v0  ;;  %933 = vmatprep.mubr.msk.bf16.mxu1 %vm307_vm0, %v140_v1 }
  0x6a   :  { %461 = vmatmul.mubr.bf16.gmra.mxu0 %v135_v10  ;;  %934 = vmatmul.mubr.msk.bf16.gmra.mxu1 %vm307_vm0, %v143_v11 }
  0x6b   :  { %468 = vmatprep.mubr.bf16.mxu0 %v139_v12  ;;  %937 = vmatprep.mubr.msk.bf16.mxu1 %vm307_vm0, %v146_v13 }
  0x72   :  { %469 = vmatmul.mubr.bf16.gmra.mxu0 %v138_v22  ;;  %938 = vmatmul.mubr.msk.bf16.gmra.mxu1 %vm307_vm0, %v149_v23 }
  0x73   :  { %476 = vmatprep.mubr.bf16.mxu0 %v142_v24  ;;  %941 = vmatprep.mubr.msk.bf16.mxu1 %vm307_vm0, %v152_v25 }
  0x7a   :  { %477 = vmatmul.mubr.bf16.gmra.mxu0 %v141_v29  ;;  %942 = vmatmul.mubr.msk.bf16.gmra.mxu1 %vm307_vm0, %v155_v30 }
  0xe2   :  { %v795_v31 = vpop.f32.mrf.mxu0  ;;  %v867_v32 = vpop.f32.mrf.mxu1 }
  0xe4   :  { %v796_v33 = vpop.f32.mrf.mxu0  ;;  %v868_v34 = vpop.f32.mrf.mxu1 }
  0xe5   :  { %v1348_v35 = vadd.f32 %v868_v34, %v867_v32  ;;  %v797_v4 = vadd.f32 %v796_v33, %v795_v31 }
  0xe6   :  { %v798_v36 = vpop.f32.mrf.mxu0  ;;  %v870_v37 = vpop.f32.mrf.mxu1 }
  0xe7   :  { %v391_v14 = vadd.f32 %v797_v4, %v1367_v7 }
  0xe8   :  { %v799_v38 = vpop.f32.mrf.mxu0  ;;  %v871_v39 = vpop.f32.mrf.mxu1 }
  0xe9   :  { %v1350_v40 = vadd.f32 %v871_v39, %v870_v37  ;;  %v800_v12 = vadd.f32 %v799_v38, %v798_v36 }
  0xea   :  { %v801_v41 = vpop.f32.mrf.mxu0  ;;  %v873_v42 = vpop.f32.mrf.mxu1 }
  0xeb   :  { %v394_v26 = vadd.f32 %v800_v12, %v1367_v7 }
  0xec   :  { %v802_v43 = vpop.f32.mrf.mxu0  ;;  %v874_v44 = vpop.f32.mrf.mxu1 }
  0xed   :  { %v1352_v45 = vadd.f32 %v874_v44, %v873_v42  ;;  %v803_v1 = vadd.f32 %v802_v43, %v801_v41 }
  0xee   :  { %v804_v46 = vpop.f32.mrf.mxu0  ;;  %v876_v47 = vpop.f32.mrf.mxu1 }
  0xef   :  { %v399_v9 = vadd.f32 %v803_v1, %v1367_v7 }
  0xf0   :  { %v805_v48 = vpop.f32.mrf.mxu0  ;;  %v877_v49 = vpop.f32.mrf.mxu1 }
  0xf1   :  { %v1354_v50 = vadd.f32 %v877_v49, %v876_v47  ;;  %v806_v8 = vadd.f32 %v805_v48, %v804_v46 }
  0xf2   :  { %v807_v51 = vpop.f32.mrf.mxu0  ;;  %v879_v52 = vpop.f32.mrf.mxu1 }
  0xf3   :  { %v402_v20 = vadd.f32 %v806_v8, %v1367_v7 }
  0xf4   :  { %v808_v53 = vpop.f32.mrf.mxu0  ;;  %v880_v54 = vpop.f32.mrf.mxu1 }
  0xf5   :  { %v1356_v55 = vadd.f32 %v880_v54, %v879_v52  ;;  %v809_v23 = vadd.f32 %v808_v53, %v807_v51 }
  0xf6   :  { %v810_v56 = vpop.f32.mrf.mxu0  ;;  %v882_v57 = vpop.f32.mrf.mxu1 }
  0xf7   :  { %v407_v39 = vadd.f32 %v809_v23, %v1367_v7 }
  0xf8   :  { %v811_v58 = vpop.f32.mrf.mxu0  ;;  %v883_v59 = vpop.f32.mrf.mxu1 }
  0xf9   :  { %v1358_v60 = vadd.f32 %v883_v59, %v882_v57  ;;  %v812_v36 = vadd.f32 %v811_v58, %v810_v56 }
  0xfa   :  { %v813_v61 = vpop.f32.mrf.mxu0  ;;  %v1360_v62 = vpop.f32.mrf.mxu1 }
  0xfb   :  { %v410_v54 = vadd.f32 %v812_v36, %v1367_v7 }
  0xfc   :  { %v814_v63 = vpop.f32.mrf.mxu0  ;;  %v1362_v0 = vpop.f32.mrf.mxu1 }
  0xfd   :  { %v815_v17 = vadd.f32 %v814_v63, %v813_v61 }
  0xfe   :  { %v816_v2 = vpop.f32.mrf.mxu0  ;;  %v888_v3 = vpop.f32.mrf.mxu1 }
  0xff   :  { %v415_v32 = vadd.f32 %v815_v17, %v1367_v7 }
 0x100   :  { %v817_v5 = vpop.f32.mrf.mxu0  ;;  %v889_v6 = vpop.f32.mrf.mxu1 }
 0x101   :  { %v818_v29 = vadd.f32 %v817_v5, %v816_v2 }
 0x102   :  { %v819_v10 = vpop.f32.mrf.mxu0  ;;  %v915_v11 = vpop.f32.mrf.mxu1 }
 0x103   :  { %v559_v13 = vadd.f32 %v915_v11, %v399_v9  ;;  %v418_v47 = vadd.f32 %v818_v29, %v1367_v7 }
 0x104   :  { %v820_v15 = vpop.f32.mrf.mxu0  ;;  %v550_v16 = vpop.f32.mrf.mxu1 }
 0x105   :  { %v678_v18 = vmax.f32 %v559_v13, 0.0  ;;  %v551_v19 = vadd.f32 %v550_v16, %v391_v14  ;;  %v821_v51 = vadd.f32 %v820_v15, %v819_v10 }
 0x106   :  { %v822_v21 = vpop.f32.mrf.mxu0  ;;  %v916_v22 = vpop.f32.mrf.mxu1 }
 0x107   :  { %710 = vst.msk [vmem:[%s1540_s3 + $0x10] sm:$0xff] %vm707_vm1, %v678_v18  ;;  %v676_v24 = vmax.f32 %v551_v19, 0.0  ;;  %v562_v25 = vadd.f32 %v916_v22, %v402_v20  ;;  %v423_v6 = vadd.f32 %v821_v51, %v1367_v7 }
 0x108   :  { %v823_v27 = vpop.f32.mrf.mxu0  ;;  %v553_v28 = vpop.f32.mrf.mxu1 }
 0x109   :  { %708 = vst.msk [vmem:[%s1540_s3] sm:$0xff] %vm707_vm1, %v676_v24  ;;  %v679_v30 = vmax.f32 %v562_v25, 0.0  ;;  %v554_v31 = vadd.f32 %v553_v28, %v394_v26  ;;  %v824_v3 = vadd.f32 %v823_v27, %v822_v21 }
 0x10a   :  { %v825_v33 = vpop.f32.mrf.mxu0  ;;  %v919_v34 = vpop.f32.mrf.mxu1 }
 0x10b   :  { %711 = vst.msk [vmem:[%s1540_s3 + $0x18] sm:$0xff] %vm707_vm1, %v679_v30  ;;  %v677_v37 = vmax.f32 %v554_v31, 0.0  ;;  %v575_v38 = vadd.f32 %v919_v34, %v415_v32  ;;  %v426_v18 = vadd.f32 %v824_v3, %v1367_v7 }
 0x10c   :  { %v826_v41 = vpop.f32.mrf.mxu0  ;;  %v566_v42 = vpop.f32.mrf.mxu1 }
 0x10d   :  { %709 = vst.msk [vmem:[%s1540_s3 + $0x8] sm:$0xff] %vm707_vm1, %v677_v37  ;;  %v682_v43 = vmax.f32 %v575_v38, 0.0  ;;  %v827_v44 = vadd.f32 %v826_v41, %v825_v33  ;;  %v567_v46 = vadd.f32 %v566_v42, %v407_v39 }
 0x10e   :  { %v828_v48 = vpop.f32.mrf.mxu0  ;;  %v920_v49 = vpop.f32.mrf.mxu1 }
 0x10f   :  { %714 = vst.msk [vmem:[%s1540_s3 + $0x30] sm:$0xff] %vm707_vm1, %v682_v43  ;;  %v680_v52 = vmax.f32 %v567_v46, 0.0  ;;  %v578_v53 = vadd.f32 %v920_v49, %v418_v47  ;;  %v431_v63 = vadd.f32 %v827_v44, %v1367_v7 }
 0x110   :  { %v829_v56 = vpop.f32.mrf.mxu0  ;;  %v569_v57 = vpop.f32.mrf.mxu1 }
 0x111   :  { %712 = vst.msk [vmem:[%s1540_s3 + $0x20] sm:$0xff] %vm707_vm1, %v680_v52  ;;  %v683_v58 = vmax.f32 %v578_v53, 0.0  ;;  %v830_v59 = vadd.f32 %v829_v56, %v828_v48  ;;  %v570_v61 = vadd.f32 %v569_v57, %v410_v54 }
 0x112   :  { %v831_v1 = vpop.f32.mrf.mxu0  ;;  %v923_v2 = vpop.f32.mrf.mxu1 }
 0x113   :  { %715 = vst.msk [vmem:[%s1540_s3 + $0x38] sm:$0xff] %vm707_vm1, %v683_v58  ;;  %v681_v4 = vmax.f32 %v570_v61, 0.0  ;;  %v591_v5 = vadd.f32 %v923_v2, %v431_v63  ;;  %v434_v12 = vadd.f32 %v830_v59, %v1367_v7 }
 0x114   :  { %v832_v8 = vpop.f32.mrf.mxu0  ;;  %v582_v9 = vpop.f32.mrf.mxu1 }
 0x115   :  { %713 = vst.msk [vmem:[%s1540_s3 + $0x28] sm:$0xff] %vm707_vm1, %v681_v4  ;;  %v686_v10 = vmax.f32 %v591_v5, 0.0  ;;  %v583_v11 = vadd.f32 %v582_v9, %v423_v6  ;;  %v833_v15 = vadd.f32 %v832_v8, %v831_v1 }
 0x116   :  { %v834_v13 = vpop.f32.mrf.mxu0  ;;  %v924_v14 = vpop.f32.mrf.mxu1 }
 0x117   :  { %718 = vst.msk [vmem:[%s1540_s3 + $0x50] sm:$0xff] %vm707_vm1, %v686_v10  ;;  %v684_v16 = vmax.f32 %v583_v11, 0.0  ;;  %v594_v17 = vadd.f32 %v924_v14, %v434_v12  ;;  %v439_v27 = vadd.f32 %v833_v15, %v1367_v7 }
 0x118   :  { %v835_v19 = vpop.f32.mrf.mxu0  ;;  %v585_v20 = vpop.f32.mrf.mxu1 }
 0x119   :  { %716 = vst.msk [vmem:[%s1540_s3 + $0x40] sm:$0xff] %vm707_vm1, %v684_v16  ;;  %v687_v21 = vmax.f32 %v594_v17, 0.0  ;;  %v586_v22 = vadd.f32 %v585_v20, %v426_v18  ;;  %v836_v25 = vadd.f32 %v835_v19, %v834_v13  ;;  %v495_v20 = vadd.f32 %v1352_v45, %v1367_v7 }
 0x11a   :  { %v837_v23 = vpop.f32.mrf.mxu0  ;;  %v927_v24 = vpop.f32.mrf.mxu1 }
 0x11b   :  { %719 = vst.msk [vmem:[%s1540_s3 + $0x58] sm:$0xff] %vm707_vm1, %v687_v21  ;;  %v685_v26 = vmax.f32 %v586_v22, 0.0  ;;  %v442_v37 = vadd.f32 %v836_v25, %v1367_v7 }
 0x11c   :  { %v838_v28 = vpop.f32.mrf.mxu0  ;;  %v598_v29 = vpop.f32.mrf.mxu1 }
 0x11d   :  { %717 = vst.msk [vmem:[%s1540_s3 + $0x48] sm:$0xff] %vm707_vm1, %v685_v26  ;;  %v839_v30 = vadd.f32 %v838_v28, %v837_v23  ;;  %v599_v31 = vadd.f32 %v598_v29, %v439_v27  ;;  %v487_v26 = vadd.f32 %v1348_v35, %v1367_v7  ;;  %v887_v27 = vadd.f32 %v1362_v0, %v1360_v62 }
 0x11e   :  { %v840_v32 = vpop.f32.mrf.mxu0  ;;  %v928_v33 = vpop.f32.mrf.mxu1  ;;  %v490_v35 = vadd.f32 %v1350_v40, %v1367_v7 }
 0x11f   :  { %v447_v34 = vadd.f32 %v839_v30, %v1367_v7  ;;  %v688_v36 = vmax.f32 %v599_v31, 0.0  ;;  %v498_v30 = vadd.f32 %v1354_v50, %v1367_v7 }
 0x120   :  { %v841_v38 = vpop.f32.mrf.mxu0  ;;  %v601_v39 = vpop.f32.mrf.mxu1 }
 0x121   :  { %v607_v41 = vadd.f32 %v927_v24, %v447_v34  ;;  %720 = vst.msk [vmem:[%s1540_s3 + $0x60] sm:$0xff] %vm707_vm1, %v688_v36  ;;  %v842_v42 = vadd.f32 %v841_v38, %v840_v32  ;;  %v602_v43 = vadd.f32 %v601_v39, %v442_v37 }
 0x122   :  { %v843_v44 = vpop.f32.mrf.mxu0  ;;  %v931_v46 = vpop.f32.mrf.mxu1 }
 0x123   :  { %v690_v47 = vmax.f32 %v607_v41, 0.0  ;;  %v450_v48 = vadd.f32 %v842_v42, %v1367_v7  ;;  %v689_v49 = vmax.f32 %v602_v43, 0.0  ;;  %v511_v41 = vadd.f32 %v887_v27, %v1367_v7 }
 0x124   :  { %v844_v51 = vpop.f32.mrf.mxu0  ;;  %v614_v52 = vpop.f32.mrf.mxu1 }
 0x125   :  { %722 = vst.msk [vmem:[%s1540_s3 + $0x70] sm:$0xff] %vm707_vm1, %v690_v47  ;;  %v610_v53 = vadd.f32 %v928_v33, %v450_v48  ;;  %721 = vst.msk [vmem:[%s1540_s3 + $0x68] sm:$0xff] %vm707_vm1, %v689_v49  ;;  %v845_v54 = vadd.f32 %v844_v51, %v843_v44  ;;  %v503_v48 = vadd.f32 %v1356_v55, %v1367_v7 }
 0x126   :  { %v846_v56 = vpop.f32.mrf.mxu0  ;;  %v932_v57 = vpop.f32.mrf.mxu1 }
 0x127   :  { %v691_v58 = vmax.f32 %v610_v53, 0.0  ;;  %v455_v59 = vadd.f32 %v845_v54, %v1367_v7 }
 0x128   :  { %v847_v61 = vpop.f32.mrf.mxu0  ;;  %v617_v63 = vpop.f32.mrf.mxu1 }
 0x129   :  { %723 = vst.msk [vmem:[%s1540_s3 + $0x78] sm:$0xff] %vm707_vm1, %v691_v58  ;;  %v615_v1 = vadd.f32 %v614_v52, %v455_v59  ;;  %v848_v2 = vadd.f32 %v847_v61, %v846_v56 }
 0x12a   :  { %v849_v3 = vpop.f32.mrf.mxu0  ;;  %v1450_v4 = vpop.f32.mrf.mxu1 }
 0x12b   :  { %v692_v5 = vmax.f32 %v615_v1, 0.0  ;;  %v458_v6 = vadd.f32 %v848_v2, %v1367_v7 }
 0x12c   :  { %v850_v8 = vpop.f32.mrf.mxu0  ;;  %v630_v9 = vpop.f32.mrf.mxu1 }
 0x12d   :  { %724 = vst.msk [vmem:[%s1540_s3 + $0x80] sm:$0xff] %vm707_vm1, %v692_v5  ;;  %v618_v10 = vadd.f32 %v617_v63, %v458_v6  ;;  %v851_v11 = vadd.f32 %v850_v8, %v849_v3  ;;  %v506_v5 = vadd.f32 %v1358_v60, %v1367_v7 }
 0x12e   :  { %v852_v12 = vpop.f32.mrf.mxu0  ;;  %v1457_v13 = vpop.f32.mrf.mxu1 }
 0x12f   :  { %v693_v14 = vmax.f32 %v618_v10, 0.0  ;;  %v463_v15 = vadd.f32 %v851_v11, %v1367_v7 }
 0x130   :  { %v853_v16 = vpop.f32.mrf.mxu0  ;;  %v633_v17 = vpop.f32.mrf.mxu1 }
 0x131   :  { %725 = vst.msk [vmem:[%s1540_s3 + $0x88] sm:$0xff] %vm707_vm1, %v693_v14  ;;  %v623_v18 = vadd.f32 %v931_v46, %v463_v15  ;;  %v854_v19 = vadd.f32 %v853_v16, %v852_v12 }
 0x132   :  { %v855_v21 = vpop.f32.mrf.mxu0  ;;  %v939_v22 = vpop.f32.mrf.mxu1 }
 0x133   :  { %v694_v23 = vmax.f32 %v623_v18, 0.0  ;;  %v466_v24 = vadd.f32 %v854_v19, %v1367_v7  ;;  %v655_v25 = vadd.f32 %v939_v22, %v495_v20 }
 0x134   :  { %v856_v28 = vpop.f32.mrf.mxu0  ;;  %v646_v29 = vpop.f32.mrf.mxu1 }
 0x135   :  { %726 = vst.msk [vmem:[%s1540_s3 + $0x90] sm:$0xff] %vm707_vm1, %v694_v23  ;;  %v626_v45 = vadd.f32 %v932_v57, %v466_v24  ;;  %v702_v31 = vmax.f32 %v655_v25, 0.0  ;;  %v857_v32 = vadd.f32 %v856_v28, %v855_v21  ;;  %v647_v33 = vadd.f32 %v646_v29, %v487_v26 }
 0x136   :  { %v858_v34 = vpop.f32.mrf.mxu0  ;;  %v940_v36 = vpop.f32.mrf.mxu1 }
 0x137   :  { %v695_v62 = vmax.f32 %v626_v45, 0.0  ;;  %734 = vst.msk [vmem:[%s1540_s3 + $0xd0] sm:$0xff] %vm707_vm1, %v702_v31  ;;  %v471_v50 = vadd.f32 %v857_v32, %v1367_v7  ;;  %v700_v0 = vmax.f32 %v647_v33, 0.0  ;;  %v658_v37 = vadd.f32 %v940_v36, %v498_v30 }
 0x138   :  { %v859_v38 = vpop.f32.mrf.mxu0  ;;  %v649_v39 = vpop.f32.mrf.mxu1 }
 0x139   :  { %727 = vst.msk [vmem:[%s1540_s3 + $0x98] sm:$0xff] %vm707_vm1, %v695_v62  ;;  %v631_v40 = vadd.f32 %v630_v9, %v471_v50  ;;  %732 = vst.msk [vmem:[%s1540_s3 + $0xc0] sm:$0xff] %vm707_vm1, %v700_v0  ;;  %v703_v42 = vmax.f32 %v658_v37, 0.0  ;;  %v860_v43 = vadd.f32 %v859_v38, %v858_v34  ;;  %v650_v44 = vadd.f32 %v649_v39, %v490_v35 }
 0x13a   :  { %v861_v46 = vpop.f32.mrf.mxu0  ;;  %v943_v47 = vpop.f32.mrf.mxu1 }
 0x13b   :  { %v696_v49 = vmax.f32 %v631_v40, 0.0  ;;  %735 = vst.msk [vmem:[%s1540_s3 + $0xd8] sm:$0xff] %vm707_vm1, %v703_v42  ;;  %v474_v51 = vadd.f32 %v860_v43, %v1367_v7  ;;  %v701_v52 = vmax.f32 %v650_v44, 0.0  ;;  %v671_v53 = vadd.f32 %v943_v47, %v511_v41 }
 0x13c   :  { %v862_v54 = vpop.f32.mrf.mxu0  ;;  %v662_v56 = vpop.f32.mrf.mxu1 }
 0x13d   :  { %728 = vst.msk [vmem:[%s1540_s3 + $0xa0] sm:$0xff] %vm707_vm1, %v696_v49  ;;  %v634_v57 = vadd.f32 %v633_v17, %v474_v51  ;;  %733 = vst.msk [vmem:[%s1540_s3 + $0xc8] sm:$0xff] %vm707_vm1, %v701_v52  ;;  %v706_v55 = vmax.f32 %v671_v53, 0.0  ;;  %v863_v58 = vadd.f32 %v862_v54, %v861_v46  ;;  %v663_v59 = vadd.f32 %v662_v56, %v503_v48 }
 0x13e   :  { %v864_v61 = vpop.f32.mrf.mxu0  ;;  %v944_v63 = vpop.f32.mrf.mxu1 }
 0x13f   :  { %v697_v1 = vmax.f32 %v634_v57, 0.0  ;;  %739 = vst.msk [vmem:[%s1540_s3 + $0xf0] sm:$0x3] %vm738_vm2, %v706_v55  ;;  %v479_v2 = vadd.f32 %v863_v58, %v1367_v7  ;;  %v704_v3 = vmax.f32 %v663_v59, 0.0 }
 0x140   :  { %v865_v6 = vpop.f32.mrf.mxu0  ;;  %v665_v8 = vpop.f32.mrf.mxu1 }
 0x141   :  { %729 = vst.msk [vmem:[%s1540_s3 + $0xa8] sm:$0xff] %vm707_vm1, %v697_v1  ;;  %v639_v9 = vadd.f32 %v1450_v4, %v479_v2  ;;  %736 = vst.msk [vmem:[%s1540_s3 + $0xe0] sm:$0xff] %vm707_vm1, %v704_v3  ;;  %v866_v10 = vadd.f32 %v865_v6, %v864_v61  ;;  %v666_v11 = vadd.f32 %v665_v8, %v506_v5 }
 0x143   :  { %v698_v12 = vmax.f32 %v639_v9, 0.0  ;;  %v482_v14 = vadd.f32 %v866_v10, %v1367_v7  ;;  %v705_v60 = vmax.f32 %v666_v11, 0.0 }
 0x145   :  { %730 = vst.msk [vmem:[%s1540_s3 + $0xb0] sm:$0xff] %vm707_vm1, %v698_v12  ;;  %v642_v15 = vadd.f32 %v1457_v13, %v482_v14  ;;  %737 = vst.msk [vmem:[%s1540_s3 + $0xe8] sm:$0xff] %vm707_vm1, %v705_v60 }
 0x147   :  { %v699_v4 = vmax.f32 %v642_v15, 0.0 }
 0x149   :  { %731 = vst.msk [vmem:[%s1540_s3 + $0xb8] sm:$0xff] %vm707_vm1, %v699_v4 }

// kernel: cnn2_forward.10
= control target key start
LH: loop header
LB: loop body
LE: loop exit
PB: predicated region body
PF: predicated region fallthrough
CT: control target
= control target key end

     0   :  { %s193_s10 = smov 64   ;;  %vm35_vm0 = vcmask 520192   ;;  %s348_s0 = inlined_call_operand.vmem [shape: f32[2,10,5,128], index: 0, kind: input, shape index: {}]   ;;  %s349_s1 = inlined_call_operand.vmem [shape: f32[2,5,5,64], index: 1, kind: output, shape index: {}]  }
   0x1   :  { %v166_v0 = vld [vmem:[%s348_s0 + $0x8] sm:$0x1f]  ;;  %v8_v1 = vld [vmem:[%s348_s0] sm:$0x1f]  ;;  %v167_v2 = vld [vmem:[%s348_s0 + $0x58] sm:$0x1f] }
   0x2   :  { %25 = vrot.lane.b32.xlu1 %v166_v0, %s193_s10  ;;  %15 = vrot.lane.b32.xlu0 %v8_v1, %s193_s10  ;;  %v9_v3 = vld [vmem:[%s348_s0 + $0x50] sm:$0x1f]  ;;  %v169_v4 = vld [vmem:[%s348_s0 + $0x60] sm:$0x1f] }
   0x3   :  { %v168_v5 = vld [vmem:[%s348_s0 + $0x10] sm:$0x1f]  ;;  %v171_v6 = vld [vmem:[%s348_s0 + $0x68] sm:$0x1f]  ;;  %v170_v7 = vld [vmem:[%s348_s0 + $0x18] sm:$0x1f] }
   0x4   :  { %v175_v8 = vld [vmem:[%s348_s0 + $0x70] sm:$0x1f]  ;;  %v174_v9 = vld [vmem:[%s348_s0 + $0x20] sm:$0x1f]  ;;  %v177_v10 = vld [vmem:[%s348_s0 + $0x78] sm:$0x1f] }
   0x5   :  { %v176_v11 = vld [vmem:[%s348_s0 + $0x28] sm:$0x1f]  ;;  %v255_v12 = vld [vmem:[%s348_s0 + $0x80] sm:$0x1f]  ;;  %v260_v13 = vld [vmem:[%s348_s0 + $0x30] sm:$0x1f] }
   0x6   :  { %27 = vrot.lane.b32.xlu1 %v167_v2, %s193_s10  ;;  %17 = vrot.lane.b32.xlu0 %v9_v3, %s193_s10  ;;  %v183_v14 = vld [vmem:[%s348_s0 + $0x88] sm:$0x1f]  ;;  %v182_v15 = vld [vmem:[%s348_s0 + $0x38] sm:$0x1f] }
   0x7   :  { %v277_v16 = vld [vmem:[%s348_s0 + $0x90] sm:$0x1f]  ;;  %v282_v17 = vld [vmem:[%s348_s0 + $0x40] sm:$0x1f]  ;;  %v291_v18 = vld [vmem:[%s348_s0 + $0x98] sm:$0x1f] }
   0x8   :  { %v296_v19 = vld [vmem:[%s348_s0 + $0x48] sm:$0x1f] }
   0xa   :  { %48 = vrot.lane.b32.xlu1 %v169_v4, %s193_s10  ;;  %46 = vrot.lane.b32.xlu0 %v168_v5, %s193_s10 }
   0xe   :  { %58 = vrot.lane.b32.xlu1 %v171_v6, %s193_s10  ;;  %56 = vrot.lane.b32.xlu0 %v170_v7, %s193_s10 }
  0x12   :  { %79 = vrot.lane.b32.xlu1 %v175_v8, %s193_s10  ;;  %77 = vrot.lane.b32.xlu0 %v174_v9, %s193_s10 }
  0x16   :  { %89 = vrot.lane.b32.xlu1 %v177_v10, %s193_s10  ;;  %87 = vrot.lane.b32.xlu0 %v176_v11, %s193_s10 }
  0x1a   :  { %110 = vrot.lane.b32.xlu1 %v255_v12, %s193_s10  ;;  %108 = vrot.lane.b32.xlu0 %v260_v13, %s193_s10 }
  0x1e   :  { %120 = vrot.lane.b32.xlu1 %v183_v14, %s193_s10  ;;  %118 = vrot.lane.b32.xlu0 %v182_v15, %s193_s10 }
  0x22   :  { %141 = vrot.lane.b32.xlu1 %v277_v16, %s193_s10  ;;  %139 = vrot.lane.b32.xlu0 %v282_v17, %s193_s10 }
  0x26   :  { %151 = vrot.lane.b32.xlu1 %v291_v18, %s193_s10  ;;  %149 = vrot.lane.b32.xlu0 %v296_v19, %s193_s10 }
  0x74   :  { %v26_v20 = vpop.permute.xlu1 %25  ;;  %v16_v21 = vpop.permute.xlu0 %15 }
  0x75   :  { %v31_v22 = vmax.f32 %v166_v0, %v26_v20  ;;  %v21_v23 = vmax.f32 %v8_v1, %v16_v21 }
  0x77   :  { %v33_v24 = vmax.f32 %v21_v23, %v31_v22 }
  0x78   :  { %v28_v25 = vpop.permute.xlu1 %27  ;;  %v18_v26 = vpop.permute.xlu0 %17 }
  0x79   :  { %36 = vst.msk [vmem:[%s349_s1] sm:$0x1f] %vm35_vm0, %v33_v24  ;;  %v32_v27 = vmax.f32 %v167_v2, %v28_v25  ;;  %v22_v28 = vmax.f32 %v9_v3, %v18_v26 }
  0x7b   :  { %v34_v29 = vmax.f32 %v22_v28, %v32_v27 }
  0x7c   :  { %v49_v30 = vpop.permute.xlu1 %48  ;;  %v47_v31 = vpop.permute.xlu0 %46 }
  0x7d   :  { %37 = vst.msk [vmem:[%s349_s1 + $0x28] sm:$0x1f] %vm35_vm0, %v34_v29  ;;  %v53_v34 = vmax.f32 %v169_v4, %v49_v30  ;;  %v52_v35 = vmax.f32 %v168_v5, %v47_v31 }
  0x80   :  { %v59_v32 = vpop.permute.xlu1 %58  ;;  %v57_v33 = vpop.permute.xlu0 %56 }
  0x81   :  { %v63_v36 = vmax.f32 %v171_v6, %v59_v32  ;;  %v62_v37 = vmax.f32 %v170_v7, %v57_v33 }
  0x83   :  { %v65_v38 = vmax.f32 %v53_v34, %v63_v36  ;;  %v64_v39 = vmax.f32 %v52_v35, %v62_v37 }
  0x84   :  { %v80_v40 = vpop.permute.xlu1 %79  ;;  %v78_v41 = vpop.permute.xlu0 %77 }
  0x85   :  { %173 = vst.msk [vmem:[%s349_s1 + $0x30] sm:$0x1f] %vm35_vm0, %v65_v38  ;;  %172 = vst.msk [vmem:[%s349_s1 + $0x8] sm:$0x1f] %vm35_vm0, %v64_v39  ;;  %v84_v44 = vmax.f32 %v175_v8, %v80_v40  ;;  %v83_v45 = vmax.f32 %v174_v9, %v78_v41 }
  0x88   :  { %v90_v42 = vpop.permute.xlu1 %89  ;;  %v88_v43 = vpop.permute.xlu0 %87 }
  0x89   :  { %v94_v46 = vmax.f32 %v177_v10, %v90_v42  ;;  %v93_v47 = vmax.f32 %v176_v11, %v88_v43 }
  0x8b   :  { %v96_v48 = vmax.f32 %v84_v44, %v94_v46  ;;  %v95_v49 = vmax.f32 %v83_v45, %v93_v47 }
  0x8c   :  { %v111_v50 = vpop.permute.xlu1 %110  ;;  %v109_v51 = vpop.permute.xlu0 %108 }
  0x8d   :  { %179 = vst.msk [vmem:[%s349_s1 + $0x38] sm:$0x1f] %vm35_vm0, %v96_v48  ;;  %178 = vst.msk [vmem:[%s349_s1 + $0x10] sm:$0x1f] %vm35_vm0, %v95_v49  ;;  %v115_v54 = vmax.f32 %v255_v12, %v111_v50  ;;  %v114_v55 = vmax.f32 %v260_v13, %v109_v51 }
  0x90   :  { %v121_v52 = vpop.permute.xlu1 %120  ;;  %v119_v53 = vpop.permute.xlu0 %118 }
  0x91   :  { %v125_v56 = vmax.f32 %v183_v14, %v121_v52  ;;  %v124_v57 = vmax.f32 %v182_v15, %v119_v53 }
  0x93   :  { %v127_v58 = vmax.f32 %v115_v54, %v125_v56  ;;  %v126_v59 = vmax.f32 %v114_v55, %v124_v57 }
  0x94   :  { %v142_v60 = vpop.permute.xlu1 %141  ;;  %v140_v61 = vpop.permute.xlu0 %139 }
  0x95   :  { %185 = vst.msk [vmem:[%s349_s1 + $0x40] sm:$0x1f] %vm35_vm0, %v127_v58  ;;  %184 = vst.msk [vmem:[%s349_s1 + $0x18] sm:$0x1f] %vm35_vm0, %v126_v59  ;;  %v146_v0 = vmax.f32 %v277_v16, %v142_v60  ;;  %v145_v1 = vmax.f32 %v282_v17, %v140_v61 }
  0x98   :  { %v152_v62 = vpop.permute.xlu1 %151  ;;  %v150_v63 = vpop.permute.xlu0 %149 }
  0x99   :  { %v156_v2 = vmax.f32 %v291_v18, %v152_v62  ;;  %v155_v3 = vmax.f32 %v296_v19, %v150_v63 }
  0x9b   :  { %v158_v4 = vmax.f32 %v146_v0, %v156_v2  ;;  %v157_v5 = vmax.f32 %v145_v1, %v155_v3 }
  0x9d   :  { %191 = vst.msk [vmem:[%s349_s1 + $0x48] sm:$0x1f] %vm35_vm0, %v158_v4  ;;  %190 = vst.msk [vmem:[%s349_s1 + $0x20] sm:$0x1f] %vm35_vm0, %v157_v5 }

// kernel: cnn2_forward.11
= control target key start
LH: loop header
LB: loop body
LE: loop exit
PB: predicated region body
PF: predicated region fallthrough
CT: control target
= control target key end

     0   :  { %vm335_vm0 = vcmask 523264   ;;  %s830_s1 = inlined_call_operand.vmem [shape: bf16[576,128], index: 1, kind: input, shape index: {}]   ;;  %s831_s0 = inlined_call_operand.vmem [shape: f32[18,576], index: 0, kind: input, shape index: {}]   ;;  %s832_s2 = inlined_call_operand.vmem [shape: f32[1,128], index: 2, kind: input, shape index: {}]   ;;  %s833_s3 = inlined_call_operand.vmem [shape: f32[18,128], index: 3, kind: output, shape index: {}]  }
   0x1   :  { %v609_v0 = vld [vmem:[%s830_s1 + $0x78] sm:$0xff]   ;;  %v613_v4 = vld [vmem:[%s830_s1 + $0x70] sm:$0xff]   ;;  %v617_v8 = vld [vmem:[%s830_s1 + $0x68] sm:$0xff]  }
   0x2   :  { %v610_v1 = vld [vmem:[%s830_s1 + $0x38] sm:$0xff]   ;;  %535 = vmatprep.subr.bf16.mxu0 %v609_v0  ;;  %v614_v5 = vld [vmem:[%s830_s1 + $0x30] sm:$0xff]   ;;  %v618_v9 = vld [vmem:[%s830_s1 + $0x28] sm:$0xff]  }
   0x3   :  { %v611_v2 = vld [vmem:[%s830_s1 + $0xf8] sm:$0xff]   ;;  %536 = vmatpush3.bf16.msra.mxu0 %v610_v1  ;;  %v615_v6 = vld [vmem:[%s830_s1 + $0xf0] sm:$0xff]   ;;  %v619_v10 = vld [vmem:[%s830_s1 + $0xe8] sm:$0xff]  }
   0x4   :  { %v612_v3 = vld [vmem:[%s830_s1 + $0xb8] sm:$0xff]   ;;  %563 = vmatprep.subr.bf16.mxu1 %v611_v2  ;;  %537 = vmatprep.subr.bf16.mxu0 %v613_v4  ;;  %v616_v7 = vld [vmem:[%s830_s1 + $0xb0] sm:$0xff]   ;;  %v620_v11 = vld [vmem:[%s830_s1 + $0xa8] sm:$0xff]  }
   0x5   :  { %564 = vmatpush3.bf16.msra.mxu1 %v612_v3  ;;  %v621_v12 = vld [vmem:[%s830_s1 + $0x60] sm:$0xff]   ;;  %v625_v16 = vld [vmem:[%s830_s1 + $0x58] sm:$0xff]   ;;  %v629_v20 = vld [vmem:[%s830_s1 + $0x50] sm:$0xff]  }
   0x6   :  { %565 = vmatprep.subr.bf16.mxu1 %v615_v6  ;;  %v622_v13 = vld [vmem:[%s830_s1 + $0x20] sm:$0xff]   ;;  %v626_v17 = vld [vmem:[%s830_s1 + $0x18] sm:$0xff]   ;;  %v630_v21 = vld [vmem:[%s830_s1 + $0x10] sm:$0xff]  }
   0x7   :  { %538 = vmatpush3.bf16.msra.mxu0 %v614_v5  ;;  %v623_v14 = vld [vmem:[%s830_s1 + $0xe0] sm:$0xff]   ;;  %v627_v18 = vld [vmem:[%s830_s1 + $0xd8] sm:$0xff]   ;;  %v631_v22 = vld [vmem:[%s830_s1 + $0xd0] sm:$0xff]  }
   0x8   :  { %539 = vmatprep.subr.bf16.mxu0 %v617_v8  ;;  %v624_v15 = vld [vmem:[%s830_s1 + $0xa0] sm:$0xff]   ;;  %v628_v19 = vld [vmem:[%s830_s1 + $0x98] sm:$0xff]   ;;  %v632_v23 = vld [vmem:[%s830_s1 + $0x90] sm:$0xff]  }
   0x9   :  { %566 = vmatpush3.bf16.msra.mxu1 %v616_v7  ;;  %v633_v24 = vld [vmem:[%s830_s1 + $0x48] sm:$0xff]   ;;  %v637_v28 = vld [vmem:[%s830_s1 + $0x40] sm:$0xff]   ;;  %v21_v32 = vld [vmem:[%s831_s0 + $0x30] sm:$0xff] }
   0xa   :  { %567 = vmatprep.subr.bf16.mxu1 %v619_v10  ;;  %v634_v25 = vld [vmem:[%s830_s1 + $0x8] sm:$0xff]   ;;  %v638_v29 = vld [vmem:[%s830_s1] sm:$0xff]   ;;  %v641_v38 = vld [vmem:[%s830_s1 + $0x118] sm:$0xff]  }
   0xb   :  { %540 = vmatpush3.bf16.msra.mxu0 %v618_v9  ;;  %v635_v26 = vld [vmem:[%s830_s1 + $0xc8] sm:$0xff]   ;;  %v639_v30 = vld [vmem:[%s830_s1 + $0xc0] sm:$0xff]   ;;  %v18_v39 = vld [vmem:[%s831_s0 + $0x18] sm:$0xff] }
   0xc   :  { %541 = vmatprep.subr.bf16.mxu0 %v621_v12  ;;  %v636_v27 = vld [vmem:[%s830_s1 + $0x88] sm:$0xff]   ;;  %v640_v34 = vld [vmem:[%s830_s1 + $0x80] sm:$0xff]   ;;  %v17_v42 = vld [vmem:[%s831_s0 + $0x10] sm:$0xff] }
   0xd   :  { %568 = vmatpush3.bf16.msra.mxu1 %v620_v11  ;;  %v16_v31 = vld [vmem:[%s831_s0 + $0x8] sm:$0xff]  ;;  %v15_v35 = vld [vmem:[%s831_s0] sm:$0xff]  ;;  %v22_v43 = vld [vmem:[%s831_s0 + $0x38] sm:$0xff] }
   0xe   :  { %569 = vmatprep.subr.bf16.mxu1 %v623_v14  ;;  %v31_v33 = vpack.c.bf16 %v21_v32, %v16_v31  ;;  %v20_v36 = vld [vmem:[%s831_s0 + $0x28] sm:$0xff]  ;;  %v23_v40 = vld [vmem:[%s831_s0 + $0x40] sm:$0xff]  ;;  %v32_v44 = vpack.c.bf16 %v22_v43, %v17_v42  ;;  %v642_v45 = vld [vmem:[%s830_s1 + $0x110] sm:$0xff]  }
   0xf   :  { %542 = vmatpush3.bf16.msra.mxu0 %v622_v13  ;;  %v30_v37 = vpack.c.bf16 %v20_v36, %v15_v35  ;;  %v33_v41 = vpack.c.bf16 %v23_v40, %v18_v39  ;;  %v26_v46 = vld [vmem:[%s831_s0 + $0x58] sm:$0x3]  ;;  %v25_v48 = vld [vmem:[%s831_s0 + $0x50] sm:$0x3]  ;;  %v643_v49 = vld [vmem:[%s830_s1 + $0x108] sm:$0xff]  }
  0x10   :  { %543 = vmatprep.subr.bf16.mxu0 %v625_v16  ;;  %374 = vmatprep.mubr.bf16.mxu0 %v31_v33  ;;  %v36_v47 = vpack.c.bf16 %v26_v46, %v26_v46  ;;  %v28_v50 = vld [vmem:[%s831_s0 + $0x68] sm:$0x3]  ;;  %v27_v52 = vld [vmem:[%s831_s0 + $0x60] sm:$0x3]  ;;  %v35_v53 = vpack.c.bf16 %v25_v48, %v25_v48  ;;  %v29_v59 = vld [vmem:[%s831_s0 + $0x70] sm:$0x3] }
  0x11   :  { %570 = vmatpush3.bf16.msra.mxu1 %v624_v15  ;;  %422 = vmatprep.mubr.bf16.mxu1 %v33_v41  ;;  %v38_v51 = vpack.c.bf16 %v28_v50, %v28_v50  ;;  %v19_v54 = vld [vmem:[%s831_s0 + $0x20] sm:$0xff]  ;;  %v24_v55 = vld [vmem:[%s831_s0 + $0x48] sm:$0xff]  ;;  %v37_v57 = vpack.c.bf16 %v27_v52, %v27_v52  ;;  %v39_v60 = vpack.c.bf16 %v29_v59, %v29_v59 }
  0x12   :  { %571 = vmatprep.subr.bf16.mxu1 %v627_v18  ;;  %v34_v56 = vpack.c.bf16 %v24_v55, %v19_v54  ;;  %v644_v58 = vld [vmem:[%s830_s1 + $0x100] sm:$0xff]  }
  0x13   :  { %544 = vmatpush3.bf16.msra.mxu0 %v626_v17  ;;  %v496_v7 = vld [vmem:[%s832_s2] ss:$0 sm:$0xff] }
  0x14   :  { %545 = vmatprep.subr.bf16.mxu0 %v629_v20 }
  0x15   :  { %572 = vmatpush3.bf16.msra.mxu1 %v628_v19 }
  0x16   :  { %573 = vmatprep.subr.bf16.mxu1 %v631_v22 }
  0x17   :  { %546 = vmatpush3.bf16.msra.mxu0 %v630_v21 }
  0x18   :  { %547 = vmatprep.subr.bf16.mxu0 %v633_v24 }
  0x19   :  { %574 = vmatpush3.bf16.msra.mxu1 %v632_v23 }
  0x1a   :  { %575 = vmatprep.subr.bf16.mxu1 %v635_v26 }
  0x1b   :  { %548 = vmatpush3.bf16.msra.mxu0 %v634_v25 }
  0x1c   :  { %549 = vmatprep.subr.bf16.mxu0 %v637_v28 }
  0x1d   :  { %576 = vmatpush3.bf16.msra.mxu1 %v636_v27 }
  0x1e   :  { %577 = vmatprep.subr.bf16.mxu1 %v639_v30 }
  0x1f   :  { %550 = vmatpush3.bf16.msra.mxu0 %v638_v29 }
  0x20   :  { %597 = vmatprep.subr.bf16.mxu0 %v641_v38 }
  0x21   :  { %578 = vmatpush3.bf16.msra.mxu1 %v640_v34 }
  0x22   :  { %375 = vmatmul.mubr.bf16.vlgmr.msra.gmra.mxu0 %v30_v37 }
  0x23   :  { %598 = vmatpush3.bf16.msra.mxu0 %v641_v38  ;;  %382 = vmatprep.mubr.bf16.mxu0 %v36_v47 }
  0x24   :  { %423 = vmatmul.mubr.bf16.vlgmr.msra.gmra.mxu1 %v32_v44  ;;  %599 = vmatprep.subr.bf16.mxu0 %v642_v45 }
  0x25   :  { %430 = vmatprep.mubr.bf16.mxu1 %v38_v51 }
  0x27   :  { %600 = vmatpush3.bf16.msra.mxu0 %v642_v45 }
  0x28   :  { %601 = vmatprep.subr.bf16.mxu0 %v643_v49 }
  0x2a   :  { %383 = vmatmul.mubr.bf16.gmra.mxu0 %v35_v53 }
  0x2b   :  { %602 = vmatpush3.bf16.msra.mxu0 %v643_v49  ;;  %605 = vmatprep.mubr.msk.bf16.mxu0 %vm335_vm0, %v34_v56 }
  0x2c   :  { %431 = vmatmul.mubr.bf16.gmra.mxu1 %v37_v57  ;;  %603 = vmatprep.subr.bf16.mxu0 %v644_v58 }
  0x2f   :  { %604 = vmatpush3.bf16.msra.mxu0 %v644_v58 }
  0x32   :  { %606 = vmatmul.mubr.msk.bf16.vlgmr.msra.gmra.mxu0 %vm335_vm0, %v39_v60 }
  0xe2   :  { %v551_v61 = vpop.f32.mrf.mxu0 }
  0xe4   :  { %v552_v62 = vpop.f32.mrf.mxu0  ;;  %v579_v63 = vpop.f32.mrf.mxu1 }
  0xe5   :  { %v553_v4 = vadd.f32 %v552_v62, %v551_v61 }
  0xe6   :  { %v554_v0 = vpop.f32.mrf.mxu0  ;;  %v580_v1 = vpop.f32.mrf.mxu1 }
  0xe7   :  { %v377_v11 = vadd.f32 %v553_v4, %v496_v7  ;;  %v581_v14 = vadd.f32 %v580_v1, %v579_v63 }
  0xe8   :  { %v555_v2 = vpop.f32.mrf.mxu0  ;;  %v582_v3 = vpop.f32.mrf.mxu1 }
  0xe9   :  { %v556_v15 = vadd.f32 %v555_v2, %v554_v0  ;;  %v425_v26 = vadd.f32 %v581_v14, %v377_v11 }
  0xea   :  { %v557_v5 = vpop.f32.mrf.mxu0  ;;  %v583_v6 = vpop.f32.mrf.mxu1 }
  0xeb   :  { %v380_v23 = vadd.f32 %v556_v15, %v496_v7  ;;  %v584_v24 = vadd.f32 %v583_v6, %v582_v3 }
  0xec   :  { %v558_v8 = vpop.f32.mrf.mxu0  ;;  %v585_v9 = vpop.f32.mrf.mxu1 }
  0xed   :  { %v559_v10 = vadd.f32 %v558_v8, %v557_v5  ;;  %v428_v32 = vadd.f32 %v584_v24, %v380_v23 }
  0xee   :  { %v560_v12 = vpop.f32.mrf.mxu0  ;;  %v586_v13 = vpop.f32.mrf.mxu1 }
  0xef   :  { %v385_v16 = vadd.f32 %v559_v10, %v496_v7  ;;  %v587_v17 = vadd.f32 %v586_v13, %v585_v9 }
  0xf0   :  { %v561_v18 = vpop.f32.mrf.mxu0  ;;  %v588_v19 = vpop.f32.mrf.mxu1 }
  0xf1   :  { %v433_v20 = vadd.f32 %v587_v17, %v385_v16 }
  0xf2   :  { %v607_v21 = vpop.f32.mrf.mxu0  ;;  %v589_v22 = vpop.f32.mrf.mxu1 }
  0xf3   :  { %v481_v25 = vadd.f32 %v607_v21, %v433_v20 }
  0xf4   :  { %v472_v27 = vpop.f32.mrf.mxu0 }
  0xf5   :  { %v488_v28 = vmax.f32 %v481_v25, 0.0  ;;  %v473_v29 = vadd.f32 %v472_v27, %v425_v26 }
  0xf6   :  { %v608_v30 = vpop.f32.mrf.mxu0 }
  0xf7   :  { %491 = vst [vmem:[%s833_s3 + $0x10] sm:$0x3] %v488_v28  ;;  %v486_v31 = vmax.f32 %v473_v29, 0.0 }
  0xf8   :  { %v475_v33 = vpop.f32.mrf.mxu0 }
  0xf9   :  { %489 = vst [vmem:[%s833_s3] sm:$0xff] %v486_v31  ;;  %v476_v34 = vadd.f32 %v475_v33, %v428_v32 }
  0xfb   :  { %v487_v35 = vmax.f32 %v476_v34, 0.0 }
  0xfd   :  { %490 = vst [vmem:[%s833_s3 + $0x8] sm:$0xff] %v487_v35 }

// kernel: cnn2_forward.13
= control target key start
LH: loop header
LB: loop body
LE: loop exit
PB: predicated region body
PF: predicated region fallthrough
CT: control target
= control target key end

     0   :  { %v215_v1 = vmov 0.0   ;;  %vm216_vm0 = vmmov 0   ;;  %s271_s0 = inlined_call_operand.vmem [shape: f32[2,128], index: 0, kind: input, shape index: {}]   ;;  %s272_s1 = inlined_call_operand.vmem [shape: bf16[128,128], index: 1, kind: input, shape index: {}]   ;;  %s273_s2 = inlined_call_operand.vmem [shape: f32[1,128], index: 2, kind: input, shape index: {}]   ;;  %s274_s3 = inlined_call_operand.hbm [shape: f32[2,128], index: 3, kind: output, shape index: {}]  }
   0x1   :  { %v185_v0 = vld [vmem:[%s272_s1 + $0x38] sm:$0xff]   ;;  %162 = vmatprep.subr.bf16.mxu0 %v215_v1  ;;  %v186_v2 = vld [vmem:[%s272_s1 + $0x30] sm:$0xff]   ;;  %178 = vmatprep.mubr.msk.bf16.mxu0 %vm216_vm0, %v215_v1  ;;  %v187_v3 = vld [vmem:[%s272_s1 + $0x28] sm:$0xff]  }
   0x2   :  { %163 = vmatpush3.bf16.msra.mxu0 %v185_v0 }
   0x3   :  { %164 = vmatprep.subr.bf16.mxu0 %v215_v1 }
   0x6   :  { %165 = vmatpush3.bf16.msra.mxu0 %v186_v2 }
   0x7   :  { %166 = vmatprep.subr.bf16.mxu0 %v215_v1 }
   0x8   :  { %8 = vsyncpa [#allocation3], 0  ;;  %v188_v4 = vld [vmem:[%s272_s1 + $0x20] sm:$0xff]   ;;  %v189_v5 = vld [vmem:[%s272_s1 + $0x18] sm:$0xff]   ;;  %s217_s5 = smov [#allocation2]  }
   0x9   :  { %v190_v6 = vld [vmem:[%s272_s1 + $0x10] sm:$0xff]   ;;  %v191_v7 = vld [vmem:[%s272_s1 + $0x8] sm:$0xff]   ;;  %v192_v8 = vld [vmem:[%s272_s1] sm:$0xff]   ;;  %s136_s6 = sshll.u32 %s217_s5, 4  ;;  %s137_s6 = int_to_ptr.vmem [resolvable:$true] %s136_s6 }
   0xa   :  { %167 = vmatpush3.bf16.msra.mxu0 %v187_v3  ;;  %v16_v9 = vld [vmem:[%s271_s0] sm:$0x3]  ;;  %s193_s1 = scalar_lea.vmem %s137_s6, 32  ;;  %p198_p1 = scmp.lt.s32.totalorder %s137_s6, %s137_s6 }
   0xb   :  { %168 = vmatprep.subr.bf16.mxu0 %v215_v1  ;;  %v17_v10 = vpack.c.bf16 %v16_v9, %v16_v9  ;;  %v144_v11 = vld [vmem:[%s273_s2] ss:$0 sm:$0xff]  ;;  %p194_p0 = scmp.ne.s32.totalorder %s137_s6, %s193_s1  ;;  %p199_p2 = scmp.lt.s32.totalorder %s193_s1, %s193_s1 }
   0xd   :  { %p200_p3 = por %p199_p2, %p198_p1 }
   0xe   :  { %169 = vmatpush3.bf16.msra.mxu0 %v188_v4 }
   0xf   :  { %170 = vmatprep.subr.bf16.mxu0 %v215_v1  ;;  %p201_p4 = pnand %p200_p3, %p194_p0 }
  0x12   :  { %171 = vmatpush3.bf16.msra.mxu0 %v189_v5 }
  0x13   :  { %172 = vmatprep.subr.bf16.mxu0 %v215_v1 }
  0x16   :  { %173 = vmatpush3.bf16.msra.mxu0 %v190_v6 }
  0x17   :  { %174 = vmatprep.subr.bf16.mxu0 %v215_v1 }
  0x1a   :  { %175 = vmatpush3.bf16.msra.mxu0 %v191_v7 }
  0x1b   :  { %176 = vmatprep.subr.bf16.mxu0 %v215_v1 }
  0x1e   :  { %177 = vmatpush3.bf16.msra.mxu0 %v192_v8 }
  0x21   :  { %179 = vmatmul.mubr.bf16.vlgmr.msra.gmra.mxu0 %v17_v10 }
  0xe1   :  { %v123_v12 = vpop.f32.mrf.mxu0 }
  0xe2   :  { %v124_v13 = vadd.f32 %v144_v11, %v123_v12 }
  0xe3   :  { %v180_v14 = vpop.f32.mrf.mxu0 }
  0xe4   :  { %129 = vst [vmem:[#allocation2] sm:$0x3] %v124_v13 }
  0xe5   :  { %v126_v15 = vpop.f32.mrf.mxu0 }
  0xe6   :  { %204 = shalt.err (!%p201_p4)
}
  0xe7   :  { %139 = dma.vmem_to_hbm [thread:$0]  %s137_s6, 32, %s274_s3, [#allocation3]   ;;  %v181_v16 = vpop.f32.mrf.mxu0 }
  0xe8   :  { %213 = dma.done.wait [#allocation3], 32  }
  0xe9   :  { %214 = vsyncadd [#allocation3], 4294967264 }
  0xea   :  { %143 = vsyncpa [#allocation3], 1 }

// kernel: cnn2_forward.12
= control target key start
LH: loop header
LB: loop body
LE: loop exit
PB: predicated region body
PF: predicated region fallthrough
CT: control target
= control target key end

     0   :  { %v1137_v21 = vmov 1983009808   ;;  %v25_v23 = vlaneseq  ;;  %vm1139_vm0 = vmmov 0   ;;  %s1397_s1 = inlined_call_operand.vmem [shape: bf16[1152,128], index: 1, kind: input, shape index: {}]   ;;  %s1398_s0 = inlined_call_operand.vmem [shape: f32[2,1152], index: 0, kind: input, shape index: {}]   ;;  %s1399_s2 = inlined_call_operand.vmem [shape: f32[1,128], index: 2, kind: input, shape index: {}]   ;;  %s1400_s3 = inlined_call_operand.vmem [shape: f32[2,128], index: 3, kind: output, shape index: {}]  }
   0x1   :  { %v1063_v0 = vld [vmem:[%s1397_s1 + $0x78] sm:$0xff]   ;;  %v1067_v4 = vld [vmem:[%s1397_s1 + $0x70] sm:$0xff]   ;;  %v1071_v8 = vld [vmem:[%s1397_s1 + $0x68] sm:$0xff]   ;;  %v23_v22 = vunpack.c.l.s4 %v1137_v21 }
   0x2   :  { %v1064_v1 = vld [vmem:[%s1397_s1 + $0x38] sm:$0xff]   ;;  %943 = vmatprep.subr.bf16.mxu0 %v1063_v0  ;;  %v1068_v5 = vld [vmem:[%s1397_s1 + $0x30] sm:$0xff]   ;;  %v1072_v9 = vld [vmem:[%s1397_s1 + $0x28] sm:$0xff]   ;;  %v26_v29 = vshrl.u32 %v25_v23, 7 }
   0x3   :  { %v1065_v2 = vld [vmem:[%s1397_s1 + $0xf8] sm:$0xff]   ;;  %944 = vmatpush3.bf16.msra.mxu0 %v1064_v1  ;;  %v1069_v6 = vld [vmem:[%s1397_s1 + $0xf0] sm:$0xff]   ;;  %v1073_v10 = vld [vmem:[%s1397_s1 + $0xe8] sm:$0xff]   ;;  %v24_v28 = vunpack.c.0.s8 %v23_v22 }
   0x4   :  { %v1066_v3 = vld [vmem:[%s1397_s1 + $0xb8] sm:$0xff]   ;;  %965 = vmatprep.subr.bf16.mxu1 %v1065_v2  ;;  %945 = vmatprep.subr.bf16.mxu0 %v1067_v4  ;;  %v1070_v7 = vld [vmem:[%s1397_s1 + $0xb0] sm:$0xff]   ;;  %v1074_v11 = vld [vmem:[%s1397_s1 + $0xa8] sm:$0xff]  }
   0x5   :  { %966 = vmatpush3.bf16.msra.mxu1 %v1066_v3  ;;  %v1075_v12 = vld [vmem:[%s1397_s1 + $0x60] sm:$0xff]   ;;  %v1079_v16 = vld [vmem:[%s1397_s1 + $0x58] sm:$0xff]   ;;  %v1083_v20 = vld [vmem:[%s1397_s1 + $0x50] sm:$0xff]   ;;  %v1247_v34 = vsub.s32 %v24_v28, %v26_v29 }
   0x6   :  { %967 = vmatprep.subr.bf16.mxu1 %v1069_v6  ;;  %v1076_v13 = vld [vmem:[%s1397_s1 + $0x20] sm:$0xff]   ;;  %v1080_v17 = vld [vmem:[%s1397_s1 + $0x18] sm:$0xff]   ;;  %v1084_v24 = vld [vmem:[%s1397_s1 + $0x10] sm:$0xff]  }
   0x7   :  { %946 = vmatpush3.bf16.msra.mxu0 %v1068_v5  ;;  %v1077_v14 = vld [vmem:[%s1397_s1 + $0xe0] sm:$0xff]   ;;  %v1081_v18 = vld [vmem:[%s1397_s1 + $0xd8] sm:$0xff]   ;;  %v1085_v25 = vld [vmem:[%s1397_s1 + $0xd0] sm:$0xff]  }
   0x8   :  { %947 = vmatprep.subr.bf16.mxu0 %v1071_v8  ;;  %v1078_v15 = vld [vmem:[%s1397_s1 + $0xa0] sm:$0xff]   ;;  %v1082_v19 = vld [vmem:[%s1397_s1 + $0x98] sm:$0xff]   ;;  %v1086_v26 = vld [vmem:[%s1397_s1 + $0x90] sm:$0xff]  }
   0x9   :  { %968 = vmatpush3.bf16.msra.mxu1 %v1070_v7  ;;  %v1087_v27 = vld [vmem:[%s1397_s1 + $0x48] sm:$0xff]   ;;  %v1091_v33 = vld [vmem:[%s1397_s1 + $0x40] sm:$0xff]   ;;  %v1095_v41 = vld [vmem:[%s1397_s1 + $0x178] sm:$0xff]  }
   0xa   :  { %969 = vmatprep.subr.bf16.mxu1 %v1073_v10  ;;  %v1088_v30 = vld [vmem:[%s1397_s1 + $0x8] sm:$0xff]   ;;  %v1092_v35 = vld [vmem:[%s1397_s1] sm:$0xff]   ;;  %v1098_v45 = vld [vmem:[%s1397_s1 + $0x1f8] sm:$0xff]  }
   0xb   :  { %948 = vmatpush3.bf16.msra.mxu0 %v1072_v9  ;;  %v1089_v31 = vld [vmem:[%s1397_s1 + $0xc8] sm:$0xff]   ;;  %v1093_v36 = vld [vmem:[%s1397_s1 + $0xc0] sm:$0xff]   ;;  %v1097_v48 = vld [vmem:[%s1397_s1 + $0x138] sm:$0xff]  }
   0xc   :  { %949 = vmatprep.subr.bf16.mxu0 %v1075_v12  ;;  %v1090_v32 = vld [vmem:[%s1397_s1 + $0x88] sm:$0xff]   ;;  %v15_v37 = vld [vmem:[%s1398_s0] sm:$0xff]  ;;  %v1100_v50 = vld [vmem:[%s1397_s1 + $0x170] sm:$0xff]  }
   0xd   :  { %970 = vmatpush3.bf16.msra.mxu1 %v1074_v11  ;;  %v28_v38 = vrot.slane %v15_v37, %v1247_v34  ;;  %v1094_v39 = vld [vmem:[%s1397_s1 + $0x80] sm:$0xff]   ;;  %v21_v40 = vcombine.high %v15_v37, %v15_v37  ;;  %v1099_v52 = vld [vmem:[%s1397_s1 + $0x1b8] sm:$0xff]   ;;  %v1102_v53 = vld [vmem:[%s1397_s1 + $0x1f0] sm:$0xff]  }
   0xe   :  { %971 = vmatprep.subr.bf16.mxu1 %v1077_v14  ;;  %v1101_v54 = vld [vmem:[%s1397_s1 + $0x130] sm:$0xff]   ;;  %v1104_v55 = vld [vmem:[%s1397_s1 + $0x168] sm:$0xff]   ;;  %v1108_v59 = vld [vmem:[%s1397_s1 + $0x160] sm:$0xff]  }
   0xf   :  { %950 = vmatpush3.bf16.msra.mxu0 %v1076_v13  ;;  %v36_v42 = vcombine.high %v28_v38, %v28_v38  ;;  %v35_v43 = vrot.slane %v21_v40, %v1247_v34  ;;  %v71_v44 = vpack.c.bf16 %v28_v38, %v28_v38  ;;  %v1103_v56 = vld [vmem:[%s1397_s1 + $0x1b0] sm:$0xff]   ;;  %v1106_v57 = vld [vmem:[%s1397_s1 + $0x1e8] sm:$0xff]   ;;  %v1110_v61 = vld [vmem:[%s1397_s1 + $0x1e0] sm:$0xff]  }
  0x10   :  { %951 = vmatprep.subr.bf16.mxu0 %v1079_v16  ;;  %v1105_v58 = vld [vmem:[%s1397_s1 + $0x128] sm:$0xff]   ;;  %v1109_v62 = vld [vmem:[%s1397_s1 + $0x120] sm:$0xff]   ;;  %v1112_v63 = vld [vmem:[%s1397_s1 + $0x158] sm:$0xff]  }
  0x11   :  { %972 = vmatpush3.bf16.msra.mxu1 %v1078_v15  ;;  %v72_v46 = vpack.c.bf16 %v36_v42, %v36_v42  ;;  %v37_v47 = vcombine.high %v35_v43, %v35_v43  ;;  %v73_v49 = vpack.c.bf16 %v35_v43, %v35_v43  ;;  %v1107_v60 = vld [vmem:[%s1397_s1 + $0x1a8] sm:$0xff]   ;;  %v1111_v0 = vld [vmem:[%s1397_s1 + $0x1a0] sm:$0xff]   ;;  %v1114_v1 = vld [vmem:[%s1397_s1 + $0x1d8] sm:$0xff]  }
  0x12   :  { %973 = vmatprep.subr.bf16.mxu1 %v1081_v18  ;;  %v1113_v2 = vld [vmem:[%s1397_s1 + $0x118] sm:$0xff]   ;;  %v1116_v3 = vld [vmem:[%s1397_s1 + $0x150] sm:$0xff]   ;;  %v1120_v7 = vld [vmem:[%s1397_s1 + $0x148] sm:$0xff]  }
  0x13   :  { %952 = vmatpush3.bf16.msra.mxu0 %v1080_v17  ;;  %695 = vmatprep.mubr.bf16.mxu0 %v72_v46  ;;  %v74_v51 = vpack.c.bf16 %v37_v47, %v37_v47  ;;  %v1115_v4 = vld [vmem:[%s1397_s1 + $0x198] sm:$0xff]   ;;  %v1118_v5 = vld [vmem:[%s1397_s1 + $0x1d0] sm:$0xff]   ;;  %v1122_v9 = vld [vmem:[%s1397_s1 + $0x1c8] sm:$0xff]  }
  0x14   :  { %953 = vmatprep.subr.bf16.mxu0 %v1083_v20  ;;  %v1117_v6 = vld [vmem:[%s1397_s1 + $0x110] sm:$0xff]   ;;  %v1121_v10 = vld [vmem:[%s1397_s1 + $0x108] sm:$0xff]   ;;  %v1124_v11 = vld [vmem:[%s1397_s1 + $0x140] sm:$0xff]  }
  0x15   :  { %974 = vmatpush3.bf16.msra.mxu1 %v1082_v19  ;;  %735 = vmatprep.mubr.bf16.mxu1 %v74_v51  ;;  %v1119_v8 = vld [vmem:[%s1397_s1 + $0x190] sm:$0xff]   ;;  %v1123_v12 = vld [vmem:[%s1397_s1 + $0x188] sm:$0xff]   ;;  %v1126_v13 = vld [vmem:[%s1397_s1 + $0x1c0] sm:$0xff]  }
  0x16   :  { %975 = vmatprep.subr.bf16.mxu1 %v1085_v25  ;;  %v16_v14 = vld [vmem:[%s1398_s0 + $0x8] sm:$0xff]  ;;  %v1125_v15 = vld [vmem:[%s1397_s1 + $0x100] sm:$0xff]   ;;  %v1138_v25 = vmov 0.0   ;;  %v1130_v28 = vld [vmem:[%s1397_s1 + $0x230] sm:$0xff]  }
  0x17   :  { %954 = vmatpush3.bf16.msra.mxu0 %v1084_v24  ;;  %v45_v16 = vrot.slane %v16_v14, %v1247_v34  ;;  %v38_v17 = vcombine.high %v16_v14, %v16_v14  ;;  %v1127_v19 = vld [vmem:[%s1397_s1 + $0x180] sm:$0xff]   ;;  %v1129_v24 = vld [vmem:[%s1397_s1 + $0x238] sm:$0xff]   ;;  %v1131_v29 = vld [vmem:[%s1397_s1 + $0x228] sm:$0xff]  }
  0x18   :  { %955 = vmatprep.subr.bf16.mxu0 %v1087_v27 }
  0x19   :  { %976 = vmatpush3.bf16.msra.mxu1 %v1086_v26  ;;  %v53_v18 = vcombine.high %v45_v16, %v45_v16  ;;  %v52_v20 = vrot.slane %v38_v17, %v1247_v34  ;;  %v75_v21 = vpack.c.bf16 %v45_v16, %v45_v16  ;;  %v1136_v34 = vld [vmem:[%s1397_s1 + $0x200] sm:$0xff]  }
  0x1a   :  { %977 = vmatprep.subr.bf16.mxu1 %v1089_v31  ;;  %v1133_v31 = vld [vmem:[%s1397_s1 + $0x218] sm:$0xff]  }
  0x1b   :  { %956 = vmatpush3.bf16.msra.mxu0 %v1088_v30  ;;  %v76_v22 = vpack.c.bf16 %v53_v18, %v53_v18  ;;  %v54_v23 = vcombine.high %v52_v20, %v52_v20  ;;  %v77_v26 = vpack.c.bf16 %v52_v20, %v52_v20  ;;  %v1132_v30 = vld [vmem:[%s1397_s1 + $0x220] sm:$0xff]  }
  0x1c   :  { %957 = vmatprep.subr.bf16.mxu0 %v1091_v33  ;;  %v1135_v33 = vld [vmem:[%s1397_s1 + $0x208] sm:$0xff]  }
  0x1d   :  { %978 = vmatpush3.bf16.msra.mxu1 %v1090_v32  ;;  %v78_v27 = vpack.c.bf16 %v54_v23, %v54_v23  ;;  %v1134_v32 = vld [vmem:[%s1397_s1 + $0x210] sm:$0xff]  }
  0x1e   :  { %979 = vmatprep.subr.bf16.mxu1 %v1093_v36 }
  0x1f   :  { %958 = vmatpush3.bf16.msra.mxu0 %v1092_v35  ;;  %v869_v35 = vld.sshfl [vmem:[%s1398_s0 + $0x10] sm:$0x3 pattern:$0x76325410] }
  0x20   :  { %987 = vmatprep.subr.bf16.mxu0 %v1095_v41  ;;  %v79_v36 = vpack.c.bf16 %v869_v35, %v869_v35 }
  0x21   :  { %980 = vmatpush3.bf16.msra.mxu1 %v1094_v39 }
  0x22   :  { %1009 = vmatprep.subr.bf16.mxu1 %v1098_v45  ;;  %696 = vmatmul.mubr.bf16.vlgmr.msra.gmra.mxu0 %v71_v44 }
  0x23   :  { %988 = vmatpush3.bf16.msra.mxu0 %v1097_v48  ;;  %775 = vmatprep.mubr.bf16.mxu0 %v76_v22 }
  0x24   :  { %736 = vmatmul.mubr.bf16.vlgmr.msra.gmra.mxu1 %v73_v49  ;;  %989 = vmatprep.subr.bf16.mxu0 %v1100_v50 }
  0x25   :  { %1010 = vmatpush3.bf16.msra.mxu1 %v1099_v52  ;;  %815 = vmatprep.mubr.bf16.mxu1 %v78_v27 }
  0x26   :  { %1011 = vmatprep.subr.bf16.mxu1 %v1102_v53 }
  0x27   :  { %990 = vmatpush3.bf16.msra.mxu0 %v1101_v54  ;;  %v870_v54 = vld [vmem:[%s1399_s2] ss:$0 sm:$0xff] }
  0x28   :  { %991 = vmatprep.subr.bf16.mxu0 %v1104_v55 }
  0x29   :  { %1012 = vmatpush3.bf16.msra.mxu1 %v1103_v56 }
  0x2a   :  { %1013 = vmatprep.subr.bf16.mxu1 %v1106_v57 }
  0x2b   :  { %992 = vmatpush3.bf16.msra.mxu0 %v1105_v58 }
  0x2c   :  { %993 = vmatprep.subr.bf16.mxu0 %v1108_v59 }
  0x2d   :  { %1014 = vmatpush3.bf16.msra.mxu1 %v1107_v60 }
  0x2e   :  { %1015 = vmatprep.subr.bf16.mxu1 %v1110_v61 }
  0x2f   :  { %994 = vmatpush3.bf16.msra.mxu0 %v1109_v62 }
  0x30   :  { %995 = vmatprep.subr.bf16.mxu0 %v1112_v63 }
  0x31   :  { %1016 = vmatpush3.bf16.msra.mxu1 %v1111_v0 }
  0x32   :  { %1017 = vmatprep.subr.bf16.mxu1 %v1114_v1 }
  0x33   :  { %996 = vmatpush3.bf16.msra.mxu0 %v1113_v2 }
  0x34   :  { %997 = vmatprep.subr.bf16.mxu0 %v1116_v3 }
  0x35   :  { %1018 = vmatpush3.bf16.msra.mxu1 %v1115_v4 }
  0x36   :  { %1019 = vmatprep.subr.bf16.mxu1 %v1118_v5 }
  0x37   :  { %998 = vmatpush3.bf16.msra.mxu0 %v1117_v6 }
  0x38   :  { %999 = vmatprep.subr.bf16.mxu0 %v1120_v7 }
  0x39   :  { %1020 = vmatpush3.bf16.msra.mxu1 %v1119_v8 }
  0x3a   :  { %1021 = vmatprep.subr.bf16.mxu1 %v1122_v9 }
  0x3b   :  { %1000 = vmatpush3.bf16.msra.mxu0 %v1121_v10 }
  0x3c   :  { %1001 = vmatprep.subr.bf16.mxu0 %v1124_v11 }
  0x3d   :  { %1022 = vmatpush3.bf16.msra.mxu1 %v1123_v12 }
  0x3e   :  { %1023 = vmatprep.subr.bf16.mxu1 %v1126_v13 }
  0x3f   :  { %1002 = vmatpush3.bf16.msra.mxu0 %v1125_v15 }
  0x40   :  { %1040 = vmatprep.subr.bf16.mxu0 %v1138_v25 }
  0x41   :  { %1024 = vmatpush3.bf16.msra.mxu1 %v1127_v19 }
  0x42   :  { %776 = vmatmul.mubr.bf16.vlgmr.msra.gmra.mxu0 %v75_v21 }
  0x43   :  { %1041 = vmatpush3.bf16.msra.mxu0 %v1129_v24  ;;  %1056 = vmatprep.mubr.msk.bf16.mxu0 %vm1139_vm0, %v1138_v25 }
  0x44   :  { %816 = vmatmul.mubr.bf16.vlgmr.msra.gmra.mxu1 %v77_v26  ;;  %1042 = vmatprep.subr.bf16.mxu0 %v1138_v25 }
  0x47   :  { %1043 = vmatpush3.bf16.msra.mxu0 %v1130_v28 }
  0x48   :  { %1044 = vmatprep.subr.bf16.mxu0 %v1138_v25 }
  0x4b   :  { %1045 = vmatpush3.bf16.msra.mxu0 %v1131_v29 }
  0x4c   :  { %1046 = vmatprep.subr.bf16.mxu0 %v1138_v25 }
  0x4f   :  { %1047 = vmatpush3.bf16.msra.mxu0 %v1132_v30 }
  0x50   :  { %1048 = vmatprep.subr.bf16.mxu0 %v1138_v25 }
  0x53   :  { %1049 = vmatpush3.bf16.msra.mxu0 %v1133_v31 }
  0x54   :  { %1050 = vmatprep.subr.bf16.mxu0 %v1138_v25 }
  0x57   :  { %1051 = vmatpush3.bf16.msra.mxu0 %v1134_v32 }
  0x58   :  { %1052 = vmatprep.subr.bf16.mxu0 %v1138_v25 }
  0x5b   :  { %1053 = vmatpush3.bf16.msra.mxu0 %v1135_v33 }
  0x5c   :  { %1054 = vmatprep.subr.bf16.mxu0 %v1138_v25 }
  0x5f   :  { %1055 = vmatpush3.bf16.msra.mxu0 %v1136_v34 }
  0x62   :  { %1057 = vmatmul.mubr.bf16.vlgmr.msra.gmra.mxu0 %v79_v36 }
  0xe2   :  { %v959_v37 = vpop.f32.mrf.mxu0 }
  0xe4   :  { %v960_v38 = vpop.f32.mrf.mxu0  ;;  %v981_v39 = vpop.f32.mrf.mxu1 }
  0xe5   :  { %v961_v53 = vadd.f32 %v960_v38, %v959_v37 }
  0xe6   :  { %v962_v40 = vpop.f32.mrf.mxu0  ;;  %v982_v41 = vpop.f32.mrf.mxu1 }
  0xe7   :  { %v698_v55 = vadd.f32 %v961_v53, %v870_v54  ;;  %v983_v56 = vadd.f32 %v982_v41, %v981_v39 }
  0xe8   :  { %v963_v42 = vpop.f32.mrf.mxu0  ;;  %v984_v43 = vpop.f32.mrf.mxu1 }
  0xe9   :  { %v738_v58 = vadd.f32 %v983_v56, %v698_v55 }
  0xea   :  { %v985_v44 = vpop.f32.mrf.mxu1 }
 0x102   :  { %v1003_v45 = vpop.f32.mrf.mxu0 }
 0x104   :  { %v1004_v46 = vpop.f32.mrf.mxu0  ;;  %v1025_v47 = vpop.f32.mrf.mxu1 }
 0x105   :  { %v1005_v57 = vadd.f32 %v1004_v46, %v1003_v45 }
 0x106   :  { %v1006_v48 = vpop.f32.mrf.mxu0  ;;  %v1026_v49 = vpop.f32.mrf.mxu1 }
 0x107   :  { %v778_v59 = vadd.f32 %v1005_v57, %v738_v58  ;;  %v1027_v60 = vadd.f32 %v1026_v49, %v1025_v47 }
 0x108   :  { %v1007_v50 = vpop.f32.mrf.mxu0  ;;  %v1028_v51 = vpop.f32.mrf.mxu1 }
 0x109   :  { %v818_v61 = vadd.f32 %v1027_v60, %v778_v59 }
 0x10a   :  { %v1029_v52 = vpop.f32.mrf.mxu1 }
 0x122   :  { %v857_v62 = vpop.f32.mrf.mxu0 }
 0x123   :  { %v858_v63 = vadd.f32 %v857_v62, %v818_v61 }
 0x124   :  { %v1058_v0 = vpop.f32.mrf.mxu0 }
 0x125   :  { %v863_v1 = vmax.f32 %v858_v63, 0.0 }
 0x126   :  { %v860_v2 = vpop.f32.mrf.mxu0 }
 0x127   :  { %864 = vst [vmem:[%s1400_s3] sm:$0x3] %v863_v1 }
 0x128   :  { %v1059_v3 = vpop.f32.mrf.mxu0 }

</bundles_post_ra>
